<compile_context>
chip_gen: v7x
topology: tpu7x:2x2x1
jax: 0.10.0
libtpu: 0.0.40
codegen_flags: <defaults>
</compile_context>

<pallas_src>
import functools

import jax
import jax.numpy as jnp
from jax.experimental import pallas as pl
from jax.experimental.pallas import tpu as pltpu

KS = 4               # conv kernel size
BN_EPS = 1e-5
LEAKY_SLOPE = 0.2
LANE = 128
VMEM_LIMIT = 32 * 1024 * 1024   # explicit scoped-VMEM limit (safe on v5e/v6e/v7x)


def _round_up(x, m):
    return (x + m - 1) // m * m


# ----------------------------- Pallas kernels ------------------------------ #
def _apply_act(y, act):
    # f32 elementwise math (v5e has no bf16 VPU/EUP path).
    if act == "leaky_relu":
        return jnp.where(y >= 0.0, y, LEAKY_SLOPE * y)
    if act == "relu":
        return jnp.maximum(y, 0.0)
    if act == "sigmoid":
        return jax.nn.sigmoid(y)
    return y


def _down_first_kernel(p_ref, w_ref, b_ref, o_ref, *, act):
    """First encoder block (no norm): y = patches @ W + b ; activation."""
    y = jnp.dot(p_ref[...], w_ref[...], preferred_element_type=jnp.float32)
    y = y + b_ref[...]
    o_ref[...] = _apply_act(y, act).astype(o_ref.dtype)


def _down_bn_kernel(p_ref, w_ref, o_ref, *, act):
    """Encoder block: conv matmul + train-mode BN (gamma=1, beta=0) + act,
    all fused — y never leaves VMEM between matmul and normalize."""
    y = jnp.dot(p_ref[...], w_ref[...], preferred_element_type=jnp.float32)
    mean = jnp.mean(y, axis=0, keepdims=True)
    var = jnp.maximum(jnp.mean(y * y, axis=0, keepdims=True) - mean * mean, 0.0)
    rstd = jax.lax.rsqrt(var + BN_EPS)
    o_ref[...] = _apply_act((y - mean) * rstd, act).astype(o_ref.dtype)


def _up_bn_kernel(p_ref, w_ref, o_ref, *, act, inv_m):
    """Decoder block: 4 ConvTranspose parity-phase matmuls + BN stats over the
    full (all-phase) output + normalize + act, fused in one kernel.

    p_ref: (4, M, K) bf16 phase patches; w_ref: (4, K, Co_pad) bf16 phase
    weights; o_ref: (4, M, Co_pad) bf16 phase outputs (interleaved in XLA)."""
    ys = []
    for ph in range(4):
        ys.append(jnp.dot(p_ref[ph], w_ref[ph],
                          preferred_element_type=jnp.float32))
    s0 = sum(jnp.sum(y, axis=0, keepdims=True) for y in ys)
    s1 = sum(jnp.sum(y * y, axis=0, keepdims=True) for y in ys)
    mean = s0 * inv_m
    var = jnp.maximum(s1 * inv_m - mean * mean, 0.0)
    rstd = jax.lax.rsqrt(var + BN_EPS)
    for ph in range(4):
        o_ref[ph] = _apply_act((ys[ph] - mean) * rstd, act).astype(o_ref.dtype)


# --------------------------- Pallas call wrappers --------------------------- #
def _compiler_params():
    return pltpu.CompilerParams(dimension_semantics=("arbitrary",),
                                vmem_limit_bytes=VMEM_LIMIT)


def _fused_down(patches, w_mat, bias, *, act, use_bn):
    """patches (M,K) bf16, w_mat (K,Co_pad) bf16 -> (M,Co_pad) bf16."""
    m, k = patches.shape
    co_pad = w_mat.shape[1]
    cost = pl.CostEstimate(
        flops=2 * m * k * co_pad + 8 * m * co_pad,
        transcendentals=m * co_pad if act == "sigmoid" else 0,
        bytes_accessed=m * k * 2 + k * co_pad * 2 + m * co_pad * 2)
    if use_bn:
        kern = functools.partial(_down_bn_kernel, act=act)
        args = (patches, w_mat)
        in_specs = [pl.BlockSpec((m, k), lambda i: (0, 0)),
                    pl.BlockSpec((k, co_pad), lambda i: (0, 0))]
    else:
        kern = functools.partial(_down_first_kernel, act=act)
        args = (patches, w_mat, bias)
        in_specs = [pl.BlockSpec((m, k), lambda i: (0, 0)),
                    pl.BlockSpec((k, co_pad), lambda i: (0, 0)),
                    pl.BlockSpec((1, co_pad), lambda i: (0, 0))]
    return pl.pallas_call(
        kern,
        out_shape=jax.ShapeDtypeStruct((m, co_pad), jnp.bfloat16),
        grid=(1,),
        in_specs=in_specs,
        out_specs=pl.BlockSpec((m, co_pad), lambda i: (0, 0)),
        compiler_params=_compiler_params(),
        cost_estimate=cost,
    )(*args)


def _fused_up(patches, w_phases, *, act):
    """patches (4,M,K) bf16, w_phases (4,K,Co_pad) bf16 -> (4,M,Co_pad) bf16."""
    _, m, k = patches.shape
    co_pad = w_phases.shape[2]
    cost = pl.CostEstimate(
        flops=4 * (2 * m * k * co_pad + 8 * m * co_pad),
        transcendentals=4 * m * co_pad if act == "sigmoid" else 0,
        bytes_accessed=4 * (m * k * 2 + k * co_pad * 2 + m * co_pad * 2))
    return pl.pallas_call(
        functools.partial(_up_bn_kernel, act=act, inv_m=1.0 / float(4 * m)),
        out_shape=jax.ShapeDtypeStruct((4, m, co_pad), jnp.bfloat16),
        grid=(1,),
        in_specs=[pl.BlockSpec((4, m, k), lambda i: (0, 0, 0)),
                  pl.BlockSpec((4, k, co_pad), lambda i: (0, 0, 0))],
        out_specs=pl.BlockSpec((4, m, co_pad), lambda i: (0, 0, 0)),
        compiler_params=_compiler_params(),
        cost_estimate=cost,
    )(patches, w_phases)


# ------------------------------ im2col (NHWC) ------------------------------ #
def _im2col_down(x):
    """Conv2d(k4,s2,p1) patches: (N*Ho*Wo, 16*Cin) bf16, row order (kh,kw,ci)."""
    n, h, w, c = x.shape
    ho, wo = h // 2, w // 2
    xp = jnp.pad(x, ((0, 0), (1, 1), (1, 1), (0, 0)))
    cols = [xp[:, a:a + 2 * ho:2, b:b + 2 * wo:2, :]
            for a in range(KS) for b in range(KS)]
    p = jnp.stack(cols, axis=3)                       # (N, Ho, Wo, 16, C)
    return p.reshape(n * ho * wo, KS * KS * c), (n, ho, wo)


def _im2col_up(x):
    """ConvTranspose2d(k4,s2,p1) 2x2-tap patches for the 4 output parities.

    Returns (4, N*H*W, 4*Cin) bf16; phase index = 2*py + px; row order
    within K is (dr, dc, ci)."""
    n, h, w, c = x.shape
    xp = jnp.pad(x, ((0, 0), (1, 1), (1, 1), (0, 0)))
    phases = []
    for py in range(2):
        for px in range(2):
            cols = [xp[:, py + dr:py + dr + h, px + dc:px + dc + w, :]
                    for dr in range(2) for dc in range(2)]
            p = jnp.stack(cols, axis=3)               # (N, H, W, 4, C)
            phases.append(p.reshape(n * h * w, 4 * c))
    return jnp.stack(phases, axis=0), (n, h, w)


# ------------------------------- UNet blocks -------------------------------- #
def conv_down(x, w_mat, bias, co, *, act, use_bn):
    """NHWC bf16 -> NHWC bf16: Conv2d(k4,s2,p1) + (BatchNorm) + activation."""
    patches, (n, ho, wo) = _im2col_down(x)
    out = _fused_down(patches, w_mat, bias, act=act, use_bn=use_bn)
    return out.reshape(n, ho, wo, -1)[..., :co]


def conv_up(x, w_phases, co, *, act):
    """NHWC bf16 -> NHWC bf16: ConvTranspose2d(k4,s2,p1) + BatchNorm + act.

    All 4 output-parity phases run in one fused kernel; the interleave back to
    (N, 2H, 2W, C) is a small bf16 reshuffle fused by XLA with the next
    layer's patch construction."""
    patches, (n, h, w) = _im2col_up(x)
    out = _fused_up(patches, w_phases, act=act)       # (4, M, Co_pad)
    co_pad = out.shape[-1]
    y = out.reshape(2, 2, n, h, w, co_pad).transpose(2, 3, 0, 4, 1, 5)
    return y.reshape(n, 2 * h, 2 * w, co_pad)[..., :co]


# ------------------------------ UNet forward -------------------------------- #
def unet_forward(x_nchw, enc_prep, dec_prep, *, enc_cout, dec_cout):
    # NCHW at the module boundary; NHWC bf16 internally.
    h = jnp.transpose(x_nchw, (0, 2, 3, 1)).astype(jnp.bfloat16)

    # Encoder: Conv2d + LeakyReLU(0.2); no norm on the first block, BN after.
    feats = []
    n_enc = len(enc_prep)
    for i, prm in enumerate(enc_prep):
        h = conv_down(h, prm["w"], prm.get("b"), enc_cout[i],
                      act="leaky_relu", use_bn=(i != 0))
        if i < n_enc - 1:
            feats.append(h)
    feats = feats[::-1]

    # Decoder: ConvTranspose2d + BN + ReLU with skip concat; last block BN +
    # Sigmoid (the spec's last UNetBlock also carries BatchNorm).
    n_dec = len(dec_prep)
    for i, prm in enumerate(dec_prep):
        is_last = i == n_dec - 1
        h = conv_up(h, prm["w_phases"], dec_cout[i],
                    act=("sigmoid" if is_last else "relu"))
        if not is_last:
            h = jnp.concatenate([h, feats[i]], axis=-1)

    return jnp.transpose(h, (0, 3, 1, 2)).astype(jnp.float32)


# ------------------------ weight prep (done once) --------------------------- #
def _prep_enc_weight(w, co_pad):
    """Conv2d weight (Cout,Cin,4,4) -> bf16 (16*Cin, Co_pad), rows (kh,kw,ci)."""
    co, cin = w.shape[0], w.shape[1]
    wm = w.transpose(2, 3, 1, 0).reshape(KS * KS * cin, co)
    return jnp.pad(wm, ((0, 0), (0, co_pad - co))).astype(jnp.bfloat16)


def _prep_dec_weight(w, co_pad):
    """ConvTranspose2d weight (Cin,Cout,4,4) -> bf16 (4, 4*Cin, Co_pad).

    Phase (py,px), tap (dr,dc) uses kernel tap kh=3-py-2*dr, kw=3-px-2*dc,
    matching the pad-1 input windows built in _im2col_up."""
    cin, co = w.shape[0], w.shape[1]
    phases = []
    for py in range(2):
        sub_h = jnp.flip(w[:, :, (1 - py)::2, :], axis=2)        # kh taps, dr order
        for px in range(2):
            sub = jnp.flip(sub_h[:, :, :, (1 - px)::2], axis=3)  # kw taps, dc order
            wp = sub.transpose(2, 3, 0, 1).reshape(4 * cin, co)  # rows (dr,dc,ci)
            wp = jnp.pad(wp, ((0, 0), (0, co_pad - co)))
            phases.append(wp.astype(jnp.bfloat16))
    return jnp.stack(phases, axis=0)


def prepare_params(enc_params, dec_params):
    enc_prep, enc_cout = [], []
    for i, (w, b) in enumerate(enc_params):
        co = int(w.shape[0])
        co_pad = _round_up(co, LANE)
        d = {"w": _prep_enc_weight(w, co_pad)}
        if i == 0:
            # only the norm-free first layer keeps its bias; train-mode BN
            # cancels the bias exactly on every other layer.
            d["b"] = jnp.pad(b, (0, co_pad - co)).reshape(1, co_pad).astype(jnp.float32)
        enc_prep.append(d)
        enc_cout.append(co)
    dec_prep, dec_cout = [], []
    for (w, b) in dec_params:
        co = int(w.shape[1])
        co_pad = _round_up(co, LANE)
        dec_prep.append({"w_phases": _prep_dec_weight(w, co_pad)})
        dec_cout.append(co)
    return enc_prep, dec_prep, tuple(enc_cout), tuple(dec_cout)


# --------------------------- deterministic init ----------------------------- #
def init_params(key, enc_channels, dec_channels):
    keys = jax.random.split(key, 2 * (len(enc_channels) + len(dec_channels)))
    ki = 0
    enc_params = []
    for i in range(len(enc_channels) - 1):
        cin, cout = enc_channels[i], enc_channels[i + 1]
        fan_in = cin * KS * KS
        w = jax.random.normal(keys[ki], (cout, cin, KS, KS), jnp.float32) * jnp.sqrt(2.0 / fan_in)
        ki += 1
        enc_params.append((w, jnp.full((cout,), 0.01, jnp.float32)))

    dec_ins = [dec_channels[0]] + [2 * c for c in dec_channels[1:-1]]
    dec_outs = list(dec_channels[1:])
    dec_params = []
    for cin, cout in zip(dec_ins, dec_outs):
        fan_in = cout * KS * KS   # torch fan_in convention for ConvTranspose2d
        w = jax.random.normal(keys[ki], (cin, cout, KS, KS), jnp.float32) * jnp.sqrt(2.0 / fan_in)
        ki += 1
        dec_params.append((w, jnp.full((cout,), 0.01, jnp.float32)))
    return enc_params, dec_params


if __name__ == "__main__":
    # Small UNet: 16x16 input, 4 down / 4 up blocks (all dropout flags False).
    enc_channels = (1, 16, 32, 64, 64)
    dec_channels = (64, 64, 32, 16, 3)

    key = jax.random.PRNGKey(0)
    k_param, k_x = jax.random.split(key)
    enc_params, dec_params = init_params(k_param, enc_channels, dec_channels)
    enc_prep, dec_prep, enc_cout, dec_cout = prepare_params(enc_params, dec_params)
    x = jax.random.normal(k_x, (2, 1, 16, 16), jnp.float32)   # NCHW like PyTorch

    fwd = jax.jit(functools.partial(unet_forward, enc_cout=enc_cout, dec_cout=dec_cout))
    out = jax.block_until_ready(fwd(x, enc_prep, dec_prep))

    assert out.shape == (2, 3, 16, 16), out.shape
    assert bool(jnp.all(jnp.isfinite(out)))
    assert bool(jnp.all(out >= 0.0)) and bool(jnp.all(out <= 1.0))  # sigmoid output
    print("KERNEL_OK")
</pallas_src>

<mosaic_0001>
module attributes {stable_mosaic.version = 11 : i64} {
  func.func @_down_first_kernel(%arg0: i32, %arg1: memref<128x16xbf16, #tpu.memory_space<vmem>>, %arg2: memref<16x128xbf16, #tpu.memory_space<vmem>>, %arg3: memref<1x128xf32, #tpu.memory_space<vmem>>, %arg4: memref<128x128xbf16, #tpu.memory_space<vmem>>) attributes {dimension_semantics = [#tpu.dimension_semantics<arbitrary>], iteration_bounds = array<i64: 1>, scalar_prefetch = 0 : i64, scratch_operands = 0 : i64, tpu.core_type = #tpu.core_type<tc>, window_params = [{pipeline_mode = #tpu.pipeline_mode<synchronous>, transform_indices = @transform_0, window_bounds = array<i64: 128, 16>}, {pipeline_mode = #tpu.pipeline_mode<synchronous>, transform_indices = @transform_1, window_bounds = array<i64: 16, 128>}, {pipeline_mode = #tpu.pipeline_mode<synchronous>, transform_indices = @transform_2, window_bounds = array<i64: 1, 128>}, {pipeline_mode = #tpu.pipeline_mode<synchronous>, transform_indices = @transform_3, window_bounds = array<i64: 128, 128>}]} {
    %c0 = arith.constant 0 : index
    %c0_0 = arith.constant 0 : index
    %0 = vector.load %arg1[%c0, %c0_0] : memref<128x16xbf16, #tpu.memory_space<vmem>>, vector<128x16xbf16>
    %c0_1 = arith.constant 0 : index
    %c0_2 = arith.constant 0 : index
    %1 = vector.load %arg2[%c0_1, %c0_2] : memref<16x128xbf16, #tpu.memory_space<vmem>>, vector<16x128xbf16>
    %cst = arith.constant dense<0.000000e+00> : vector<128x128xf32>
    %2 = tpu.matmul %0, %1, %cst {dimension_numbers = #tpu.dot_dimension_numbers<[1], [0], [0], [1], [0, 0, 1, 1], [], []>} : vector<128x16xbf16>, vector<16x128xbf16>, vector<128x128xf32> -> vector<128x128xf32>
    %c0_3 = arith.constant 0 : index
    %c0_4 = arith.constant 0 : index
    %3 = vector.load %arg3[%c0_3, %c0_4] : memref<1x128xf32, #tpu.memory_space<vmem>>, vector<1x128xf32>
    %4 = vector.broadcast %3 : vector<1x128xf32> to vector<128x128xf32>
    %5 = arith.addf %2, %4 : vector<128x128xf32>
    %cst_5 = arith.constant 0.000000e+00 : f32
    %6 = vector.broadcast %cst_5 : f32 to vector<128x128xf32>
    %7 = arith.cmpf oge, %5, %6 : vector<128x128xf32>
    %cst_6 = arith.constant 2.000000e-01 : f32
    %8 = vector.broadcast %cst_6 : f32 to vector<128x128xf32>
    %9 = arith.mulf %8, %5 : vector<128x128xf32>
    %10 = arith.select %7, %5, %9 : vector<128x128xi1>, vector<128x128xf32>
    %11 = arith.truncf %10 : vector<128x128xf32> to vector<128x128xbf16>
    %c0_7 = arith.constant 0 : index
    %c0_8 = arith.constant 0 : index
    %12 = vector.load %arg4[%c0_7, %c0_8] : memref<128x128xbf16, #tpu.memory_space<vmem>>, vector<128x128xbf16>
    tpu.vector_store %arg4[%c0_7, %c0_8], %11 {strides = array<i32>} : memref<128x128xbf16, #tpu.memory_space<vmem>>, vector<128x128xbf16>,
    return
  }
  func.func @transform_0(%arg0: i32) -> (i32, i32) {
    %c0_i32 = arith.constant 0 : i32
    %c0_i32_0 = arith.constant 0 : i32
    %c0_i32_1 = arith.constant 0 : i32
    return %c0_i32, %c0_i32_0 : i32, i32
  }
  func.func @transform_1(%arg0: i32) -> (i32, i32) {
    %c0_i32 = arith.constant 0 : i32
    %c0_i32_0 = arith.constant 0 : i32
    %c0_i32_1 = arith.constant 0 : i32
    return %c0_i32, %c0_i32_0 : i32, i32
  }
  func.func @transform_2(%arg0: i32) -> (i32, i32) {
    %c0_i32 = arith.constant 0 : i32
    %c0_i32_0 = arith.constant 0 : i32
    %c0_i32_1 = arith.constant 0 : i32
    return %c0_i32, %c0_i32_0 : i32, i32
  }
  func.func @transform_3(%arg0: i32) -> (i32, i32) {
    %c0_i32 = arith.constant 0 : i32
    %c0_i32_0 = arith.constant 0 : i32
    %c0_i32_1 = arith.constant 0 : i32
    return %c0_i32, %c0_i32_0 : i32, i32
  }
}

module attributes {stable_mosaic.version = 11 : i64} {
  func.func @_down_bn_kernel(%arg0: i32, %arg1: memref<32x256xbf16, #tpu.memory_space<vmem>>, %arg2: memref<256x128xbf16, #tpu.memory_space<vmem>>, %arg3: memref<32x128xbf16, #tpu.memory_space<vmem>>) attributes {dimension_semantics = [#tpu.dimension_semantics<arbitrary>], iteration_bounds = array<i64: 1>, scalar_prefetch = 0 : i64, scratch_operands = 0 : i64, tpu.core_type = #tpu.core_type<tc>, window_params = [{pipeline_mode = #tpu.pipeline_mode<synchronous>, transform_indices = @transform_0, window_bounds = array<i64: 32, 256>}, {pipeline_mode = #tpu.pipeline_mode<synchronous>, transform_indices = @transform_1, window_bounds = array<i64: 256, 128>}, {pipeline_mode = #tpu.pipeline_mode<synchronous>, transform_indices = @transform_2, window_bounds = array<i64: 32, 128>}]} {
    %c0 = arith.constant 0 : index
    %c0_0 = arith.constant 0 : index
    %0 = vector.load %arg1[%c0, %c0_0] : memref<32x256xbf16, #tpu.memory_space<vmem>>, vector<32x256xbf16>
    %c0_1 = arith.constant 0 : index
    %c0_2 = arith.constant 0 : index
    %1 = vector.load %arg2[%c0_1, %c0_2] : memref<256x128xbf16, #tpu.memory_space<vmem>>, vector<256x128xbf16>
    %cst = arith.constant dense<0.000000e+00> : vector<32x128xf32>
    %2 = tpu.matmul %0, %1, %cst {dimension_numbers = #tpu.dot_dimension_numbers<[1], [0], [0], [1], [0, 0, 1, 1], [], []>} : vector<32x256xbf16>, vector<256x128xbf16>, vector<32x128xf32> -> vector<32x128xf32>
    %cst_3 = arith.constant dense<0.000000e+00> : vector<128xf32>
    %3 = vector.multi_reduction <add>, %2, %cst_3 [0] : vector<32x128xf32> to vector<128xf32>
    %4 = vector.shape_cast %3 : vector<128xf32> to vector<1x128xf32>
    %cst_4 = arith.constant 3.200000e+01 : f32
    %5 = vector.broadcast %cst_4 : f32 to vector<1x128xf32>
    %6 = arith.divf %4, %5 : vector<1x128xf32>
    %7 = arith.mulf %2, %2 : vector<32x128xf32>
    %cst_5 = arith.constant dense<0.000000e+00> : vector<128xf32>
    %8 = vector.multi_reduction <add>, %7, %cst_5 [0] : vector<32x128xf32> to vector<128xf32>
    %9 = vector.shape_cast %8 : vector<128xf32> to vector<1x128xf32>
    %cst_6 = arith.constant 3.200000e+01 : f32
    %10 = vector.broadcast %cst_6 : f32 to vector<1x128xf32>
    %11 = arith.divf %9, %10 : vector<1x128xf32>
    %12 = arith.mulf %6, %6 : vector<1x128xf32>
    %13 = arith.subf %11, %12 : vector<1x128xf32>
    %cst_7 = arith.constant 0.000000e+00 : f32
    %14 = vector.broadcast %cst_7 : f32 to vector<1x128xf32>
    %15 = arith.maximumf %13, %14 : vector<1x128xf32>
    %cst_8 = arith.constant 9.99999974E-6 : f32
    %16 = vector.broadcast %cst_8 : f32 to vector<1x128xf32>
    %17 = arith.addf %15, %16 : vector<1x128xf32>
    %18 = math.rsqrt %17 : vector<1x128xf32>
    %19 = vector.broadcast %6 : vector<1x128xf32> to vector<32x128xf32>
    %20 = arith.subf %2, %19 : vector<32x128xf32>
    %21 = vector.broadcast %18 : vector<1x128xf32> to vector<32x128xf32>
    %22 = arith.mulf %20, %21 : vector<32x128xf32>
    %cst_9 = arith.constant 0.000000e+00 : f32
    %23 = vector.broadcast %cst_9 : f32 to vector<32x128xf32>
    %24 = arith.cmpf oge, %22, %23 : vector<32x128xf32>
    %cst_10 = arith.constant 2.000000e-01 : f32
    %25 = vector.broadcast %cst_10 : f32 to vector<32x128xf32>
    %26 = arith.mulf %25, %22 : vector<32x128xf32>
    %27 = arith.select %24, %22, %26 : vector<32x128xi1>, vector<32x128xf32>
    %28 = arith.truncf %27 : vector<32x128xf32> to vector<32x128xbf16>
    %c0_11 = arith.constant 0 : index
    %c0_12 = arith.constant 0 : index
    %29 = vector.load %arg3[%c0_11, %c0_12] : memref<32x128xbf16, #tpu.memory_space<vmem>>, vector<32x128xbf16>
    tpu.vector_store %arg3[%c0_11, %c0_12], %28 {strides = array<i32>} : memref<32x128xbf16, #tpu.memory_space<vmem>>, vector<32x128xbf16>,
    return
  }
  func.func @transform_0(%arg0: i32) -> (i32, i32) {
    %c0_i32 = arith.constant 0 : i32
    %c0_i32_0 = arith.constant 0 : i32
    %c0_i32_1 = arith.constant 0 : i32
    return %c0_i32, %c0_i32_0 : i32, i32
  }
  func.func @transform_1(%arg0: i32) -> (i32, i32) {
    %c0_i32 = arith.constant 0 : i32
    %c0_i32_0 = arith.constant 0 : i32
    %c0_i32_1 = arith.constant 0 : i32
    return %c0_i32, %c0_i32_0 : i32, i32
  }
  func.func @transform_2(%arg0: i32) -> (i32, i32) {
    %c0_i32 = arith.constant 0 : i32
    %c0_i32_0 = arith.constant 0 : i32
    %c0_i32_1 = arith.constant 0 : i32
    return %c0_i32, %c0_i32_0 : i32, i32
  }
}

module attributes {stable_mosaic.version = 11 : i64} {
  func.func @_down_bn_kernel(%arg0: i32, %arg1: memref<8x512xbf16, #tpu.memory_space<vmem>>, %arg2: memref<512x128xbf16, #tpu.memory_space<vmem>>, %arg3: memref<8x128xbf16, #tpu.memory_space<vmem>>) attributes {dimension_semantics = [#tpu.dimension_semantics<arbitrary>], iteration_bounds = array<i64: 1>, scalar_prefetch = 0 : i64, scratch_operands = 0 : i64, tpu.core_type = #tpu.core_type<tc>, window_params = [{pipeline_mode = #tpu.pipeline_mode<synchronous>, transform_indices = @transform_0, window_bounds = array<i64: 8, 512>}, {pipeline_mode = #tpu.pipeline_mode<synchronous>, transform_indices = @transform_1, window_bounds = array<i64: 512, 128>}, {pipeline_mode = #tpu.pipeline_mode<synchronous>, transform_indices = @transform_2, window_bounds = array<i64: 8, 128>}]} {
    %c0 = arith.constant 0 : index
    %c0_0 = arith.constant 0 : index
    %0 = vector.load %arg1[%c0, %c0_0] : memref<8x512xbf16, #tpu.memory_space<vmem>>, vector<8x512xbf16>
    %c0_1 = arith.constant 0 : index
    %c0_2 = arith.constant 0 : index
    %1 = vector.load %arg2[%c0_1, %c0_2] : memref<512x128xbf16, #tpu.memory_space<vmem>>, vector<512x128xbf16>
    %cst = arith.constant dense<0.000000e+00> : vector<8x128xf32>
    %2 = tpu.matmul %0, %1, %cst {dimension_numbers = #tpu.dot_dimension_numbers<[1], [0], [0], [1], [0, 0, 1, 1], [], []>} : vector<8x512xbf16>, vector<512x128xbf16>, vector<8x128xf32> -> vector<8x128xf32>
    %cst_3 = arith.constant dense<0.000000e+00> : vector<128xf32>
    %3 = vector.multi_reduction <add>, %2, %cst_3 [0] : vector<8x128xf32> to vector<128xf32>
    %4 = vector.shape_cast %3 : vector<128xf32> to vector<1x128xf32>
    %cst_4 = arith.constant 8.000000e+00 : f32
    %5 = vector.broadcast %cst_4 : f32 to vector<1x128xf32>
    %6 = arith.divf %4, %5 : vector<1x128xf32>
    %7 = arith.mulf %2, %2 : vector<8x128xf32>
    %cst_5 = arith.constant dense<0.000000e+00> : vector<128xf32>
    %8 = vector.multi_reduction <add>, %7, %cst_5 [0] : vector<8x128xf32> to vector<128xf32>
    %9 = vector.shape_cast %8 : vector<128xf32> to vector<1x128xf32>
    %cst_6 = arith.constant 8.000000e+00 : f32
    %10 = vector.broadcast %cst_6 : f32 to vector<1x128xf32>
    %11 = arith.divf %9, %10 : vector<1x128xf32>
    %12 = arith.mulf %6, %6 : vector<1x128xf32>
    %13 = arith.subf %11, %12 : vector<1x128xf32>
    %cst_7 = arith.constant 0.000000e+00 : f32
    %14 = vector.broadcast %cst_7 : f32 to vector<1x128xf32>
    %15 = arith.maximumf %13, %14 : vector<1x128xf32>
    %cst_8 = arith.constant 9.99999974E-6 : f32
    %16 = vector.broadcast %cst_8 : f32 to vector<1x128xf32>
    %17 = arith.addf %15, %16 : vector<1x128xf32>
    %18 = math.rsqrt %17 : vector<1x128xf32>
    %19 = vector.broadcast %6 : vector<1x128xf32> to vector<8x128xf32>
    %20 = arith.subf %2, %19 : vector<8x128xf32>
    %21 = vector.broadcast %18 : vector<1x128xf32> to vector<8x128xf32>
    %22 = arith.mulf %20, %21 : vector<8x128xf32>
    %cst_9 = arith.constant 0.000000e+00 : f32
    %23 = vector.broadcast %cst_9 : f32 to vector<8x128xf32>
    %24 = arith.cmpf oge, %22, %23 : vector<8x128xf32>
    %cst_10 = arith.constant 2.000000e-01 : f32
    %25 = vector.broadcast %cst_10 : f32 to vector<8x128xf32>
    %26 = arith.mulf %25, %22 : vector<8x128xf32>
    %27 = arith.select %24, %22, %26 : vector<8x128xi1>, vector<8x128xf32>
    %28 = arith.truncf %27 : vector<8x128xf32> to vector<8x128xbf16>
    %c0_11 = arith.constant 0 : index
    %c0_12 = arith.constant 0 : index
    %29 = vector.load %arg3[%c0_11, %c0_12] : memref<8x128xbf16, #tpu.memory_space<vmem>>, vector<8x128xbf16>
    tpu.vector_store %arg3[%c0_11, %c0_12], %28 {strides = array<i32>} : memref<8x128xbf16, #tpu.memory_space<vmem>>, vector<8x128xbf16>,
    return
  }
  func.func @transform_0(%arg0: i32) -> (i32, i32) {
    %c0_i32 = arith.constant 0 : i32
    %c0_i32_0 = arith.constant 0 : i32
    %c0_i32_1 = arith.constant 0 : i32
    return %c0_i32, %c0_i32_0 : i32, i32
  }
  func.func @transform_1(%arg0: i32) -> (i32, i32) {
    %c0_i32 = arith.constant 0 : i32
    %c0_i32_0 = arith.constant 0 : i32
    %c0_i32_1 = arith.constant 0 : i32
    return %c0_i32, %c0_i32_0 : i32, i32
  }
  func.func @transform_2(%arg0: i32) -> (i32, i32) {
    %c0_i32 = arith.constant 0 : i32
    %c0_i32_0 = arith.constant 0 : i32
    %c0_i32_1 = arith.constant 0 : i32
    return %c0_i32, %c0_i32_0 : i32, i32
  }
}

module attributes {stable_mosaic.version = 11 : i64} {
  func.func @_down_bn_kernel(%arg0: i32, %arg1: memref<2x1024xbf16, #tpu.memory_space<vmem>>, %arg2: memref<1024x128xbf16, #tpu.memory_space<vmem>>, %arg3: memref<2x128xbf16, #tpu.memory_space<vmem>>) attributes {dimension_semantics = [#tpu.dimension_semantics<arbitrary>], iteration_bounds = array<i64: 1>, scalar_prefetch = 0 : i64, scratch_operands = 0 : i64, tpu.core_type = #tpu.core_type<tc>, window_params = [{pipeline_mode = #tpu.pipeline_mode<synchronous>, transform_indices = @transform_0, window_bounds = array<i64: 2, 1024>}, {pipeline_mode = #tpu.pipeline_mode<synchronous>, transform_indices = @transform_1, window_bounds = array<i64: 1024, 128>}, {pipeline_mode = #tpu.pipeline_mode<synchronous>, transform_indices = @transform_2, window_bounds = array<i64: 2, 128>}]} {
    %c0 = arith.constant 0 : index
    %c0_0 = arith.constant 0 : index
    %0 = vector.load %arg1[%c0, %c0_0] : memref<2x1024xbf16, #tpu.memory_space<vmem>>, vector<2x1024xbf16>
    %c0_1 = arith.constant 0 : index
    %c0_2 = arith.constant 0 : index
    %1 = vector.load %arg2[%c0_1, %c0_2] : memref<1024x128xbf16, #tpu.memory_space<vmem>>, vector<1024x128xbf16>
    %cst = arith.constant dense<0.000000e+00> : vector<2x128xf32>
    %2 = tpu.matmul %0, %1, %cst {dimension_numbers = #tpu.dot_dimension_numbers<[1], [0], [0], [1], [0, 0, 1, 1], [], []>} : vector<2x1024xbf16>, vector<1024x128xbf16>, vector<2x128xf32> -> vector<2x128xf32>
    %cst_3 = arith.constant dense<0.000000e+00> : vector<128xf32>
    %3 = vector.multi_reduction <add>, %2, %cst_3 [0] : vector<2x128xf32> to vector<128xf32>
    %4 = vector.shape_cast %3 : vector<128xf32> to vector<1x128xf32>
    %cst_4 = arith.constant 2.000000e+00 : f32
    %5 = vector.broadcast %cst_4 : f32 to vector<1x128xf32>
    %6 = arith.divf %4, %5 : vector<1x128xf32>
    %7 = arith.mulf %2, %2 : vector<2x128xf32>
    %cst_5 = arith.constant dense<0.000000e+00> : vector<128xf32>
    %8 = vector.multi_reduction <add>, %7, %cst_5 [0] : vector<2x128xf32> to vector<128xf32>
    %9 = vector.shape_cast %8 : vector<128xf32> to vector<1x128xf32>
    %cst_6 = arith.constant 2.000000e+00 : f32
    %10 = vector.broadcast %cst_6 : f32 to vector<1x128xf32>
    %11 = arith.divf %9, %10 : vector<1x128xf32>
    %12 = arith.mulf %6, %6 : vector<1x128xf32>
    %13 = arith.subf %11, %12 : vector<1x128xf32>
    %cst_7 = arith.constant 0.000000e+00 : f32
    %14 = vector.broadcast %cst_7 : f32 to vector<1x128xf32>
    %15 = arith.maximumf %13, %14 : vector<1x128xf32>
    %cst_8 = arith.constant 9.99999974E-6 : f32
    %16 = vector.broadcast %cst_8 : f32 to vector<1x128xf32>
    %17 = arith.addf %15, %16 : vector<1x128xf32>
    %18 = math.rsqrt %17 : vector<1x128xf32>
    %19 = vector.broadcast %6 : vector<1x128xf32> to vector<2x128xf32>
    %20 = arith.subf %2, %19 : vector<2x128xf32>
    %21 = vector.broadcast %18 : vector<1x128xf32> to vector<2x128xf32>
    %22 = arith.mulf %20, %21 : vector<2x128xf32>
    %cst_9 = arith.constant 0.000000e+00 : f32
    %23 = vector.broadcast %cst_9 : f32 to vector<2x128xf32>
    %24 = arith.cmpf oge, %22, %23 : vector<2x128xf32>
    %cst_10 = arith.constant 2.000000e-01 : f32
    %25 = vector.broadcast %cst_10 : f32 to vector<2x128xf32>
    %26 = arith.mulf %25, %22 : vector<2x128xf32>
    %27 = arith.select %24, %22, %26 : vector<2x128xi1>, vector<2x128xf32>
    %28 = arith.truncf %27 : vector<2x128xf32> to vector<2x128xbf16>
    %c0_11 = arith.constant 0 : index
    %c0_12 = arith.constant 0 : index
    %29 = vector.load %arg3[%c0_11, %c0_12] : memref<2x128xbf16, #tpu.memory_space<vmem>>, vector<2x128xbf16>
    tpu.vector_store %arg3[%c0_11, %c0_12], %28 {strides = array<i32>} : memref<2x128xbf16, #tpu.memory_space<vmem>>, vector<2x128xbf16>,
    return
  }
  func.func @transform_0(%arg0: i32) -> (i32, i32) {
    %c0_i32 = arith.constant 0 : i32
    %c0_i32_0 = arith.constant 0 : i32
    %c0_i32_1 = arith.constant 0 : i32
    return %c0_i32, %c0_i32_0 : i32, i32
  }
  func.func @transform_1(%arg0: i32) -> (i32, i32) {
    %c0_i32 = arith.constant 0 : i32
    %c0_i32_0 = arith.constant 0 : i32
    %c0_i32_1 = arith.constant 0 : i32
    return %c0_i32, %c0_i32_0 : i32, i32
  }
  func.func @transform_2(%arg0: i32) -> (i32, i32) {
    %c0_i32 = arith.constant 0 : i32
    %c0_i32_0 = arith.constant 0 : i32
    %c0_i32_1 = arith.constant 0 : i32
    return %c0_i32, %c0_i32_0 : i32, i32
  }
}

module attributes {stable_mosaic.version = 11 : i64} {
  func.func @_up_bn_kernel(%arg0: i32, %arg1: memref<4x2x256xbf16, #tpu.memory_space<vmem>>, %arg2: memref<4x256x128xbf16, #tpu.memory_space<vmem>>, %arg3: memref<4x2x128xbf16, #tpu.memory_space<vmem>>) attributes {dimension_semantics = [#tpu.dimension_semantics<arbitrary>], iteration_bounds = array<i64: 1>, scalar_prefetch = 0 : i64, scratch_operands = 0 : i64, tpu.core_type = #tpu.core_type<tc>, window_params = [{pipeline_mode = #tpu.pipeline_mode<synchronous>, transform_indices = @transform_0, window_bounds = array<i64: 4, 2, 256>}, {pipeline_mode = #tpu.pipeline_mode<synchronous>, transform_indices = @transform_1, window_bounds = array<i64: 4, 256, 128>}, {pipeline_mode = #tpu.pipeline_mode<synchronous>, transform_indices = @transform_2, window_bounds = array<i64: 4, 2, 128>}]} {
    %c0 = arith.constant 0 : index
    %c0_0 = arith.constant 0 : index
    %c0_1 = arith.constant 0 : index
    %0 = vector.load %arg1[%c0, %c0_0, %c0_1] : memref<4x2x256xbf16, #tpu.memory_space<vmem>>, vector<1x2x256xbf16>
    %1 = vector.shape_cast %0 : vector<1x2x256xbf16> to vector<2x256xbf16>
    %c0_2 = arith.constant 0 : index
    %c0_3 = arith.constant 0 : index
    %c0_4 = arith.constant 0 : index
    %2 = vector.load %arg2[%c0_2, %c0_3, %c0_4] : memref<4x256x128xbf16, #tpu.memory_space<vmem>>, vector<1x256x128xbf16>
    %3 = vector.shape_cast %2 : vector<1x256x128xbf16> to vector<256x128xbf16>
    %cst = arith.constant dense<0.000000e+00> : vector<2x128xf32>
    %4 = tpu.matmul %1, %3, %cst {dimension_numbers = #tpu.dot_dimension_numbers<[1], [0], [0], [1], [0, 0, 1, 1], [], []>} : vector<2x256xbf16>, vector<256x128xbf16>, vector<2x128xf32> -> vector<2x128xf32>
    %c1 = arith.constant 1 : index
    %c0_5 = arith.constant 0 : index
    %c0_6 = arith.constant 0 : index
    %5 = vector.load %arg1[%c1, %c0_5, %c0_6] : memref<4x2x256xbf16, #tpu.memory_space<vmem>>, vector<1x2x256xbf16>
    %6 = vector.shape_cast %5 : vector<1x2x256xbf16> to vector<2x256xbf16>
    %c1_7 = arith.constant 1 : index
    %c0_8 = arith.constant 0 : index
    %c0_9 = arith.constant 0 : index
    %7 = vector.load %arg2[%c1_7, %c0_8, %c0_9] : memref<4x256x128xbf16, #tpu.memory_space<vmem>>, vector<1x256x128xbf16>
    %8 = vector.shape_cast %7 : vector<1x256x128xbf16> to vector<256x128xbf16>
    %cst_10 = arith.constant dense<0.000000e+00> : vector<2x128xf32>
    %9 = tpu.matmul %6, %8, %cst_10 {dimension_numbers = #tpu.dot_dimension_numbers<[1], [0], [0], [1], [0, 0, 1, 1], [], []>} : vector<2x256xbf16>, vector<256x128xbf16>, vector<2x128xf32> -> vector<2x128xf32>
    %c2 = arith.constant 2 : index
    %c0_11 = arith.constant 0 : index
    %c0_12 = arith.constant 0 : index
    %10 = vector.load %arg1[%c2, %c0_11, %c0_12] : memref<4x2x256xbf16, #tpu.memory_space<vmem>>, vector<1x2x256xbf16>
    %11 = vector.shape_cast %10 : vector<1x2x256xbf16> to vector<2x256xbf16>
    %c2_13 = arith.constant 2 : index
    %c0_14 = arith.constant 0 : index
    %c0_15 = arith.constant 0 : index
    %12 = vector.load %arg2[%c2_13, %c0_14, %c0_15] : memref<4x256x128xbf16, #tpu.memory_space<vmem>>, vector<1x256x128xbf16>
    %13 = vector.shape_cast %12 : vector<1x256x128xbf16> to vector<256x128xbf16>
    %cst_16 = arith.constant dense<0.000000e+00> : vector<2x128xf32>
    %14 = tpu.matmul %11, %13, %cst_16 {dimension_numbers = #tpu.dot_dimension_numbers<[1], [0], [0], [1], [0, 0, 1, 1], [], []>} : vector<2x256xbf16>, vector<256x128xbf16>, vector<2x128xf32> -> vector<2x128xf32>
    %c3 = arith.constant 3 : index
    %c0_17 = arith.constant 0 : index
    %c0_18 = arith.constant 0 : index
    %15 = vector.load %arg1[%c3, %c0_17, %c0_18] : memref<4x2x256xbf16, #tpu.memory_space<vmem>>, vector<1x2x256xbf16>
    %16 = vector.shape_cast %15 : vector<1x2x256xbf16> to vector<2x256xbf16>
    %c3_19 = arith.constant 3 : index
    %c0_20 = arith.constant 0 : index
    %c0_21 = arith.constant 0 : index
    %17 = vector.load %arg2[%c3_19, %c0_20, %c0_21] : memref<4x256x128xbf16, #tpu.memory_space<vmem>>, vector<1x256x128xbf16>
    %18 = vector.shape_cast %17 : vector<1x256x128xbf16> to vector<256x128xbf16>
    %cst_22 = arith.constant dense<0.000000e+00> : vector<2x128xf32>
    %19 = tpu.matmul %16, %18, %cst_22 {dimension_numbers = #tpu.dot_dimension_numbers<[1], [0], [0], [1], [0, 0, 1, 1], [], []>} : vector<2x256xbf16>, vector<256x128xbf16>, vector<2x128xf32> -> vector<2x128xf32>
    %cst_23 = arith.constant dense<0.000000e+00> : vector<128xf32>
    %20 = vector.multi_reduction <add>, %4, %cst_23 [0] : vector<2x128xf32> to vector<128xf32>
    %21 = vector.shape_cast %20 : vector<128xf32> to vector<1x128xf32>
    %cst_24 = arith.constant 0.000000e+00 : f32
    %22 = vector.broadcast %cst_24 : f32 to vector<1x128xf32>
    %23 = arith.addf %22, %21 : vector<1x128xf32>
    %cst_25 = arith.constant dense<0.000000e+00> : vector<128xf32>
    %24 = vector.multi_reduction <add>, %9, %cst_25 [0] : vector<2x128xf32> to vector<128xf32>
    %25 = vector.shape_cast %24 : vector<128xf32> to vector<1x128xf32>
    %26 = arith.addf %23, %25 : vector<1x128xf32>
    %cst_26 = arith.constant dense<0.000000e+00> : vector<128xf32>
    %27 = vector.multi_reduction <add>, %14, %cst_26 [0] : vector<2x128xf32> to vector<128xf32>
    %28 = vector.shape_cast %27 : vector<128xf32> to vector<1x128xf32>
    %29 = arith.addf %26, %28 : vector<1x128xf32>
    %cst_27 = arith.constant dense<0.000000e+00> : vector<128xf32>
    %30 = vector.multi_reduction <add>, %19, %cst_27 [0] : vector<2x128xf32> to vector<128xf32>
    %31 = vector.shape_cast %30 : vector<128xf32> to vector<1x128xf32>
    %32 = arith.addf %29, %31 : vector<1x128xf32>
    %33 = arith.mulf %4, %4 : vector<2x128xf32>
    %cst_28 = arith.constant dense<0.000000e+00> : vector<128xf32>
    %34 = vector.multi_reduction <add>, %33, %cst_28 [0] : vector<2x128xf32> to vector<128xf32>
    %35 = vector.shape_cast %34 : vector<128xf32> to vector<1x128xf32>
    %cst_29 = arith.constant 0.000000e+00 : f32
    %36 = vector.broadcast %cst_29 : f32 to vector<1x128xf32>
    %37 = arith.addf %36, %35 : vector<1x128xf32>
    %38 = arith.mulf %9, %9 : vector<2x128xf32>
    %cst_30 = arith.constant dense<0.000000e+00> : vector<128xf32>
    %39 = vector.multi_reduction <add>, %38, %cst_30 [0] : vector<2x128xf32> to vector<128xf32>
    %40 = vector.shape_cast %39 : vector<128xf32> to vector<1x128xf32>
    %41 = arith.addf %37, %40 : vector<1x128xf32>
    %42 = arith.mulf %14, %14 : vector<2x128xf32>
    %cst_31 = arith.constant dense<0.000000e+00> : vector<128xf32>
    %43 = vector.multi_reduction <add>, %42, %cst_31 [0] : vector<2x128xf32> to vector<128xf32>
    %44 = vector.shape_cast %43 : vector<128xf32> to vector<1x128xf32>
    %45 = arith.addf %41, %44 : vector<1x128xf32>
    %46 = arith.mulf %19, %19 : vector<2x128xf32>
    %cst_32 = arith.constant dense<0.000000e+00> : vector<128xf32>
    %47 = vector.multi_reduction <add>, %46, %cst_32 [0] : vector<2x128xf32> to vector<128xf32>
    %48 = vector.shape_cast %47 : vector<128xf32> to vector<1x128xf32>
    %49 = arith.addf %45, %48 : vector<1x128xf32>
    %cst_33 = arith.constant 1.250000e-01 : f32
    %50 = vector.broadcast %cst_33 : f32 to vector<1x128xf32>
    %51 = arith.mulf %32, %50 : vector<1x128xf32>
    %cst_34 = arith.constant 1.250000e-01 : f32
    %52 = vector.broadcast %cst_34 : f32 to vector<1x128xf32>
    %53 = arith.mulf %49, %52 : vector<1x128xf32>
    %54 = arith.mulf %51, %51 : vector<1x128xf32>
    %55 = arith.subf %53, %54 : vector<1x128xf32>
    %cst_35 = arith.constant 0.000000e+00 : f32
    %56 = vector.broadcast %cst_35 : f32 to vector<1x128xf32>
    %57 = arith.maximumf %55, %56 : vector<1x128xf32>
    %cst_36 = arith.constant 9.99999974E-6 : f32
    %58 = vector.broadcast %cst_36 : f32 to vector<1x128xf32>
    %59 = arith.addf %57, %58 : vector<1x128xf32>
    %60 = math.rsqrt %59 : vector<1x128xf32>
    %61 = vector.broadcast %51 : vector<1x128xf32> to vector<2x128xf32>
    %62 = arith.subf %4, %61 : vector<2x128xf32>
    %63 = vector.broadcast %60 : vector<1x128xf32> to vector<2x128xf32>
    %64 = arith.mulf %62, %63 : vector<2x128xf32>
    %cst_37 = arith.constant 0.000000e+00 : f32
    %65 = vector.broadcast %cst_37 : f32 to vector<2x128xf32>
    %66 = arith.maximumf %64, %65 : vector<2x128xf32>
    %67 = arith.truncf %66 : vector<2x128xf32> to vector<2x128xbf16>
    %c0_38 = arith.constant 0 : index
    %c0_39 = arith.constant 0 : index
    %c0_40 = arith.constant 0 : index
    %68 = vector.load %arg3[%c0_38, %c0_39, %c0_40] : memref<4x2x128xbf16, #tpu.memory_space<vmem>>, vector<1x2x128xbf16>
    %69 = vector.shape_cast %68 : vector<1x2x128xbf16> to vector<2x128xbf16>
    %70 = vector.shape_cast %67 : vector<2x128xbf16> to vector<1x2x128xbf16>
    tpu.vector_store %arg3[%c0_38, %c0_39, %c0_40], %70 {strides = array<i32>} : memref<4x2x128xbf16, #tpu.memory_space<vmem>>, vector<1x2x128xbf16>,
    %71 = vector.broadcast %51 : vector<1x128xf32> to vector<2x128xf32>
    %72 = arith.subf %9, %71 : vector<2x128xf32>
    %73 = vector.broadcast %60 : vector<1x128xf32> to vector<2x128xf32>
    %74 = arith.mulf %72, %73 : vector<2x128xf32>
    %cst_41 = arith.constant 0.000000e+00 : f32
    %75 = vector.broadcast %cst_41 : f32 to vector<2x128xf32>
    %76 = arith.maximumf %74, %75 : vector<2x128xf32>
    %77 = arith.truncf %76 : vector<2x128xf32> to vector<2x128xbf16>
    %c1_42 = arith.constant 1 : index
    %c0_43 = arith.constant 0 : index
    %c0_44 = arith.constant 0 : index
    %78 = vector.load %arg3[%c1_42, %c0_43, %c0_44] : memref<4x2x128xbf16, #tpu.memory_space<vmem>>, vector<1x2x128xbf16>
    %79 = vector.shape_cast %78 : vector<1x2x128xbf16> to vector<2x128xbf16>
    %80 = vector.shape_cast %77 : vector<2x128xbf16> to vector<1x2x128xbf16>
    tpu.vector_store %arg3[%c1_42, %c0_43, %c0_44], %80 {strides = array<i32>} : memref<4x2x128xbf16, #tpu.memory_space<vmem>>, vector<1x2x128xbf16>,
    %81 = vector.broadcast %51 : vector<1x128xf32> to vector<2x128xf32>
    %82 = arith.subf %14, %81 : vector<2x128xf32>
    %83 = vector.broadcast %60 : vector<1x128xf32> to vector<2x128xf32>
    %84 = arith.mulf %82, %83 : vector<2x128xf32>
    %cst_45 = arith.constant 0.000000e+00 : f32
    %85 = vector.broadcast %cst_45 : f32 to vector<2x128xf32>
    %86 = arith.maximumf %84, %85 : vector<2x128xf32>
    %87 = arith.truncf %86 : vector<2x128xf32> to vector<2x128xbf16>
    %c2_46 = arith.constant 2 : index
    %c0_47 = arith.constant 0 : index
    %c0_48 = arith.constant 0 : index
    %88 = vector.load %arg3[%c2_46, %c0_47, %c0_48] : memref<4x2x128xbf16, #tpu.memory_space<vmem>>, vector<1x2x128xbf16>
    %89 = vector.shape_cast %88 : vector<1x2x128xbf16> to vector<2x128xbf16>
    %90 = vector.shape_cast %87 : vector<2x128xbf16> to vector<1x2x128xbf16>
    tpu.vector_store %arg3[%c2_46, %c0_47, %c0_48], %90 {strides = array<i32>} : memref<4x2x128xbf16, #tpu.memory_space<vmem>>, vector<1x2x128xbf16>,
    %91 = vector.broadcast %51 : vector<1x128xf32> to vector<2x128xf32>
    %92 = arith.subf %19, %91 : vector<2x128xf32>
    %93 = vector.broadcast %60 : vector<1x128xf32> to vector<2x128xf32>
    %94 = arith.mulf %92, %93 : vector<2x128xf32>
    %cst_49 = arith.constant 0.000000e+00 : f32
    %95 = vector.broadcast %cst_49 : f32 to vector<2x128xf32>
    %96 = arith.maximumf %94, %95 : vector<2x128xf32>
    %97 = arith.truncf %96 : vector<2x128xf32> to vector<2x128xbf16>
    %c3_50 = arith.constant 3 : index
    %c0_51 = arith.constant 0 : index
    %c0_52 = arith.constant 0 : index
    %98 = vector.load %arg3[%c3_50, %c0_51, %c0_52] : memref<4x2x128xbf16, #tpu.memory_space<vmem>>, vector<1x2x128xbf16>
    %99 = vector.shape_cast %98 : vector<1x2x128xbf16> to vector<2x128xbf16>
    %100 = vector.shape_cast %97 : vector<2x128xbf16> to vector<1x2x128xbf16>
    tpu.vector_store %arg3[%c3_50, %c0_51, %c0_52], %100 {strides = array<i32>} : memref<4x2x128xbf16, #tpu.memory_space<vmem>>, vector<1x2x128xbf16>,
    return
  }
  func.func @transform_0(%arg0: i32) -> (i32, i32, i32) {
    %c0_i32 = arith.constant 0 : i32
    %c0_i32_0 = arith.constant 0 : i32
    %c0_i32_1 = arith.constant 0 : i32
    %c0_i32_2 = arith.constant 0 : i32
    return %c0_i32, %c0_i32_0, %c0_i32_1 : i32, i32, i32
  }
  func.func @transform_1(%arg0: i32) -> (i32, i32, i32) {
    %c0_i32 = arith.constant 0 : i32
    %c0_i32_0 = arith.constant 0 : i32
    %c0_i32_1 = arith.constant 0 : i32
    %c0_i32_2 = arith.constant 0 : i32
    return %c0_i32, %c0_i32_0, %c0_i32_1 : i32, i32, i32
  }
  func.func @transform_2(%arg0: i32) -> (i32, i32, i32) {
    %c0_i32 = arith.constant 0 : i32
    %c0_i32_0 = arith.constant 0 : i32
    %c0_i32_1 = arith.constant 0 : i32
    %c0_i32_2 = arith.constant 0 : i32
    return %c0_i32, %c0_i32_0, %c0_i32_1 : i32, i32, i32
  }
}

module attributes {stable_mosaic.version = 11 : i64} {
  func.func @_up_bn_kernel(%arg0: i32, %arg1: memref<4x8x512xbf16, #tpu.memory_space<vmem>>, %arg2: memref<4x512x128xbf16, #tpu.memory_space<vmem>>, %arg3: memref<4x8x128xbf16, #tpu.memory_space<vmem>>) attributes {dimension_semantics = [#tpu.dimension_semantics<arbitrary>], iteration_bounds = array<i64: 1>, scalar_prefetch = 0 : i64, scratch_operands = 0 : i64, tpu.core_type = #tpu.core_type<tc>, window_params = [{pipeline_mode = #tpu.pipeline_mode<synchronous>, transform_indices = @transform_0, window_bounds = array<i64: 4, 8, 512>}, {pipeline_mode = #tpu.pipeline_mode<synchronous>, transform_indices = @transform_1, window_bounds = array<i64: 4, 512, 128>}, {pipeline_mode = #tpu.pipeline_mode<synchronous>, transform_indices = @transform_2, window_bounds = array<i64: 4, 8, 128>}]} {
    %c0 = arith.constant 0 : index
    %c0_0 = arith.constant 0 : index
    %c0_1 = arith.constant 0 : index
    %0 = vector.load %arg1[%c0, %c0_0, %c0_1] : memref<4x8x512xbf16, #tpu.memory_space<vmem>>, vector<1x8x512xbf16>
    %1 = vector.shape_cast %0 : vector<1x8x512xbf16> to vector<8x512xbf16>
    %c0_2 = arith.constant 0 : index
    %c0_3 = arith.constant 0 : index
    %c0_4 = arith.constant 0 : index
    %2 = vector.load %arg2[%c0_2, %c0_3, %c0_4] : memref<4x512x128xbf16, #tpu.memory_space<vmem>>, vector<1x512x128xbf16>
    %3 = vector.shape_cast %2 : vector<1x512x128xbf16> to vector<512x128xbf16>
    %cst = arith.constant dense<0.000000e+00> : vector<8x128xf32>
    %4 = tpu.matmul %1, %3, %cst {dimension_numbers = #tpu.dot_dimension_numbers<[1], [0], [0], [1], [0, 0, 1, 1], [], []>} : vector<8x512xbf16>, vector<512x128xbf16>, vector<8x128xf32> -> vector<8x128xf32>
    %c1 = arith.constant 1 : index
    %c0_5 = arith.constant 0 : index
    %c0_6 = arith.constant 0 : index
    %5 = vector.load %arg1[%c1, %c0_5, %c0_6] : memref<4x8x512xbf16, #tpu.memory_space<vmem>>, vector<1x8x512xbf16>
    %6 = vector.shape_cast %5 : vector<1x8x512xbf16> to vector<8x512xbf16>
    %c1_7 = arith.constant 1 : index
    %c0_8 = arith.constant 0 : index
    %c0_9 = arith.constant 0 : index
    %7 = vector.load %arg2[%c1_7, %c0_8, %c0_9] : memref<4x512x128xbf16, #tpu.memory_space<vmem>>, vector<1x512x128xbf16>
    %8 = vector.shape_cast %7 : vector<1x512x128xbf16> to vector<512x128xbf16>
    %cst_10 = arith.constant dense<0.000000e+00> : vector<8x128xf32>
    %9 = tpu.matmul %6, %8, %cst_10 {dimension_numbers = #tpu.dot_dimension_numbers<[1], [0], [0], [1], [0, 0, 1, 1], [], []>} : vector<8x512xbf16>, vector<512x128xbf16>, vector<8x128xf32> -> vector<8x128xf32>
    %c2 = arith.constant 2 : index
    %c0_11 = arith.constant 0 : index
    %c0_12 = arith.constant 0 : index
    %10 = vector.load %arg1[%c2, %c0_11, %c0_12] : memref<4x8x512xbf16, #tpu.memory_space<vmem>>, vector<1x8x512xbf16>
    %11 = vector.shape_cast %10 : vector<1x8x512xbf16> to vector<8x512xbf16>
    %c2_13 = arith.constant 2 : index
    %c0_14 = arith.constant 0 : index
    %c0_15 = arith.constant 0 : index
    %12 = vector.load %arg2[%c2_13, %c0_14, %c0_15] : memref<4x512x128xbf16, #tpu.memory_space<vmem>>, vector<1x512x128xbf16>
    %13 = vector.shape_cast %12 : vector<1x512x128xbf16> to vector<512x128xbf16>
    %cst_16 = arith.constant dense<0.000000e+00> : vector<8x128xf32>
    %14 = tpu.matmul %11, %13, %cst_16 {dimension_numbers = #tpu.dot_dimension_numbers<[1], [0], [0], [1], [0, 0, 1, 1], [], []>} : vector<8x512xbf16>, vector<512x128xbf16>, vector<8x128xf32> -> vector<8x128xf32>
    %c3 = arith.constant 3 : index
    %c0_17 = arith.constant 0 : index
    %c0_18 = arith.constant 0 : index
    %15 = vector.load %arg1[%c3, %c0_17, %c0_18] : memref<4x8x512xbf16, #tpu.memory_space<vmem>>, vector<1x8x512xbf16>
    %16 = vector.shape_cast %15 : vector<1x8x512xbf16> to vector<8x512xbf16>
    %c3_19 = arith.constant 3 : index
    %c0_20 = arith.constant 0 : index
    %c0_21 = arith.constant 0 : index
    %17 = vector.load %arg2[%c3_19, %c0_20, %c0_21] : memref<4x512x128xbf16, #tpu.memory_space<vmem>>, vector<1x512x128xbf16>
    %18 = vector.shape_cast %17 : vector<1x512x128xbf16> to vector<512x128xbf16>
    %cst_22 = arith.constant dense<0.000000e+00> : vector<8x128xf32>
    %19 = tpu.matmul %16, %18, %cst_22 {dimension_numbers = #tpu.dot_dimension_numbers<[1], [0], [0], [1], [0, 0, 1, 1], [], []>} : vector<8x512xbf16>, vector<512x128xbf16>, vector<8x128xf32> -> vector<8x128xf32>
    %cst_23 = arith.constant dense<0.000000e+00> : vector<128xf32>
    %20 = vector.multi_reduction <add>, %4, %cst_23 [0] : vector<8x128xf32> to vector<128xf32>
    %21 = vector.shape_cast %20 : vector<128xf32> to vector<1x128xf32>
    %cst_24 = arith.constant 0.000000e+00 : f32
    %22 = vector.broadcast %cst_24 : f32 to vector<1x128xf32>
    %23 = arith.addf %22, %21 : vector<1x128xf32>
    %cst_25 = arith.constant dense<0.000000e+00> : vector<128xf32>
    %24 = vector.multi_reduction <add>, %9, %cst_25 [0] : vector<8x128xf32> to vector<128xf32>
    %25 = vector.shape_cast %24 : vector<128xf32> to vector<1x128xf32>
    %26 = arith.addf %23, %25 : vector<1x128xf32>
    %cst_26 = arith.constant dense<0.000000e+00> : vector<128xf32>
    %27 = vector.multi_reduction <add>, %14, %cst_26 [0] : vector<8x128xf32> to vector<128xf32>
    %28 = vector.shape_cast %27 : vector<128xf32> to vector<1x128xf32>
    %29 = arith.addf %26, %28 : vector<1x128xf32>
    %cst_27 = arith.constant dense<0.000000e+00> : vector<128xf32>
    %30 = vector.multi_reduction <add>, %19, %cst_27 [0] : vector<8x128xf32> to vector<128xf32>
    %31 = vector.shape_cast %30 : vector<128xf32> to vector<1x128xf32>
    %32 = arith.addf %29, %31 : vector<1x128xf32>
    %33 = arith.mulf %4, %4 : vector<8x128xf32>
    %cst_28 = arith.constant dense<0.000000e+00> : vector<128xf32>
    %34 = vector.multi_reduction <add>, %33, %cst_28 [0] : vector<8x128xf32> to vector<128xf32>
    %35 = vector.shape_cast %34 : vector<128xf32> to vector<1x128xf32>
    %cst_29 = arith.constant 0.000000e+00 : f32
    %36 = vector.broadcast %cst_29 : f32 to vector<1x128xf32>
    %37 = arith.addf %36, %35 : vector<1x128xf32>
    %38 = arith.mulf %9, %9 : vector<8x128xf32>
    %cst_30 = arith.constant dense<0.000000e+00> : vector<128xf32>
    %39 = vector.multi_reduction <add>, %38, %cst_30 [0] : vector<8x128xf32> to vector<128xf32>
    %40 = vector.shape_cast %39 : vector<128xf32> to vector<1x128xf32>
    %41 = arith.addf %37, %40 : vector<1x128xf32>
    %42 = arith.mulf %14, %14 : vector<8x128xf32>
    %cst_31 = arith.constant dense<0.000000e+00> : vector<128xf32>
    %43 = vector.multi_reduction <add>, %42, %cst_31 [0] : vector<8x128xf32> to vector<128xf32>
    %44 = vector.shape_cast %43 : vector<128xf32> to vector<1x128xf32>
    %45 = arith.addf %41, %44 : vector<1x128xf32>
    %46 = arith.mulf %19, %19 : vector<8x128xf32>
    %cst_32 = arith.constant dense<0.000000e+00> : vector<128xf32>
    %47 = vector.multi_reduction <add>, %46, %cst_32 [0] : vector<8x128xf32> to vector<128xf32>
    %48 = vector.shape_cast %47 : vector<128xf32> to vector<1x128xf32>
    %49 = arith.addf %45, %48 : vector<1x128xf32>
    %cst_33 = arith.constant 3.125000e-02 : f32
    %50 = vector.broadcast %cst_33 : f32 to vector<1x128xf32>
    %51 = arith.mulf %32, %50 : vector<1x128xf32>
    %cst_34 = arith.constant 3.125000e-02 : f32
    %52 = vector.broadcast %cst_34 : f32 to vector<1x128xf32>
    %53 = arith.mulf %49, %52 : vector<1x128xf32>
    %54 = arith.mulf %51, %51 : vector<1x128xf32>
    %55 = arith.subf %53, %54 : vector<1x128xf32>
    %cst_35 = arith.constant 0.000000e+00 : f32
    %56 = vector.broadcast %cst_35 : f32 to vector<1x128xf32>
    %57 = arith.maximumf %55, %56 : vector<1x128xf32>
    %cst_36 = arith.constant 9.99999974E-6 : f32
    %58 = vector.broadcast %cst_36 : f32 to vector<1x128xf32>
    %59 = arith.addf %57, %58 : vector<1x128xf32>
    %60 = math.rsqrt %59 : vector<1x128xf32>
    %61 = vector.broadcast %51 : vector<1x128xf32> to vector<8x128xf32>
    %62 = arith.subf %4, %61 : vector<8x128xf32>
    %63 = vector.broadcast %60 : vector<1x128xf32> to vector<8x128xf32>
    %64 = arith.mulf %62, %63 : vector<8x128xf32>
    %cst_37 = arith.constant 0.000000e+00 : f32
    %65 = vector.broadcast %cst_37 : f32 to vector<8x128xf32>
    %66 = arith.maximumf %64, %65 : vector<8x128xf32>
    %67 = arith.truncf %66 : vector<8x128xf32> to vector<8x128xbf16>
    %c0_38 = arith.constant 0 : index
    %c0_39 = arith.constant 0 : index
    %c0_40 = arith.constant 0 : index
    %68 = vector.load %arg3[%c0_38, %c0_39, %c0_40] : memref<4x8x128xbf16, #tpu.memory_space<vmem>>, vector<1x8x128xbf16>
    %69 = vector.shape_cast %68 : vector<1x8x128xbf16> to vector<8x128xbf16>
    %70 = vector.shape_cast %67 : vector<8x128xbf16> to vector<1x8x128xbf16>
    tpu.vector_store %arg3[%c0_38, %c0_39, %c0_40], %70 {strides = array<i32>} : memref<4x8x128xbf16, #tpu.memory_space<vmem>>, vector<1x8x128xbf16>,
    %71 = vector.broadcast %51 : vector<1x128xf32> to vector<8x128xf32>
    %72 = arith.subf %9, %71 : vector<8x128xf32>
    %73 = vector.broadcast %60 : vector<1x128xf32> to vector<8x128xf32>
    %74 = arith.mulf %72, %73 : vector<8x128xf32>
    %cst_41 = arith.constant 0.000000e+00 : f32
    %75 = vector.broadcast %cst_41 : f32 to vector<8x128xf32>
    %76 = arith.maximumf %74, %75 : vector<8x128xf32>
    %77 = arith.truncf %76 : vector<8x128xf32> to vector<8x128xbf16>
    %c1_42 = arith.constant 1 : index
    %c0_43 = arith.constant 0 : index
    %c0_44 = arith.constant 0 : index
    %78 = vector.load %arg3[%c1_42, %c0_43, %c0_44] : memref<4x8x128xbf16, #tpu.memory_space<vmem>>, vector<1x8x128xbf16>
    %79 = vector.shape_cast %78 : vector<1x8x128xbf16> to vector<8x128xbf16>
    %80 = vector.shape_cast %77 : vector<8x128xbf16> to vector<1x8x128xbf16>
    tpu.vector_store %arg3[%c1_42, %c0_43, %c0_44], %80 {strides = array<i32>} : memref<4x8x128xbf16, #tpu.memory_space<vmem>>, vector<1x8x128xbf16>,
    %81 = vector.broadcast %51 : vector<1x128xf32> to vector<8x128xf32>
    %82 = arith.subf %14, %81 : vector<8x128xf32>
    %83 = vector.broadcast %60 : vector<1x128xf32> to vector<8x128xf32>
    %84 = arith.mulf %82, %83 : vector<8x128xf32>
    %cst_45 = arith.constant 0.000000e+00 : f32
    %85 = vector.broadcast %cst_45 : f32 to vector<8x128xf32>
    %86 = arith.maximumf %84, %85 : vector<8x128xf32>
    %87 = arith.truncf %86 : vector<8x128xf32> to vector<8x128xbf16>
    %c2_46 = arith.constant 2 : index
    %c0_47 = arith.constant 0 : index
    %c0_48 = arith.constant 0 : index
    %88 = vector.load %arg3[%c2_46, %c0_47, %c0_48] : memref<4x8x128xbf16, #tpu.memory_space<vmem>>, vector<1x8x128xbf16>
    %89 = vector.shape_cast %88 : vector<1x8x128xbf16> to vector<8x128xbf16>
    %90 = vector.shape_cast %87 : vector<8x128xbf16> to vector<1x8x128xbf16>
    tpu.vector_store %arg3[%c2_46, %c0_47, %c0_48], %90 {strides = array<i32>} : memref<4x8x128xbf16, #tpu.memory_space<vmem>>, vector<1x8x128xbf16>,
    %91 = vector.broadcast %51 : vector<1x128xf32> to vector<8x128xf32>
    %92 = arith.subf %19, %91 : vector<8x128xf32>
    %93 = vector.broadcast %60 : vector<1x128xf32> to vector<8x128xf32>
    %94 = arith.mulf %92, %93 : vector<8x128xf32>
    %cst_49 = arith.constant 0.000000e+00 : f32
    %95 = vector.broadcast %cst_49 : f32 to vector<8x128xf32>
    %96 = arith.maximumf %94, %95 : vector<8x128xf32>
    %97 = arith.truncf %96 : vector<8x128xf32> to vector<8x128xbf16>
    %c3_50 = arith.constant 3 : index
    %c0_51 = arith.constant 0 : index
    %c0_52 = arith.constant 0 : index
    %98 = vector.load %arg3[%c3_50, %c0_51, %c0_52] : memref<4x8x128xbf16, #tpu.memory_space<vmem>>, vector<1x8x128xbf16>
    %99 = vector.shape_cast %98 : vector<1x8x128xbf16> to vector<8x128xbf16>
    %100 = vector.shape_cast %97 : vector<8x128xbf16> to vector<1x8x128xbf16>
    tpu.vector_store %arg3[%c3_50, %c0_51, %c0_52], %100 {strides = array<i32>} : memref<4x8x128xbf16, #tpu.memory_space<vmem>>, vector<1x8x128xbf16>,
    return
  }
  func.func @transform_0(%arg0: i32) -> (i32, i32, i32) {
    %c0_i32 = arith.constant 0 : i32
    %c0_i32_0 = arith.constant 0 : i32
    %c0_i32_1 = arith.constant 0 : i32
    %c0_i32_2 = arith.constant 0 : i32
    return %c0_i32, %c0_i32_0, %c0_i32_1 : i32, i32, i32
  }
  func.func @transform_1(%arg0: i32) -> (i32, i32, i32) {
    %c0_i32 = arith.constant 0 : i32
    %c0_i32_0 = arith.constant 0 : i32
    %c0_i32_1 = arith.constant 0 : i32
    %c0_i32_2 = arith.constant 0 : i32
    return %c0_i32, %c0_i32_0, %c0_i32_1 : i32, i32, i32
  }
  func.func @transform_2(%arg0: i32) -> (i32, i32, i32) {
    %c0_i32 = arith.constant 0 : i32
    %c0_i32_0 = arith.constant 0 : i32
    %c0_i32_1 = arith.constant 0 : i32
    %c0_i32_2 = arith.constant 0 : i32
    return %c0_i32, %c0_i32_0, %c0_i32_1 : i32, i32, i32
  }
}

module attributes {stable_mosaic.version = 11 : i64} {
  func.func @_up_bn_kernel(%arg0: i32, %arg1: memref<4x32x256xbf16, #tpu.memory_space<vmem>>, %arg2: memref<4x256x128xbf16, #tpu.memory_space<vmem>>, %arg3: memref<4x32x128xbf16, #tpu.memory_space<vmem>>) attributes {dimension_semantics = [#tpu.dimension_semantics<arbitrary>], iteration_bounds = array<i64: 1>, scalar_prefetch = 0 : i64, scratch_operands = 0 : i64, tpu.core_type = #tpu.core_type<tc>, window_params = [{pipeline_mode = #tpu.pipeline_mode<synchronous>, transform_indices = @transform_0, window_bounds = array<i64: 4, 32, 256>}, {pipeline_mode = #tpu.pipeline_mode<synchronous>, transform_indices = @transform_1, window_bounds = array<i64: 4, 256, 128>}, {pipeline_mode = #tpu.pipeline_mode<synchronous>, transform_indices = @transform_2, window_bounds = array<i64: 4, 32, 128>}]} {
    %c0 = arith.constant 0 : index
    %c0_0 = arith.constant 0 : index
    %c0_1 = arith.constant 0 : index
    %0 = vector.load %arg1[%c0, %c0_0, %c0_1] : memref<4x32x256xbf16, #tpu.memory_space<vmem>>, vector<1x32x256xbf16>
    %1 = vector.shape_cast %0 : vector<1x32x256xbf16> to vector<32x256xbf16>
    %c0_2 = arith.constant 0 : index
    %c0_3 = arith.constant 0 : index
    %c0_4 = arith.constant 0 : index
    %2 = vector.load %arg2[%c0_2, %c0_3, %c0_4] : memref<4x256x128xbf16, #tpu.memory_space<vmem>>, vector<1x256x128xbf16>
    %3 = vector.shape_cast %2 : vector<1x256x128xbf16> to vector<256x128xbf16>
    %cst = arith.constant dense<0.000000e+00> : vector<32x128xf32>
    %4 = tpu.matmul %1, %3, %cst {dimension_numbers = #tpu.dot_dimension_numbers<[1], [0], [0], [1], [0, 0, 1, 1], [], []>} : vector<32x256xbf16>, vector<256x128xbf16>, vector<32x128xf32> -> vector<32x128xf32>
    %c1 = arith.constant 1 : index
    %c0_5 = arith.constant 0 : index
    %c0_6 = arith.constant 0 : index
    %5 = vector.load %arg1[%c1, %c0_5, %c0_6] : memref<4x32x256xbf16, #tpu.memory_space<vmem>>, vector<1x32x256xbf16>
    %6 = vector.shape_cast %5 : vector<1x32x256xbf16> to vector<32x256xbf16>
    %c1_7 = arith.constant 1 : index
    %c0_8 = arith.constant 0 : index
    %c0_9 = arith.constant 0 : index
    %7 = vector.load %arg2[%c1_7, %c0_8, %c0_9] : memref<4x256x128xbf16, #tpu.memory_space<vmem>>, vector<1x256x128xbf16>
    %8 = vector.shape_cast %7 : vector<1x256x128xbf16> to vector<256x128xbf16>
    %cst_10 = arith.constant dense<0.000000e+00> : vector<32x128xf32>
    %9 = tpu.matmul %6, %8, %cst_10 {dimension_numbers = #tpu.dot_dimension_numbers<[1], [0], [0], [1], [0, 0, 1, 1], [], []>} : vector<32x256xbf16>, vector<256x128xbf16>, vector<32x128xf32> -> vector<32x128xf32>
    %c2 = arith.constant 2 : index
    %c0_11 = arith.constant 0 : index
    %c0_12 = arith.constant 0 : index
    %10 = vector.load %arg1[%c2, %c0_11, %c0_12] : memref<4x32x256xbf16, #tpu.memory_space<vmem>>, vector<1x32x256xbf16>
    %11 = vector.shape_cast %10 : vector<1x32x256xbf16> to vector<32x256xbf16>
    %c2_13 = arith.constant 2 : index
    %c0_14 = arith.constant 0 : index
    %c0_15 = arith.constant 0 : index
    %12 = vector.load %arg2[%c2_13, %c0_14, %c0_15] : memref<4x256x128xbf16, #tpu.memory_space<vmem>>, vector<1x256x128xbf16>
    %13 = vector.shape_cast %12 : vector<1x256x128xbf16> to vector<256x128xbf16>
    %cst_16 = arith.constant dense<0.000000e+00> : vector<32x128xf32>
    %14 = tpu.matmul %11, %13, %cst_16 {dimension_numbers = #tpu.dot_dimension_numbers<[1], [0], [0], [1], [0, 0, 1, 1], [], []>} : vector<32x256xbf16>, vector<256x128xbf16>, vector<32x128xf32> -> vector<32x128xf32>
    %c3 = arith.constant 3 : index
    %c0_17 = arith.constant 0 : index
    %c0_18 = arith.constant 0 : index
    %15 = vector.load %arg1[%c3, %c0_17, %c0_18] : memref<4x32x256xbf16, #tpu.memory_space<vmem>>, vector<1x32x256xbf16>
    %16 = vector.shape_cast %15 : vector<1x32x256xbf16> to vector<32x256xbf16>
    %c3_19 = arith.constant 3 : index
    %c0_20 = arith.constant 0 : index
    %c0_21 = arith.constant 0 : index
    %17 = vector.load %arg2[%c3_19, %c0_20, %c0_21] : memref<4x256x128xbf16, #tpu.memory_space<vmem>>, vector<1x256x128xbf16>
    %18 = vector.shape_cast %17 : vector<1x256x128xbf16> to vector<256x128xbf16>
    %cst_22 = arith.constant dense<0.000000e+00> : vector<32x128xf32>
    %19 = tpu.matmul %16, %18, %cst_22 {dimension_numbers = #tpu.dot_dimension_numbers<[1], [0], [0], [1], [0, 0, 1, 1], [], []>} : vector<32x256xbf16>, vector<256x128xbf16>, vector<32x128xf32> -> vector<32x128xf32>
    %cst_23 = arith.constant dense<0.000000e+00> : vector<128xf32>
    %20 = vector.multi_reduction <add>, %4, %cst_23 [0] : vector<32x128xf32> to vector<128xf32>
    %21 = vector.shape_cast %20 : vector<128xf32> to vector<1x128xf32>
    %cst_24 = arith.constant 0.000000e+00 : f32
    %22 = vector.broadcast %cst_24 : f32 to vector<1x128xf32>
    %23 = arith.addf %22, %21 : vector<1x128xf32>
    %cst_25 = arith.constant dense<0.000000e+00> : vector<128xf32>
    %24 = vector.multi_reduction <add>, %9, %cst_25 [0] : vector<32x128xf32> to vector<128xf32>
    %25 = vector.shape_cast %24 : vector<128xf32> to vector<1x128xf32>
    %26 = arith.addf %23, %25 : vector<1x128xf32>
    %cst_26 = arith.constant dense<0.000000e+00> : vector<128xf32>
    %27 = vector.multi_reduction <add>, %14, %cst_26 [0] : vector<32x128xf32> to vector<128xf32>
    %28 = vector.shape_cast %27 : vector<128xf32> to vector<1x128xf32>
    %29 = arith.addf %26, %28 : vector<1x128xf32>
    %cst_27 = arith.constant dense<0.000000e+00> : vector<128xf32>
    %30 = vector.multi_reduction <add>, %19, %cst_27 [0] : vector<32x128xf32> to vector<128xf32>
    %31 = vector.shape_cast %30 : vector<128xf32> to vector<1x128xf32>
    %32 = arith.addf %29, %31 : vector<1x128xf32>
    %33 = arith.mulf %4, %4 : vector<32x128xf32>
    %cst_28 = arith.constant dense<0.000000e+00> : vector<128xf32>
    %34 = vector.multi_reduction <add>, %33, %cst_28 [0] : vector<32x128xf32> to vector<128xf32>
    %35 = vector.shape_cast %34 : vector<128xf32> to vector<1x128xf32>
    %cst_29 = arith.constant 0.000000e+00 : f32
    %36 = vector.broadcast %cst_29 : f32 to vector<1x128xf32>
    %37 = arith.addf %36, %35 : vector<1x128xf32>
    %38 = arith.mulf %9, %9 : vector<32x128xf32>
    %cst_30 = arith.constant dense<0.000000e+00> : vector<128xf32>
    %39 = vector.multi_reduction <add>, %38, %cst_30 [0] : vector<32x128xf32> to vector<128xf32>
    %40 = vector.shape_cast %39 : vector<128xf32> to vector<1x128xf32>
    %41 = arith.addf %37, %40 : vector<1x128xf32>
    %42 = arith.mulf %14, %14 : vector<32x128xf32>
    %cst_31 = arith.constant dense<0.000000e+00> : vector<128xf32>
    %43 = vector.multi_reduction <add>, %42, %cst_31 [0] : vector<32x128xf32> to vector<128xf32>
    %44 = vector.shape_cast %43 : vector<128xf32> to vector<1x128xf32>
    %45 = arith.addf %41, %44 : vector<1x128xf32>
    %46 = arith.mulf %19, %19 : vector<32x128xf32>
    %cst_32 = arith.constant dense<0.000000e+00> : vector<128xf32>
    %47 = vector.multi_reduction <add>, %46, %cst_32 [0] : vector<32x128xf32> to vector<128xf32>
    %48 = vector.shape_cast %47 : vector<128xf32> to vector<1x128xf32>
    %49 = arith.addf %45, %48 : vector<1x128xf32>
    %cst_33 = arith.constant 7.812500e-03 : f32
    %50 = vector.broadcast %cst_33 : f32 to vector<1x128xf32>
    %51 = arith.mulf %32, %50 : vector<1x128xf32>
    %cst_34 = arith.constant 7.812500e-03 : f32
    %52 = vector.broadcast %cst_34 : f32 to vector<1x128xf32>
    %53 = arith.mulf %49, %52 : vector<1x128xf32>
    %54 = arith.mulf %51, %51 : vector<1x128xf32>
    %55 = arith.subf %53, %54 : vector<1x128xf32>
    %cst_35 = arith.constant 0.000000e+00 : f32
    %56 = vector.broadcast %cst_35 : f32 to vector<1x128xf32>
    %57 = arith.maximumf %55, %56 : vector<1x128xf32>
    %cst_36 = arith.constant 9.99999974E-6 : f32
    %58 = vector.broadcast %cst_36 : f32 to vector<1x128xf32>
    %59 = arith.addf %57, %58 : vector<1x128xf32>
    %60 = math.rsqrt %59 : vector<1x128xf32>
    %61 = vector.broadcast %51 : vector<1x128xf32> to vector<32x128xf32>
    %62 = arith.subf %4, %61 : vector<32x128xf32>
    %63 = vector.broadcast %60 : vector<1x128xf32> to vector<32x128xf32>
    %64 = arith.mulf %62, %63 : vector<32x128xf32>
    %cst_37 = arith.constant 0.000000e+00 : f32
    %65 = vector.broadcast %cst_37 : f32 to vector<32x128xf32>
    %66 = arith.maximumf %64, %65 : vector<32x128xf32>
    %67 = arith.truncf %66 : vector<32x128xf32> to vector<32x128xbf16>
    %c0_38 = arith.constant 0 : index
    %c0_39 = arith.constant 0 : index
    %c0_40 = arith.constant 0 : index
    %68 = vector.load %arg3[%c0_38, %c0_39, %c0_40] : memref<4x32x128xbf16, #tpu.memory_space<vmem>>, vector<1x32x128xbf16>
    %69 = vector.shape_cast %68 : vector<1x32x128xbf16> to vector<32x128xbf16>
    %70 = vector.shape_cast %67 : vector<32x128xbf16> to vector<1x32x128xbf16>
    tpu.vector_store %arg3[%c0_38, %c0_39, %c0_40], %70 {strides = array<i32>} : memref<4x32x128xbf16, #tpu.memory_space<vmem>>, vector<1x32x128xbf16>,
    %71 = vector.broadcast %51 : vector<1x128xf32> to vector<32x128xf32>
    %72 = arith.subf %9, %71 : vector<32x128xf32>
    %73 = vector.broadcast %60 : vector<1x128xf32> to vector<32x128xf32>
    %74 = arith.mulf %72, %73 : vector<32x128xf32>
    %cst_41 = arith.constant 0.000000e+00 : f32
    %75 = vector.broadcast %cst_41 : f32 to vector<32x128xf32>
    %76 = arith.maximumf %74, %75 : vector<32x128xf32>
    %77 = arith.truncf %76 : vector<32x128xf32> to vector<32x128xbf16>
    %c1_42 = arith.constant 1 : index
    %c0_43 = arith.constant 0 : index
    %c0_44 = arith.constant 0 : index
    %78 = vector.load %arg3[%c1_42, %c0_43, %c0_44] : memref<4x32x128xbf16, #tpu.memory_space<vmem>>, vector<1x32x128xbf16>
    %79 = vector.shape_cast %78 : vector<1x32x128xbf16> to vector<32x128xbf16>
    %80 = vector.shape_cast %77 : vector<32x128xbf16> to vector<1x32x128xbf16>
    tpu.vector_store %arg3[%c1_42, %c0_43, %c0_44], %80 {strides = array<i32>} : memref<4x32x128xbf16, #tpu.memory_space<vmem>>, vector<1x32x128xbf16>,
    %81 = vector.broadcast %51 : vector<1x128xf32> to vector<32x128xf32>
    %82 = arith.subf %14, %81 : vector<32x128xf32>
    %83 = vector.broadcast %60 : vector<1x128xf32> to vector<32x128xf32>
    %84 = arith.mulf %82, %83 : vector<32x128xf32>
    %cst_45 = arith.constant 0.000000e+00 : f32
    %85 = vector.broadcast %cst_45 : f32 to vector<32x128xf32>
    %86 = arith.maximumf %84, %85 : vector<32x128xf32>
    %87 = arith.truncf %86 : vector<32x128xf32> to vector<32x128xbf16>
    %c2_46 = arith.constant 2 : index
    %c0_47 = arith.constant 0 : index
    %c0_48 = arith.constant 0 : index
    %88 = vector.load %arg3[%c2_46, %c0_47, %c0_48] : memref<4x32x128xbf16, #tpu.memory_space<vmem>>, vector<1x32x128xbf16>
    %89 = vector.shape_cast %88 : vector<1x32x128xbf16> to vector<32x128xbf16>
    %90 = vector.shape_cast %87 : vector<32x128xbf16> to vector<1x32x128xbf16>
    tpu.vector_store %arg3[%c2_46, %c0_47, %c0_48], %90 {strides = array<i32>} : memref<4x32x128xbf16, #tpu.memory_space<vmem>>, vector<1x32x128xbf16>,
    %91 = vector.broadcast %51 : vector<1x128xf32> to vector<32x128xf32>
    %92 = arith.subf %19, %91 : vector<32x128xf32>
    %93 = vector.broadcast %60 : vector<1x128xf32> to vector<32x128xf32>
    %94 = arith.mulf %92, %93 : vector<32x128xf32>
    %cst_49 = arith.constant 0.000000e+00 : f32
    %95 = vector.broadcast %cst_49 : f32 to vector<32x128xf32>
    %96 = arith.maximumf %94, %95 : vector<32x128xf32>
    %97 = arith.truncf %96 : vector<32x128xf32> to vector<32x128xbf16>
    %c3_50 = arith.constant 3 : index
    %c0_51 = arith.constant 0 : index
    %c0_52 = arith.constant 0 : index
    %98 = vector.load %arg3[%c3_50, %c0_51, %c0_52] : memref<4x32x128xbf16, #tpu.memory_space<vmem>>, vector<1x32x128xbf16>
    %99 = vector.shape_cast %98 : vector<1x32x128xbf16> to vector<32x128xbf16>
    %100 = vector.shape_cast %97 : vector<32x128xbf16> to vector<1x32x128xbf16>
    tpu.vector_store %arg3[%c3_50, %c0_51, %c0_52], %100 {strides = array<i32>} : memref<4x32x128xbf16, #tpu.memory_space<vmem>>, vector<1x32x128xbf16>,
    return
  }
  func.func @transform_0(%arg0: i32) -> (i32, i32, i32) {
    %c0_i32 = arith.constant 0 : i32
    %c0_i32_0 = arith.constant 0 : i32
    %c0_i32_1 = arith.constant 0 : i32
    %c0_i32_2 = arith.constant 0 : i32
    return %c0_i32, %c0_i32_0, %c0_i32_1 : i32, i32, i32
  }
  func.func @transform_1(%arg0: i32) -> (i32, i32, i32) {
    %c0_i32 = arith.constant 0 : i32
    %c0_i32_0 = arith.constant 0 : i32
    %c0_i32_1 = arith.constant 0 : i32
    %c0_i32_2 = arith.constant 0 : i32
    return %c0_i32, %c0_i32_0, %c0_i32_1 : i32, i32, i32
  }
  func.func @transform_2(%arg0: i32) -> (i32, i32, i32) {
    %c0_i32 = arith.constant 0 : i32
    %c0_i32_0 = arith.constant 0 : i32
    %c0_i32_1 = arith.constant 0 : i32
    %c0_i32_2 = arith.constant 0 : i32
    return %c0_i32, %c0_i32_0, %c0_i32_1 : i32, i32, i32
  }
}

module attributes {stable_mosaic.version = 11 : i64} {
  func.func @_up_bn_kernel(%arg0: i32, %arg1: memref<4x128x128xbf16, #tpu.memory_space<vmem>>, %arg2: memref<4x128x128xbf16, #tpu.memory_space<vmem>>, %arg3: memref<4x128x128xbf16, #tpu.memory_space<vmem>>) attributes {dimension_semantics = [#tpu.dimension_semantics<arbitrary>], iteration_bounds = array<i64: 1>, scalar_prefetch = 0 : i64, scratch_operands = 0 : i64, tpu.core_type = #tpu.core_type<tc>, window_params = [{pipeline_mode = #tpu.pipeline_mode<synchronous>, transform_indices = @transform_0, window_bounds = array<i64: 4, 128, 128>}, {pipeline_mode = #tpu.pipeline_mode<synchronous>, transform_indices = @transform_1, window_bounds = array<i64: 4, 128, 128>}, {pipeline_mode = #tpu.pipeline_mode<synchronous>, transform_indices = @transform_2, window_bounds = array<i64: 4, 128, 128>}]} {
    %c0 = arith.constant 0 : index
    %c0_0 = arith.constant 0 : index
    %c0_1 = arith.constant 0 : index
    %0 = vector.load %arg1[%c0, %c0_0, %c0_1] : memref<4x128x128xbf16, #tpu.memory_space<vmem>>, vector<1x128x128xbf16>
    %1 = vector.shape_cast %0 : vector<1x128x128xbf16> to vector<128x128xbf16>
    %c0_2 = arith.constant 0 : index
    %c0_3 = arith.constant 0 : index
    %c0_4 = arith.constant 0 : index
    %2 = vector.load %arg2[%c0_2, %c0_3, %c0_4] : memref<4x128x128xbf16, #tpu.memory_space<vmem>>, vector<1x128x128xbf16>
    %3 = vector.shape_cast %2 : vector<1x128x128xbf16> to vector<128x128xbf16>
    %cst = arith.constant dense<0.000000e+00> : vector<128x128xf32>
    %4 = tpu.matmul %1, %3, %cst {dimension_numbers = #tpu.dot_dimension_numbers<[1], [0], [0], [1], [0, 0, 1, 1], [], []>} : vector<128x128xbf16>, vector<128x128xbf16>, vector<128x128xf32> -> vector<128x128xf32>
    %c1 = arith.constant 1 : index
    %c0_5 = arith.constant 0 : index
    %c0_6 = arith.constant 0 : index
    %5 = vector.load %arg1[%c1, %c0_5, %c0_6] : memref<4x128x128xbf16, #tpu.memory_space<vmem>>, vector<1x128x128xbf16>
    %6 = vector.shape_cast %5 : vector<1x128x128xbf16> to vector<128x128xbf16>
    %c1_7 = arith.constant 1 : index
    %c0_8 = arith.constant 0 : index
    %c0_9 = arith.constant 0 : index
    %7 = vector.load %arg2[%c1_7, %c0_8, %c0_9] : memref<4x128x128xbf16, #tpu.memory_space<vmem>>, vector<1x128x128xbf16>
    %8 = vector.shape_cast %7 : vector<1x128x128xbf16> to vector<128x128xbf16>
    %cst_10 = arith.constant dense<0.000000e+00> : vector<128x128xf32>
    %9 = tpu.matmul %6, %8, %cst_10 {dimension_numbers = #tpu.dot_dimension_numbers<[1], [0], [0], [1], [0, 0, 1, 1], [], []>} : vector<128x128xbf16>, vector<128x128xbf16>, vector<128x128xf32> -> vector<128x128xf32>
    %c2 = arith.constant 2 : index
    %c0_11 = arith.constant 0 : index
    %c0_12 = arith.constant 0 : index
    %10 = vector.load %arg1[%c2, %c0_11, %c0_12] : memref<4x128x128xbf16, #tpu.memory_space<vmem>>, vector<1x128x128xbf16>
    %11 = vector.shape_cast %10 : vector<1x128x128xbf16> to vector<128x128xbf16>
    %c2_13 = arith.constant 2 : index
    %c0_14 = arith.constant 0 : index
    %c0_15 = arith.constant 0 : index
    %12 = vector.load %arg2[%c2_13, %c0_14, %c0_15] : memref<4x128x128xbf16, #tpu.memory_space<vmem>>, vector<1x128x128xbf16>
    %13 = vector.shape_cast %12 : vector<1x128x128xbf16> to vector<128x128xbf16>
    %cst_16 = arith.constant dense<0.000000e+00> : vector<128x128xf32>
    %14 = tpu.matmul %11, %13, %cst_16 {dimension_numbers = #tpu.dot_dimension_numbers<[1], [0], [0], [1], [0, 0, 1, 1], [], []>} : vector<128x128xbf16>, vector<128x128xbf16>, vector<128x128xf32> -> vector<128x128xf32>
    %c3 = arith.constant 3 : index
    %c0_17 = arith.constant 0 : index
    %c0_18 = arith.constant 0 : index
    %15 = vector.load %arg1[%c3, %c0_17, %c0_18] : memref<4x128x128xbf16, #tpu.memory_space<vmem>>, vector<1x128x128xbf16>
    %16 = vector.shape_cast %15 : vector<1x128x128xbf16> to vector<128x128xbf16>
    %c3_19 = arith.constant 3 : index
    %c0_20 = arith.constant 0 : index
    %c0_21 = arith.constant 0 : index
    %17 = vector.load %arg2[%c3_19, %c0_20, %c0_21] : memref<4x128x128xbf16, #tpu.memory_space<vmem>>, vector<1x128x128xbf16>
    %18 = vector.shape_cast %17 : vector<1x128x128xbf16> to vector<128x128xbf16>
    %cst_22 = arith.constant dense<0.000000e+00> : vector<128x128xf32>
    %19 = tpu.matmul %16, %18, %cst_22 {dimension_numbers = #tpu.dot_dimension_numbers<[1], [0], [0], [1], [0, 0, 1, 1], [], []>} : vector<128x128xbf16>, vector<128x128xbf16>, vector<128x128xf32> -> vector<128x128xf32>
    %cst_23 = arith.constant dense<0.000000e+00> : vector<128xf32>
    %20 = vector.multi_reduction <add>, %4, %cst_23 [0] : vector<128x128xf32> to vector<128xf32>
    %21 = vector.shape_cast %20 : vector<128xf32> to vector<1x128xf32>
    %cst_24 = arith.constant 0.000000e+00 : f32
    %22 = vector.broadcast %cst_24 : f32 to vector<1x128xf32>
    %23 = arith.addf %22, %21 : vector<1x128xf32>
    %cst_25 = arith.constant dense<0.000000e+00> : vector<128xf32>
    %24 = vector.multi_reduction <add>, %9, %cst_25 [0] : vector<128x128xf32> to vector<128xf32>
    %25 = vector.shape_cast %24 : vector<128xf32> to vector<1x128xf32>
    %26 = arith.addf %23, %25 : vector<1x128xf32>
    %cst_26 = arith.constant dense<0.000000e+00> : vector<128xf32>
    %27 = vector.multi_reduction <add>, %14, %cst_26 [0] : vector<128x128xf32> to vector<128xf32>
    %28 = vector.shape_cast %27 : vector<128xf32> to vector<1x128xf32>
    %29 = arith.addf %26, %28 : vector<1x128xf32>
    %cst_27 = arith.constant dense<0.000000e+00> : vector<128xf32>
    %30 = vector.multi_reduction <add>, %19, %cst_27 [0] : vector<128x128xf32> to vector<128xf32>
    %31 = vector.shape_cast %30 : vector<128xf32> to vector<1x128xf32>
    %32 = arith.addf %29, %31 : vector<1x128xf32>
    %33 = arith.mulf %4, %4 : vector<128x128xf32>
    %cst_28 = arith.constant dense<0.000000e+00> : vector<128xf32>
    %34 = vector.multi_reduction <add>, %33, %cst_28 [0] : vector<128x128xf32> to vector<128xf32>
    %35 = vector.shape_cast %34 : vector<128xf32> to vector<1x128xf32>
    %cst_29 = arith.constant 0.000000e+00 : f32
    %36 = vector.broadcast %cst_29 : f32 to vector<1x128xf32>
    %37 = arith.addf %36, %35 : vector<1x128xf32>
    %38 = arith.mulf %9, %9 : vector<128x128xf32>
    %cst_30 = arith.constant dense<0.000000e+00> : vector<128xf32>
    %39 = vector.multi_reduction <add>, %38, %cst_30 [0] : vector<128x128xf32> to vector<128xf32>
    %40 = vector.shape_cast %39 : vector<128xf32> to vector<1x128xf32>
    %41 = arith.addf %37, %40 : vector<1x128xf32>
    %42 = arith.mulf %14, %14 : vector<128x128xf32>
    %cst_31 = arith.constant dense<0.000000e+00> : vector<128xf32>
    %43 = vector.multi_reduction <add>, %42, %cst_31 [0] : vector<128x128xf32> to vector<128xf32>
    %44 = vector.shape_cast %43 : vector<128xf32> to vector<1x128xf32>
    %45 = arith.addf %41, %44 : vector<1x128xf32>
    %46 = arith.mulf %19, %19 : vector<128x128xf32>
    %cst_32 = arith.constant dense<0.000000e+00> : vector<128xf32>
    %47 = vector.multi_reduction <add>, %46, %cst_32 [0] : vector<128x128xf32> to vector<128xf32>
    %48 = vector.shape_cast %47 : vector<128xf32> to vector<1x128xf32>
    %49 = arith.addf %45, %48 : vector<1x128xf32>
    %cst_33 = arith.constant 0.001953125 : f32
    %50 = vector.broadcast %cst_33 : f32 to vector<1x128xf32>
    %51 = arith.mulf %32, %50 : vector<1x128xf32>
    %cst_34 = arith.constant 0.001953125 : f32
    %52 = vector.broadcast %cst_34 : f32 to vector<1x128xf32>
    %53 = arith.mulf %49, %52 : vector<1x128xf32>
    %54 = arith.mulf %51, %51 : vector<1x128xf32>
    %55 = arith.subf %53, %54 : vector<1x128xf32>
    %cst_35 = arith.constant 0.000000e+00 : f32
    %56 = vector.broadcast %cst_35 : f32 to vector<1x128xf32>
    %57 = arith.maximumf %55, %56 : vector<1x128xf32>
    %cst_36 = arith.constant 9.99999974E-6 : f32
    %58 = vector.broadcast %cst_36 : f32 to vector<1x128xf32>
    %59 = arith.addf %57, %58 : vector<1x128xf32>
    %60 = math.rsqrt %59 : vector<1x128xf32>
    %61 = vector.broadcast %51 : vector<1x128xf32> to vector<128x128xf32>
    %62 = arith.subf %4, %61 : vector<128x128xf32>
    %63 = vector.broadcast %60 : vector<1x128xf32> to vector<128x128xf32>
    %64 = arith.mulf %62, %63 : vector<128x128xf32>
    %65 = arith.negf %64 : vector<128x128xf32>
    %66 = math.exp %65 : vector<128x128xf32>
    %cst_37 = arith.constant 1.000000e+00 : f32
    %67 = vector.broadcast %cst_37 : f32 to vector<128x128xf32>
    %68 = arith.addf %67, %66 : vector<128x128xf32>
    %69 = arith.divf %67, %68 : vector<128x128xf32>
    %70 = arith.truncf %69 : vector<128x128xf32> to vector<128x128xbf16>
    %c0_38 = arith.constant 0 : index
    %c0_39 = arith.constant 0 : index
    %c0_40 = arith.constant 0 : index
    %71 = vector.load %arg3[%c0_38, %c0_39, %c0_40] : memref<4x128x128xbf16, #tpu.memory_space<vmem>>, vector<1x128x128xbf16>
    %72 = vector.shape_cast %71 : vector<1x128x128xbf16> to vector<128x128xbf16>
    %73 = vector.shape_cast %70 : vector<128x128xbf16> to vector<1x128x128xbf16>
    tpu.vector_store %arg3[%c0_38, %c0_39, %c0_40], %73 {strides = array<i32>} : memref<4x128x128xbf16, #tpu.memory_space<vmem>>, vector<1x128x128xbf16>,
    %74 = vector.broadcast %51 : vector<1x128xf32> to vector<128x128xf32>
    %75 = arith.subf %9, %74 : vector<128x128xf32>
    %76 = vector.broadcast %60 : vector<1x128xf32> to vector<128x128xf32>
    %77 = arith.mulf %75, %76 : vector<128x128xf32>
    %78 = arith.negf %77 : vector<128x128xf32>
    %79 = math.exp %78 : vector<128x128xf32>
    %cst_41 = arith.constant 1.000000e+00 : f32
    %80 = vector.broadcast %cst_41 : f32 to vector<128x128xf32>
    %81 = arith.addf %80, %79 : vector<128x128xf32>
    %82 = arith.divf %80, %81 : vector<128x128xf32>
    %83 = arith.truncf %82 : vector<128x128xf32> to vector<128x128xbf16>
    %c1_42 = arith.constant 1 : index
    %c0_43 = arith.constant 0 : index
    %c0_44 = arith.constant 0 : index
    %84 = vector.load %arg3[%c1_42, %c0_43, %c0_44] : memref<4x128x128xbf16, #tpu.memory_space<vmem>>, vector<1x128x128xbf16>
    %85 = vector.shape_cast %84 : vector<1x128x128xbf16> to vector<128x128xbf16>
    %86 = vector.shape_cast %83 : vector<128x128xbf16> to vector<1x128x128xbf16>
    tpu.vector_store %arg3[%c1_42, %c0_43, %c0_44], %86 {strides = array<i32>} : memref<4x128x128xbf16, #tpu.memory_space<vmem>>, vector<1x128x128xbf16>,
    %87 = vector.broadcast %51 : vector<1x128xf32> to vector<128x128xf32>
    %88 = arith.subf %14, %87 : vector<128x128xf32>
    %89 = vector.broadcast %60 : vector<1x128xf32> to vector<128x128xf32>
    %90 = arith.mulf %88, %89 : vector<128x128xf32>
    %91 = arith.negf %90 : vector<128x128xf32>
    %92 = math.exp %91 : vector<128x128xf32>
    %cst_45 = arith.constant 1.000000e+00 : f32
    %93 = vector.broadcast %cst_45 : f32 to vector<128x128xf32>
    %94 = arith.addf %93, %92 : vector<128x128xf32>
    %95 = arith.divf %93, %94 : vector<128x128xf32>
    %96 = arith.truncf %95 : vector<128x128xf32> to vector<128x128xbf16>
    %c2_46 = arith.constant 2 : index
    %c0_47 = arith.constant 0 : index
    %c0_48 = arith.constant 0 : index
    %97 = vector.load %arg3[%c2_46, %c0_47, %c0_48] : memref<4x128x128xbf16, #tpu.memory_space<vmem>>, vector<1x128x128xbf16>
    %98 = vector.shape_cast %97 : vector<1x128x128xbf16> to vector<128x128xbf16>
    %99 = vector.shape_cast %96 : vector<128x128xbf16> to vector<1x128x128xbf16>
    tpu.vector_store %arg3[%c2_46, %c0_47, %c0_48], %99 {strides = array<i32>} : memref<4x128x128xbf16, #tpu.memory_space<vmem>>, vector<1x128x128xbf16>,
    %100 = vector.broadcast %51 : vector<1x128xf32> to vector<128x128xf32>
    %101 = arith.subf %19, %100 : vector<128x128xf32>
    %102 = vector.broadcast %60 : vector<1x128xf32> to vector<128x128xf32>
    %103 = arith.mulf %101, %102 : vector<128x128xf32>
    %104 = arith.negf %103 : vector<128x128xf32>
    %105 = math.exp %104 : vector<128x128xf32>
    %cst_49 = arith.constant 1.000000e+00 : f32
    %106 = vector.broadcast %cst_49 : f32 to vector<128x128xf32>
    %107 = arith.addf %106, %105 : vector<128x128xf32>
    %108 = arith.divf %106, %107 : vector<128x128xf32>
    %109 = arith.truncf %108 : vector<128x128xf32> to vector<128x128xbf16>
    %c3_50 = arith.constant 3 : index
    %c0_51 = arith.constant 0 : index
    %c0_52 = arith.constant 0 : index
    %110 = vector.load %arg3[%c3_50, %c0_51, %c0_52] : memref<4x128x128xbf16, #tpu.memory_space<vmem>>, vector<1x128x128xbf16>
    %111 = vector.shape_cast %110 : vector<1x128x128xbf16> to vector<128x128xbf16>
    %112 = vector.shape_cast %109 : vector<128x128xbf16> to vector<1x128x128xbf16>
    tpu.vector_store %arg3[%c3_50, %c0_51, %c0_52], %112 {strides = array<i32>} : memref<4x128x128xbf16, #tpu.memory_space<vmem>>, vector<1x128x128xbf16>,
    return
  }
  func.func @transform_0(%arg0: i32) -> (i32, i32, i32) {
    %c0_i32 = arith.constant 0 : i32
    %c0_i32_0 = arith.constant 0 : i32
    %c0_i32_1 = arith.constant 0 : i32
    %c0_i32_2 = arith.constant 0 : i32
    return %c0_i32, %c0_i32_0, %c0_i32_1 : i32, i32, i32
  }
  func.func @transform_1(%arg0: i32) -> (i32, i32, i32) {
    %c0_i32 = arith.constant 0 : i32
    %c0_i32_0 = arith.constant 0 : i32
    %c0_i32_1 = arith.constant 0 : i32
    %c0_i32_2 = arith.constant 0 : i32
    return %c0_i32, %c0_i32_0, %c0_i32_1 : i32, i32, i32
  }
  func.func @transform_2(%arg0: i32) -> (i32, i32, i32) {
    %c0_i32 = arith.constant 0 : i32
    %c0_i32_0 = arith.constant 0 : i32
    %c0_i32_1 = arith.constant 0 : i32
    %c0_i32_2 = arith.constant 0 : i32
    return %c0_i32, %c0_i32_0, %c0_i32_1 : i32, i32, i32
  }
}

</mosaic_0001>

<bundles_post_ra>
// kernel: unet_forward.8
= control target key start
LH: loop header
LB: loop body
LE: loop exit
PB: predicated region body
PF: predicated region fallthrough
CT: control target
= control target key end

     0   :  { %vm86_vm0 = vcmask 130048   ;;  %s579_s1 = inlined_call_operand.vmem [shape: bf16[16,128], index: 1, kind: input, shape index: {}]   ;;  %s580_s0 = inlined_call_operand.vmem [shape: bf16[128,16], index: 0, kind: input, shape index: {}]   ;;  %s581_s2 = inlined_call_operand.vmem [shape: f32[1,128], index: 2, kind: input, shape index: {}]   ;;  %s582_s3 = inlined_call_operand.vmem [shape: bf16[128,128], index: 3, kind: output, shape index: {}]  }
   0x1   :  { %v466_v0 = vld [vmem:[%s579_s1] sm:$0xff]   ;;  %v469_v3 = vld [vmem:[%s580_s0 + $0x8] sm:$0xff]   ;;  %v471_v5 = vld [vmem:[%s580_s0 + $0x10] sm:$0xff]  }
   0x2   :  { %v467_v1 = vld [vmem:[%s580_s0] sm:$0xff]   ;;  %446 = vmatprep.subr.bf16.mxu0 %v466_v0  ;;  %464 = vmatprep.subr.bf16.mxu1 %v466_v0  ;;  %v470_v4 = vld [vmem:[%s580_s0 + $0x28] sm:$0xff]   ;;  %v472_v6 = vld [vmem:[%s580_s0 + $0x30] sm:$0xff]  }
   0x3   :  { %v468_v2 = vld [vmem:[%s580_s0 + $0x20] sm:$0xff]   ;;  %447 = vmatpush3.bf16.msra.mxu0 %v466_v0  ;;  %465 = vmatpush3.bf16.msra.mxu1 %v466_v0  ;;  %v473_v7 = vld [vmem:[%s580_s0 + $0x18] sm:$0xff]  }
   0x4   :  { %448 = vmatprep.mubr.msk.bf16.mxu0 %vm86_vm0, %v467_v1  ;;  %456 = vmatprep.mubr.msk.bf16.mxu1 %vm86_vm0, %v468_v2  ;;  %v474_v8 = vld [vmem:[%s580_s0 + $0x38] sm:$0xff]   ;;  %v533_v9 = vld [vmem:[%s581_s2] ss:$0 sm:$0xff] }
   0x6   :  { %449 = vmatmul.mubr.msk.bf16.vlgmr.msra.gmra.mrb[0].mxu0 %vm86_vm0, %v469_v3  ;;  %457 = vmatmul.mubr.msk.bf16.vlgmr.msra.gmra.mrb[0].mxu1 %vm86_vm0, %v470_v4 }
   0x7   :  { %452 = vmatprep.mubr.msk.bf16.mxu0 %vm86_vm0, %v471_v5  ;;  %460 = vmatprep.mubr.msk.bf16.mxu1 %vm86_vm0, %v472_v6 }
   0xe   :  { %453 = vmatmul.mubr.msk.bf16.gmra.mrb[4].mxu0 %vm86_vm0, %v473_v7  ;;  %461 = vmatmul.mubr.msk.bf16.gmra.mrb[4].mxu1 %vm86_vm0, %v474_v8 }
  0xd9   :  { %v450_v10 = vpop.f32.mrb[0].mxu0  ;;  %v458_v11 = vpop.f32.mrb[0].mxu1 }
  0xda   :  { %v154_v12 = vadd.f32 %v450_v10, %v533_v9  ;;  %v186_v13 = vadd.f32 %v458_v11, %v533_v9  ;;  %v145_v14 = vpop.f32.mrb[1].mxu0  ;;  %v177_v15 = vpop.f32.mrb[1].mxu1 }
  0xdb   :  { %v146_v16 = vadd.f32 %v533_v9, %v145_v14  ;;  %v178_v17 = vadd.f32 %v533_v9, %v177_v15  ;;  %v451_v18 = vpop.f32.mrb[2].mxu0  ;;  %v459_v19 = vpop.f32.mrb[2].mxu1 }
  0xdc   :  { %vm210_vm1 = vcmp.ge.f32.partialorder %v154_v12, 0.0  ;;  %v226_v20 = vmul.f32 0.2, %v154_v12  ;;  %vm218_vm2 = vcmp.ge.f32.partialorder %v186_v13, 0.0  ;;  %v234_v21 = vmul.f32 0.2, %v186_v13 }
  0xdd   :  { %vm208_vm3 = vcmp.ge.f32.partialorder %v146_v16, 0.0  ;;  %v224_v22 = vmul.f32 0.2, %v146_v16  ;;  %vm216_vm4 = vcmp.ge.f32.partialorder %v178_v17, 0.0  ;;  %v232_v23 = vmul.f32 0.2, %v178_v17 }
  0xde   :  { %v157_v24 = vadd.f32 %v451_v18, %v533_v9  ;;  %v189_v25 = vadd.f32 %v459_v19, %v533_v9  ;;  %v148_v26 = vpop.f32.mrb[3].mxu0  ;;  %v180_v27 = vpop.f32.mrb[3].mxu1  ;;  %v242_v28 = vsel %vm210_vm1, %v154_v12, %v226_v20  ;;  %v250_v29 = vsel %vm218_vm2, %v186_v13, %v234_v21 }
  0xdf   :  { %v149_v30 = vadd.f32 %v533_v9, %v148_v26  ;;  %v181_v31 = vadd.f32 %v533_v9, %v180_v27  ;;  %v240_v36 = vsel %vm208_vm3, %v146_v16, %v224_v22  ;;  %v248_v37 = vsel %vm216_vm4, %v178_v17, %v232_v23 }
  0xe0   :  { %vm211_vm5 = vcmp.ge.f32.partialorder %v157_v24, 0.0  ;;  %v227_v32 = vmul.f32 0.2, %v157_v24  ;;  %vm219_vm6 = vcmp.ge.f32.partialorder %v189_v25, 0.0  ;;  %v235_v33 = vmul.f32 0.2, %v189_v25 }
  0xe1   :  { %vm209_vm7 = vcmp.ge.f32.partialorder %v149_v30, 0.0  ;;  %v225_v34 = vmul.f32 0.2, %v149_v30  ;;  %vm217_vm8 = vcmp.ge.f32.partialorder %v181_v31, 0.0  ;;  %v233_v35 = vmul.f32 0.2, %v181_v31 }
  0xe2   :  { %v243_v38 = vsel %vm211_vm5, %v157_v24, %v227_v32  ;;  %v251_v39 = vsel %vm219_vm6, %v189_v25, %v235_v33  ;;  %v454_v40 = vpop.f32.mrb[4].mxu0  ;;  %v462_v41 = vpop.f32.mrb[4].mxu1 }
  0xe3   :  { %v398_v42 = vpack.c.bf16 %v243_v38, %v242_v28  ;;  %v418_v43 = vpack.c.bf16 %v251_v39, %v250_v29  ;;  %v241_v44 = vsel %vm209_vm7, %v149_v30, %v225_v34  ;;  %v249_v45 = vsel %vm217_vm8, %v181_v31, %v233_v35  ;;  %v161_v46 = vpop.f32.mrb[5].mxu0  ;;  %v193_v47 = vpop.f32.mrb[5].mxu1 }
  0xe4   :  { %v393_v48 = vpack.c.bf16 %v241_v44, %v240_v36  ;;  %v413_v49 = vpack.c.bf16 %v249_v45, %v248_v37  ;;  %v170_v50 = vadd.f32 %v454_v40, %v533_v9  ;;  %v202_v51 = vadd.f32 %v462_v41, %v533_v9  ;;  %v455_v52 = vpop.f32.mrb[6].mxu0  ;;  %v463_v53 = vpop.f32.mrb[6].mxu1 }
  0xe5   :  { %430 = vst [vmem:[%s582_s3 + $0x8] sm:$0xff] %v398_v42   ;;  %434 = vst [vmem:[%s582_s3 + $0x28] sm:$0xff] %v418_v43   ;;  %v162_v54 = vadd.f32 %v533_v9, %v161_v46  ;;  %v194_v55 = vadd.f32 %v533_v9, %v193_v47  ;;  %v173_v56 = vadd.f32 %v455_v52, %v533_v9  ;;  %v164_v58 = vpop.f32.mrb[7].mxu0  ;;  %v196_v59 = vpop.f32.mrb[7].mxu1 }
  0xe6   :  { %v205_v57 = vadd.f32 %v463_v53, %v533_v9  ;;  %394 = vst [vmem:[%s582_s3] sm:$0xff] %v393_v48   ;;  %433 = vst [vmem:[%s582_s3 + $0x20] sm:$0xff] %v413_v49   ;;  %v230_v60 = vmul.f32 0.2, %v170_v50  ;;  %vm214_vm9 = vcmp.ge.f32.partialorder %v170_v50, 0.0  ;;  %v238_v61 = vmul.f32 0.2, %v202_v51 }
  0xe7   :  { %vm222_vm10 = vcmp.ge.f32.partialorder %v202_v51, 0.0  ;;  %vm212_vm11 = vcmp.ge.f32.partialorder %v162_v54, 0.0  ;;  %vm215_vm12 = vcmp.ge.f32.partialorder %v173_v56, 0.0  ;;  %v231_v62 = vmul.f32 0.2, %v173_v56 }
  0xe8   :  { %v228_v63 = vmul.f32 0.2, %v162_v54  ;;  %vm220_vm13 = vcmp.ge.f32.partialorder %v194_v55, 0.0  ;;  %vm223_vm14 = vcmp.ge.f32.partialorder %v205_v57, 0.0  ;;  %v239_v0 = vmul.f32 0.2, %v205_v57 }
  0xe9   :  { %v246_v1 = vsel %vm214_vm9, %v170_v50, %v230_v60  ;;  %v247_v2 = vsel %vm215_vm12, %v173_v56, %v231_v62  ;;  %v165_v3 = vadd.f32 %v533_v9, %v164_v58  ;;  %v197_v4 = vadd.f32 %v533_v9, %v196_v59 }
  0xea   :  { %v254_v5 = vsel %vm222_vm10, %v202_v51, %v238_v61  ;;  %v236_v6 = vmul.f32 0.2, %v194_v55  ;;  %v408_v7 = vpack.c.bf16 %v247_v2, %v246_v1  ;;  %v255_v8 = vsel %vm223_vm14, %v205_v57, %v239_v0 }
  0xeb   :  { %v428_v10 = vpack.c.bf16 %v255_v8, %v254_v5  ;;  %vm213_vm15 = vcmp.ge.f32.partialorder %v165_v3, 0.0  ;;  %v229_v11 = vmul.f32 0.2, %v165_v3  ;;  %vm221_vm0 = vcmp.ge.f32.partialorder %v197_v4, 0.0 }
  0xec   :  { %432 = vst [vmem:[%s582_s3 + $0x18] sm:$0xff] %v408_v7   ;;  %v237_v12 = vmul.f32 0.2, %v197_v4  ;;  %v244_v13 = vsel %vm212_vm11, %v162_v54, %v228_v63  ;;  %v252_v14 = vsel %vm220_vm13, %v194_v55, %v236_v6 }
  0xed   :  { %436 = vst [vmem:[%s582_s3 + $0x38] sm:$0xff] %v428_v10   ;;  %v245_v9 = vsel %vm213_vm15, %v165_v3, %v229_v11 }
  0xee   :  { %v403_v15 = vpack.c.bf16 %v245_v9, %v244_v13  ;;  %v253_v16 = vsel %vm221_vm0, %v197_v4, %v237_v12 }
  0xef   :  { %v423_v17 = vpack.c.bf16 %v253_v16, %v252_v14 }
  0xf0   :  { %431 = vst [vmem:[%s582_s3 + $0x10] sm:$0xff] %v403_v15  }
  0xf1   :  { %435 = vst [vmem:[%s582_s3 + $0x30] sm:$0xff] %v423_v17  }

// kernel: unet_forward.9
= control target key start
LH: loop header
LB: loop body
LE: loop exit
PB: predicated region body
PF: predicated region fallthrough
CT: control target
= control target key end

     0   :  { %s475_s1 = inlined_call_operand.vmem [shape: bf16[256,128], index: 1, kind: input, shape index: {}]   ;;  %s476_s0 = inlined_call_operand.vmem [shape: bf16[32,256], index: 0, kind: input, shape index: {}]   ;;  %s477_s2 = inlined_call_operand.vmem [shape: bf16[32,128], index: 2, kind: output, shape index: {}]  }
   0x1   :  { %v370_v0 = vld [vmem:[%s475_s1 + $0x40] sm:$0xff]   ;;  %v372_v2 = vld [vmem:[%s475_s1 + $0x48] sm:$0xff]   ;;  %v374_v4 = vld [vmem:[%s475_s1 + $0x50] sm:$0xff]  }
   0x2   :  { %v371_v1 = vld [vmem:[%s475_s1] sm:$0xff]   ;;  %326 = vmatprep.subr.bf16.mxu0 %v370_v0  ;;  %354 = vmatprep.subr.bf16.mxu1 %v370_v0  ;;  %v373_v3 = vld [vmem:[%s475_s1 + $0x8] sm:$0xff]   ;;  %v375_v5 = vld [vmem:[%s475_s1 + $0x10] sm:$0xff]  }
   0x3   :  { %327 = vmatpush3.bf16.msra.mxu0 %v371_v1  ;;  %362 = vmatpush3.bf16.msra.mxu1 %v371_v1  ;;  %v376_v6 = vld [vmem:[%s475_s1 + $0x58] sm:$0xff]   ;;  %v378_v8 = vld [vmem:[%s475_s1 + $0x60] sm:$0xff]   ;;  %v380_v10 = vld [vmem:[%s475_s1 + $0x68] sm:$0xff]  }
   0x4   :  { %328 = vmatprep.subr.bf16.mxu0 %v372_v2  ;;  %355 = vmatprep.subr.bf16.mxu1 %v372_v2  ;;  %v377_v7 = vld [vmem:[%s475_s1 + $0x18] sm:$0xff]   ;;  %v379_v9 = vld [vmem:[%s475_s1 + $0x20] sm:$0xff]   ;;  %v381_v13 = vld [vmem:[%s475_s1 + $0x28] sm:$0xff]  }
   0x5   :  { %v388_v11 = vld [vmem:[%s476_s0 + $0x4] ss:$8 sps:$4 sm:$0xff]   ;;  %v391_v12 = vld [vmem:[%s476_s0 + $0x14] ss:$8 sps:$4 sm:$0xff]   ;;  %v386_v18 = vld [vmem:[%s476_s0] ss:$8 sps:$4 sm:$0xff]  }
   0x6   :  { %v382_v14 = vld [vmem:[%s475_s1 + $0x70] sm:$0xff]   ;;  %196 = vmatprep.mubr.bf16.mxu0 %v388_v11  ;;  %204 = vmatprep.mubr.bf16.mxu1 %v391_v12  ;;  %v384_v16 = vld [vmem:[%s475_s1 + $0x78] sm:$0xff]  }
   0x7   :  { %329 = vmatpush3.bf16.msra.mxu0 %v373_v3  ;;  %363 = vmatpush3.bf16.msra.mxu1 %v373_v3  ;;  %v383_v15 = vld [vmem:[%s475_s1 + $0x30] sm:$0xff]   ;;  %v385_v17 = vld [vmem:[%s475_s1 + $0x38] sm:$0xff]  }
   0x8   :  { %330 = vmatprep.subr.bf16.mxu0 %v374_v4  ;;  %356 = vmatprep.subr.bf16.mxu1 %v374_v4  ;;  %v389_v19 = vld [vmem:[%s476_s0 + $0x10] ss:$8 sps:$4 sm:$0xff]  }
   0xb   :  { %331 = vmatpush3.bf16.msra.mxu0 %v375_v5  ;;  %364 = vmatpush3.bf16.msra.mxu1 %v375_v5 }
   0xc   :  { %332 = vmatprep.subr.bf16.mxu0 %v376_v6  ;;  %357 = vmatprep.subr.bf16.mxu1 %v376_v6 }
   0xf   :  { %333 = vmatpush3.bf16.msra.mxu0 %v377_v7  ;;  %365 = vmatpush3.bf16.msra.mxu1 %v377_v7 }
  0x10   :  { %334 = vmatprep.subr.bf16.mxu0 %v378_v8  ;;  %358 = vmatprep.subr.bf16.mxu1 %v378_v8 }
  0x13   :  { %335 = vmatpush3.bf16.msra.mxu0 %v379_v9  ;;  %366 = vmatpush3.bf16.msra.mxu1 %v379_v9 }
  0x14   :  { %336 = vmatprep.subr.bf16.mxu0 %v380_v10  ;;  %359 = vmatprep.subr.bf16.mxu1 %v380_v10 }
  0x17   :  { %337 = vmatpush3.bf16.msra.mxu0 %v381_v13  ;;  %367 = vmatpush3.bf16.msra.mxu1 %v381_v13 }
  0x18   :  { %338 = vmatprep.subr.bf16.mxu0 %v382_v14  ;;  %360 = vmatprep.subr.bf16.mxu1 %v382_v14 }
  0x1b   :  { %339 = vmatpush3.bf16.msra.mxu0 %v383_v15  ;;  %368 = vmatpush3.bf16.msra.mxu1 %v383_v15 }
  0x1c   :  { %340 = vmatprep.subr.bf16.mxu0 %v384_v16  ;;  %361 = vmatprep.subr.bf16.mxu1 %v384_v16 }
  0x1f   :  { %341 = vmatpush3.bf16.msra.mxu0 %v385_v17  ;;  %369 = vmatpush3.bf16.msra.mxu1 %v385_v17 }
  0x22   :  { %197 = vmatmul.mubr.bf16.vlgmr.msra.gmra.mrb[0].mxu0 %v386_v18  ;;  %205 = vmatmul.mubr.bf16.vlgmr.msra.gmra.mrb[0].mxu1 %v389_v19 }
  0xf5   :  { %v342_v20 = vpop.f32.mrb[0].mxu0  ;;  %v348_v21 = vpop.f32.mrb[0].mxu1 }
  0xf6   :  { %v343_v22 = vpop.f32.mrb[1].mxu0  ;;  %v349_v23 = vpop.f32.mrb[1].mxu1 }
  0xf7   :  { %v344_v24 = vadd.f32 %v343_v22, %v342_v20  ;;  %v345_v25 = vpop.f32.mrb[2].mxu0  ;;  %v350_v26 = vadd.f32 %v349_v23, %v348_v21  ;;  %v351_v27 = vpop.f32.mrb[2].mxu1 }
  0xf8   :  { %v346_v28 = vpop.f32.mrb[3].mxu0  ;;  %v352_v29 = vpop.f32.mrb[3].mxu1 }
  0xf9   :  { %v347_v30 = vadd.f32 %v346_v28, %v345_v25  ;;  %v353_v31 = vadd.f32 %v352_v29, %v351_v27  ;;  %v224_v32 = vmul.f32 %v344_v24, %v344_v24  ;;  %v226_v33 = vmul.f32 %v350_v26, %v350_v26 }
  0xfb   :  { %v213_v34 = vadd.f32 %v347_v30, %v344_v24  ;;  %v225_v35 = vmul.f32 %v347_v30, %v347_v30  ;;  %v227_v39 = vmul.f32 %v353_v31, %v353_v31 }
  0xfd   :  { %v228_v36 = vadd.f32 %v225_v35, %v224_v32  ;;  %v214_v37 = vadd.f32 %v350_v26, %v213_v34 }
  0xff   :  { %v215_v38 = vadd.f32 %v353_v31, %v214_v37  ;;  %v229_v40 = vadd.f32 %v228_v36, %v226_v33 }
 0x101   :  { %v216_v41 = vrot.slane %v215_v38, 4  ;;  %v230_v42 = vadd.f32 %v229_v40, %v227_v39 }
 0x103   :  { %v217_v43 = vadd.f32 %v216_v41, %v215_v38  ;;  %v231_v44 = vrot.slane %v230_v42, 4 }
 0x105   :  { %v218_v45 = vrot.slane %v217_v43, 2  ;;  %v232_v46 = vadd.f32 %v231_v44, %v230_v42 }
 0x107   :  { %v219_v47 = vadd.f32 %v218_v45, %v217_v43  ;;  %v233_v48 = vrot.slane %v232_v46, 2 }
 0x109   :  { %v220_v49 = vrot.slane %v219_v47, 1  ;;  %v234_v50 = vadd.f32 %v233_v48, %v232_v46 }
 0x10b   :  { %v221_v51 = vadd.f32 %v220_v49, %v219_v47  ;;  %v235_v52 = vrot.slane %v234_v50, 1 }
 0x10d   :  { %v223_v53 = vmul.f32 0.03125, %v221_v51  ;;  %v236_v54 = vadd.f32 %v235_v52, %v234_v50 }
 0x10f   :  { %v237_v55 = vmul.f32 0.03125, %v236_v54  ;;  %v238_v56 = vmul.f32 %v223_v53, %v223_v53  ;;  %v243_v57 = vsub.f32 %v344_v24, %v223_v53  ;;  %v244_v58 = vsub.f32 %v347_v30, %v223_v53 }
 0x110   :  { %v245_v59 = vsub.f32 %v350_v26, %v223_v53  ;;  %v246_v60 = vsub.f32 %v353_v31, %v223_v53 }
 0x111   :  { %v239_v61 = vsub.f32 %v237_v55, %v238_v56 }
 0x113   :  { %v240_v62 = vmax.f32 %v239_v61, 0.0 }
 0x115   :  { %v241_v63 = vadd.f32 1e-05, %v240_v62 }
 0x117   :  { %392 = vrsqrt.f32 %v241_v63 }
 0x121   :  { %v393_v0 = vpop.eup %392 }
 0x122   :  { %v247_v1 = vmul.f32 %v393_v0, %v243_v57  ;;  %v248_v2 = vmul.f32 %v393_v0, %v244_v58  ;;  %v249_v3 = vmul.f32 %v393_v0, %v245_v59  ;;  %v250_v4 = vmul.f32 %v393_v0, %v246_v60 }
 0x124   :  { %vm251_vm0 = vcmp.ge.f32.partialorder %v247_v1, 0.0  ;;  %vm252_vm1 = vcmp.ge.f32.partialorder %v248_v2, 0.0  ;;  %vm253_vm2 = vcmp.ge.f32.partialorder %v249_v3, 0.0  ;;  %vm254_vm3 = vcmp.ge.f32.partialorder %v250_v4, 0.0 }
 0x125   :  { %v255_v5 = vmul.f32 0.2, %v247_v1  ;;  %v256_v6 = vmul.f32 0.2, %v248_v2  ;;  %v257_v7 = vmul.f32 0.2, %v249_v3 }
 0x126   :  { %v258_v8 = vmul.f32 0.2, %v250_v4 }
 0x127   :  { %v259_v9 = vsel %vm251_vm0, %v247_v1, %v255_v5  ;;  %v260_v10 = vsel %vm252_vm1, %v248_v2, %v256_v6  ;;  %v261_v11 = vsel %vm253_vm2, %v249_v3, %v257_v7 }
 0x128   :  { %v262_v12 = vsel %vm254_vm3, %v250_v4, %v258_v8  ;;  %v318_v13 = vpack.c.bf16 %v260_v10, %v259_v9 }
 0x129   :  { %v323_v14 = vpack.c.bf16 %v262_v12, %v261_v11 }
 0x12a   :  { %319 = vst [vmem:[%s477_s2] sm:$0xff] %v318_v13  }
 0x12b   :  { %325 = vst [vmem:[%s477_s2 + $0x8] sm:$0xff] %v323_v14  }

// kernel: unet_forward.10
= control target key start
LH: loop header
LB: loop body
LE: loop exit
PB: predicated region body
PF: predicated region fallthrough
CT: control target
= control target key end

     0   :  { %s634_s1 = inlined_call_operand.vmem [shape: bf16[512,128], index: 1, kind: input, shape index: {}]   ;;  %s635_s0 = inlined_call_operand.vmem [shape: bf16[8,512], index: 0, kind: input, shape index: {}]   ;;  %s636_s2 = inlined_call_operand.vmem [shape: bf16[8,128], index: 2, kind: output, shape index: {}]  }
   0x1   :  { %v476_v0 = vld [vmem:[%s634_s1 + $0x40] sm:$0xff]   ;;  %v480_v4 = vld [vmem:[%s634_s1 + $0x48] sm:$0xff]   ;;  %v484_v8 = vld [vmem:[%s634_s1 + $0x50] sm:$0xff]  }
   0x2   :  { %v477_v1 = vld [vmem:[%s634_s1 + $0xc0] sm:$0xff]   ;;  %432 = vmatprep.subr.bf16.mxu0 %v476_v0  ;;  %v481_v5 = vld [vmem:[%s634_s1 + $0xc8] sm:$0xff]   ;;  %v485_v9 = vld [vmem:[%s634_s1 + $0xd0] sm:$0xff]  }
   0x3   :  { %v478_v2 = vld [vmem:[%s634_s1] sm:$0xff]   ;;  %454 = vmatprep.subr.bf16.mxu1 %v477_v1  ;;  %v482_v6 = vld [vmem:[%s634_s1 + $0x8] sm:$0xff]   ;;  %v486_v10 = vld [vmem:[%s634_s1 + $0x10] sm:$0xff]  }
   0x4   :  { %v479_v3 = vld [vmem:[%s634_s1 + $0x80] sm:$0xff]   ;;  %433 = vmatpush3.bf16.msra.mxu0 %v478_v2  ;;  %v483_v7 = vld [vmem:[%s634_s1 + $0x88] sm:$0xff]   ;;  %v487_v11 = vld [vmem:[%s634_s1 + $0x90] sm:$0xff]  }
   0x5   :  { %455 = vmatpush3.bf16.msra.mxu1 %v479_v3  ;;  %434 = vmatprep.subr.bf16.mxu0 %v480_v4  ;;  %v488_v12 = vld [vmem:[%s634_s1 + $0x58] sm:$0xff]   ;;  %v492_v16 = vld [vmem:[%s634_s1 + $0x60] sm:$0xff]   ;;  %v496_v20 = vld [vmem:[%s634_s1 + $0x68] sm:$0xff]  }
   0x6   :  { %456 = vmatprep.subr.bf16.mxu1 %v481_v5  ;;  %v489_v13 = vld [vmem:[%s634_s1 + $0xd8] sm:$0xff]   ;;  %v493_v17 = vld [vmem:[%s634_s1 + $0xe0] sm:$0xff]   ;;  %v497_v21 = vld [vmem:[%s634_s1 + $0xe8] sm:$0xff]  }
   0x7   :  { %v490_v14 = vld [vmem:[%s634_s1 + $0x18] sm:$0xff]   ;;  %v494_v18 = vld [vmem:[%s634_s1 + $0x20] sm:$0xff]   ;;  %v498_v22 = vld [vmem:[%s634_s1 + $0x28] sm:$0xff]  }
   0x8   :  { %435 = vmatpush3.bf16.msra.mxu0 %v482_v6  ;;  %v491_v15 = vld [vmem:[%s634_s1 + $0x98] sm:$0xff]   ;;  %v495_v19 = vld [vmem:[%s634_s1 + $0xa0] sm:$0xff]   ;;  %v499_v23 = vld [vmem:[%s634_s1 + $0xa8] sm:$0xff]  }
   0x9   :  { %457 = vmatpush3.bf16.msra.mxu1 %v483_v7  ;;  %436 = vmatprep.subr.bf16.mxu0 %v484_v8  ;;  %v500_v24 = vld [vmem:[%s634_s1 + $0x70] sm:$0xff]   ;;  %v504_v28 = vld [vmem:[%s634_s1 + $0x78] sm:$0xff]   ;;  %v12_v32 = vld [vmem:[%s635_s0] sm:$0xff] }
   0xa   :  { %458 = vmatprep.subr.bf16.mxu1 %v485_v9  ;;  %v501_v25 = vld [vmem:[%s634_s1 + $0xf0] sm:$0xff]   ;;  %v505_v29 = vld [vmem:[%s634_s1 + $0xf8] sm:$0xff]   ;;  %v13_v33 = vld [vmem:[%s635_s0 + $0x8] sm:$0xff]  ;;  %v396_v34 = vcombine.low %v12_v32, %v12_v32  ;;  %v397_v35 = vcombine.high %v12_v32, %v12_v32 }
   0xb   :  { %v502_v26 = vld [vmem:[%s634_s1 + $0x30] sm:$0xff]   ;;  %v506_v30 = vld [vmem:[%s634_s1 + $0x38] sm:$0xff]   ;;  %v398_v36 = vcombine.low %v13_v33, %v13_v33  ;;  %v399_v37 = vcombine.high %v13_v33, %v13_v33 }
   0xc   :  { %437 = vmatpush3.bf16.msra.mxu0 %v486_v10  ;;  %v503_v27 = vld [vmem:[%s634_s1 + $0xb0] sm:$0xff]   ;;  %v507_v31 = vld [vmem:[%s634_s1 + $0xb8] sm:$0xff]   ;;  %316 = vmatprep.mubr.bf16.mxu0 %v397_v35 }
   0xd   :  { %459 = vmatpush3.bf16.msra.mxu1 %v487_v11  ;;  %438 = vmatprep.subr.bf16.mxu0 %v488_v12 }
   0xe   :  { %460 = vmatprep.subr.bf16.mxu1 %v489_v13  ;;  %356 = vmatprep.mubr.bf16.mxu1 %v399_v37 }
  0x10   :  { %439 = vmatpush3.bf16.msra.mxu0 %v490_v14 }
  0x11   :  { %461 = vmatpush3.bf16.msra.mxu1 %v491_v15  ;;  %440 = vmatprep.subr.bf16.mxu0 %v492_v16 }
  0x12   :  { %462 = vmatprep.subr.bf16.mxu1 %v493_v17 }
  0x14   :  { %441 = vmatpush3.bf16.msra.mxu0 %v494_v18 }
  0x15   :  { %463 = vmatpush3.bf16.msra.mxu1 %v495_v19  ;;  %442 = vmatprep.subr.bf16.mxu0 %v496_v20 }
  0x16   :  { %464 = vmatprep.subr.bf16.mxu1 %v497_v21 }
  0x18   :  { %443 = vmatpush3.bf16.msra.mxu0 %v498_v22 }
  0x19   :  { %465 = vmatpush3.bf16.msra.mxu1 %v499_v23  ;;  %444 = vmatprep.subr.bf16.mxu0 %v500_v24 }
  0x1a   :  { %466 = vmatprep.subr.bf16.mxu1 %v501_v25 }
  0x1c   :  { %445 = vmatpush3.bf16.msra.mxu0 %v502_v26 }
  0x1d   :  { %467 = vmatpush3.bf16.msra.mxu1 %v503_v27  ;;  %446 = vmatprep.subr.bf16.mxu0 %v504_v28 }
  0x1e   :  { %468 = vmatprep.subr.bf16.mxu1 %v505_v29 }
  0x20   :  { %447 = vmatpush3.bf16.msra.mxu0 %v506_v30 }
  0x21   :  { %469 = vmatpush3.bf16.msra.mxu1 %v507_v31 }
  0x23   :  { %317 = vmatmul.mubr.bf16.vlgmr.msra.gmra.mrb[0].mxu0 %v396_v34 }
  0x24   :  { %357 = vmatmul.mubr.bf16.vlgmr.msra.gmra.mrb[0].mxu1 %v398_v36 }
  0xf6   :  { %v448_v38 = vpop.f32.mrb[0].mxu0 }
  0xf7   :  { %v470_v39 = vpop.f32.mrb[0].mxu1  ;;  %v449_v40 = vpop.f32.mrb[1].mxu0 }
  0xf8   :  { %v471_v41 = vpop.f32.mrb[1].mxu1  ;;  %v450_v42 = vadd.f32 %v449_v40, %v448_v38  ;;  %v451_v44 = vpop.f32.mrb[2].mxu0 }
  0xf9   :  { %v472_v43 = vadd.f32 %v471_v41, %v470_v39  ;;  %v473_v45 = vpop.f32.mrb[2].mxu1  ;;  %v452_v46 = vpop.f32.mrb[3].mxu0 }
  0xfa   :  { %v474_v47 = vpop.f32.mrb[3].mxu1 }
  0xfb   :  { %v359_v48 = vadd.f32 %v472_v43, %v450_v42 }
  0xfd   :  { %v364_v49 = vrot.slane %v359_v48, 4  ;;  %v372_v50 = vmul.f32 %v359_v48, %v359_v48 }
  0xff   :  { %v365_v51 = vadd.f32 %v364_v49, %v359_v48  ;;  %v373_v52 = vrot.slane %v372_v50, 4 }
 0x101   :  { %v366_v53 = vrot.slane %v365_v51, 2  ;;  %v374_v54 = vadd.f32 %v373_v52, %v372_v50 }
 0x103   :  { %v367_v55 = vadd.f32 %v366_v53, %v365_v51  ;;  %v375_v56 = vrot.slane %v374_v54, 2 }
 0x105   :  { %v368_v57 = vrot.slane %v367_v55, 1  ;;  %v376_v58 = vadd.f32 %v375_v56, %v374_v54 }
 0x107   :  { %v369_v59 = vadd.f32 %v368_v57, %v367_v55  ;;  %v377_v60 = vrot.slane %v376_v58, 1 }
 0x109   :  { %v371_v61 = vmul.f32 0.125, %v369_v59  ;;  %v378_v62 = vadd.f32 %v377_v60, %v376_v58 }
 0x10b   :  { %v379_v63 = vmul.f32 0.125, %v378_v62  ;;  %v380_v0 = vmul.f32 %v371_v61, %v371_v61  ;;  %v385_v4 = vsub.f32 %v359_v48, %v371_v61 }
 0x10d   :  { %v381_v1 = vsub.f32 %v379_v63, %v380_v0 }
 0x10f   :  { %v382_v2 = vmax.f32 %v381_v1, 0.0 }
 0x111   :  { %v383_v3 = vadd.f32 1e-05, %v382_v2 }
 0x113   :  { %512 = vrsqrt.f32 %v383_v3 }
 0x11d   :  { %v513_v5 = vpop.eup %512 }
 0x11e   :  { %v386_v6 = vmul.f32 %v513_v5, %v385_v4 }
 0x120   :  { %vm387_vm0 = vcmp.ge.f32.partialorder %v386_v6, 0.0  ;;  %v388_v7 = vmul.f32 0.2, %v386_v6 }
 0x122   :  { %v389_v8 = vsel %vm387_vm0, %v386_v6, %v388_v7 }
 0x123   :  { %v390_v9 = vpack.c.bf16 %v389_v8, %v389_v8 }
 0x125   :  { %391 = vst [vmem:[%s636_s2] sm:$0xf] %v390_v9 }

// kernel: unet_forward.11
= control target key start
LH: loop header
LB: loop body
LE: loop exit
PB: predicated region body
PF: predicated region fallthrough
CT: control target
= control target key end

     0   :  { %v998_v22 = vmov 1966171168   ;;  %v146_v24 = vlaneseq  ;;  %vm743_vm0 = vcmask 1041408   ;;  %s1225_s1 = inlined_call_operand.vmem [shape: bf16[1024,128], index: 1, kind: input, shape index: {}]   ;;  %s1226_s0 = inlined_call_operand.vmem [shape: bf16[2,1024], index: 0, kind: input, shape index: {}]   ;;  %s1227_s2 = inlined_call_operand.vmem [shape: bf16[2,128], index: 2, kind: output, shape index: {}]  }
   0x1   :  { %v931_v0 = vld [vmem:[%s1225_s1 + $0x40] sm:$0xff]   ;;  %v935_v4 = vld [vmem:[%s1225_s1 + $0x48] sm:$0xff]   ;;  %v939_v8 = vld [vmem:[%s1225_s1 + $0x50] sm:$0xff]   ;;  %v144_v23 = vunpack.c.l.s4 %v998_v22 }
   0x2   :  { %v932_v1 = vld [vmem:[%s1225_s1 + $0xc0] sm:$0xff]   ;;  %842 = vmatprep.subr.bf16.mxu0 %v931_v0  ;;  %v936_v5 = vld [vmem:[%s1225_s1 + $0xc8] sm:$0xff]   ;;  %v940_v9 = vld [vmem:[%s1225_s1 + $0xd0] sm:$0xff]   ;;  %v147_v30 = vshrl.u32 %v146_v24, 7 }
   0x3   :  { %v933_v2 = vld [vmem:[%s1225_s1] sm:$0xff]   ;;  %864 = vmatprep.subr.bf16.mxu1 %v932_v1  ;;  %v937_v6 = vld [vmem:[%s1225_s1 + $0x8] sm:$0xff]   ;;  %v941_v10 = vld [vmem:[%s1225_s1 + $0x10] sm:$0xff]   ;;  %v145_v29 = vunpack.c.0.s8 %v144_v23 }
   0x4   :  { %v934_v3 = vld [vmem:[%s1225_s1 + $0x80] sm:$0xff]   ;;  %843 = vmatpush3.bf16.msra.mxu0 %v933_v2  ;;  %v938_v7 = vld [vmem:[%s1225_s1 + $0x88] sm:$0xff]   ;;  %v942_v11 = vld [vmem:[%s1225_s1 + $0x90] sm:$0xff]  }
   0x5   :  { %865 = vmatpush3.bf16.msra.mxu1 %v934_v3  ;;  %844 = vmatprep.subr.bf16.mxu0 %v935_v4  ;;  %v943_v12 = vld [vmem:[%s1225_s1 + $0x58] sm:$0xff]   ;;  %v947_v16 = vld [vmem:[%s1225_s1 + $0x60] sm:$0xff]   ;;  %v951_v20 = vld [vmem:[%s1225_s1 + $0x68] sm:$0xff]   ;;  %v1104_v35 = vsub.s32 %v145_v29, %v147_v30 }
   0x6   :  { %866 = vmatprep.subr.bf16.mxu1 %v936_v5  ;;  %v944_v13 = vld [vmem:[%s1225_s1 + $0xd8] sm:$0xff]   ;;  %v948_v17 = vld [vmem:[%s1225_s1 + $0xe0] sm:$0xff]   ;;  %v952_v21 = vld [vmem:[%s1225_s1 + $0xe8] sm:$0xff]  }
   0x7   :  { %v945_v14 = vld [vmem:[%s1225_s1 + $0x18] sm:$0xff]   ;;  %v949_v18 = vld [vmem:[%s1225_s1 + $0x20] sm:$0xff]   ;;  %v953_v25 = vld [vmem:[%s1225_s1 + $0x28] sm:$0xff]  }
   0x8   :  { %845 = vmatpush3.bf16.msra.mxu0 %v937_v6  ;;  %v946_v15 = vld [vmem:[%s1225_s1 + $0x98] sm:$0xff]   ;;  %v950_v19 = vld [vmem:[%s1225_s1 + $0xa0] sm:$0xff]   ;;  %v954_v26 = vld [vmem:[%s1225_s1 + $0xa8] sm:$0xff]  }
   0x9   :  { %867 = vmatpush3.bf16.msra.mxu1 %v938_v7  ;;  %846 = vmatprep.subr.bf16.mxu0 %v939_v8  ;;  %v955_v27 = vld [vmem:[%s1225_s1 + $0x70] sm:$0xff]   ;;  %v959_v33 = vld [vmem:[%s1225_s1 + $0x78] sm:$0xff]   ;;  %v12_v38 = vld [vmem:[%s1226_s0] sm:$0xff] }
   0xa   :  { %868 = vmatprep.subr.bf16.mxu1 %v940_v9  ;;  %v956_v28 = vld [vmem:[%s1225_s1 + $0xf0] sm:$0xff]   ;;  %v960_v34 = vld [vmem:[%s1225_s1 + $0xf8] sm:$0xff]   ;;  %v142_v39 = vcombine.high %v12_v38, %v12_v38  ;;  %v149_v40 = vrot.slane %v12_v38, %v1104_v35  ;;  %v964_v41 = vld [vmem:[%s1225_s1 + $0x140] sm:$0xff]  }
   0xb   :  { %v957_v31 = vld [vmem:[%s1225_s1 + $0x30] sm:$0xff]   ;;  %v961_v36 = vld [vmem:[%s1225_s1 + $0x38] sm:$0xff]   ;;  %v965_v42 = vld [vmem:[%s1225_s1 + $0x1c0] sm:$0xff]  }
   0xc   :  { %847 = vmatpush3.bf16.msra.mxu0 %v941_v10  ;;  %v958_v32 = vld [vmem:[%s1225_s1 + $0xb0] sm:$0xff]   ;;  %v962_v37 = vld [vmem:[%s1225_s1 + $0xb8] sm:$0xff]   ;;  %v157_v43 = vcombine.high %v149_v40, %v149_v40  ;;  %v165_v44 = vrot.slane %v149_v40, %v1104_v35  ;;  %v1124_v45 = vrot.slane %v142_v39, %v1104_v35  ;;  %v966_v47 = vld [vmem:[%s1225_s1 + $0x100] sm:$0xff]  }
   0xd   :  { %869 = vmatpush3.bf16.msra.mxu1 %v942_v11  ;;  %848 = vmatprep.subr.bf16.mxu0 %v943_v12  ;;  %v968_v50 = vld [vmem:[%s1225_s1 + $0x148] sm:$0xff]   ;;  %v967_v52 = vld [vmem:[%s1225_s1 + $0x180] sm:$0xff]   ;;  %v972_v57 = vld [vmem:[%s1225_s1 + $0x150] sm:$0xff]  }
   0xe   :  { %870 = vmatprep.subr.bf16.mxu1 %v944_v13  ;;  %v179_v46 = vrot.slane %v157_v43, %v1104_v35  ;;  %v158_v48 = vcombine.high %v1124_v45, %v1124_v45  ;;  %v187_v49 = vcombine.high %v165_v44, %v165_v44  ;;  %v969_v54 = vld [vmem:[%s1225_s1 + $0x1c8] sm:$0xff]   ;;  %v973_v59 = vld [vmem:[%s1225_s1 + $0x1d0] sm:$0xff]   ;;  %v976_v61 = vld [vmem:[%s1225_s1 + $0x158] sm:$0xff]  }
   0xf   :  { %v970_v55 = vld [vmem:[%s1225_s1 + $0x108] sm:$0xff]   ;;  %v974_v60 = vld [vmem:[%s1225_s1 + $0x110] sm:$0xff]   ;;  %v977_v63 = vld [vmem:[%s1225_s1 + $0x1d8] sm:$0xff]  }
  0x10   :  { %849 = vmatpush3.bf16.msra.mxu0 %v945_v14  ;;  %615 = vmatprep.mubr.bf16.mxu0 %v179_v46  ;;  %v189_v51 = vcombine.high %v179_v46, %v179_v46  ;;  %v186_v53 = vrot.slane %v158_v48, %v1104_v35  ;;  %v971_v58 = vld [vmem:[%s1225_s1 + $0x188] sm:$0xff]   ;;  %v975_v62 = vld [vmem:[%s1225_s1 + $0x190] sm:$0xff]   ;;  %v978_v0 = vld [vmem:[%s1225_s1 + $0x118] sm:$0xff]  }
  0x11   :  { %871 = vmatpush3.bf16.msra.mxu1 %v946_v15  ;;  %850 = vmatprep.subr.bf16.mxu0 %v947_v16  ;;  %v980_v1 = vld [vmem:[%s1225_s1 + $0x160] sm:$0xff]   ;;  %v979_v2 = vld [vmem:[%s1225_s1 + $0x198] sm:$0xff]   ;;  %v984_v5 = vld [vmem:[%s1225_s1 + $0x168] sm:$0xff]  }
  0x12   :  { %872 = vmatprep.subr.bf16.mxu1 %v948_v17  ;;  %655 = vmatprep.mubr.bf16.mxu1 %v189_v51  ;;  %v190_v56 = vcombine.high %v186_v53, %v186_v53  ;;  %v981_v3 = vld [vmem:[%s1225_s1 + $0x1e0] sm:$0xff]   ;;  %v985_v7 = vld [vmem:[%s1225_s1 + $0x1e8] sm:$0xff]   ;;  %v988_v9 = vld [vmem:[%s1225_s1 + $0x170] sm:$0xff]   ;;  %v172_v17 = vrot.slane %v1124_v45, %v1104_v35 }
  0x13   :  { %v982_v4 = vld [vmem:[%s1225_s1 + $0x120] sm:$0xff]   ;;  %v986_v8 = vld [vmem:[%s1225_s1 + $0x128] sm:$0xff]   ;;  %v989_v11 = vld [vmem:[%s1225_s1 + $0x1f0] sm:$0xff]  }
  0x14   :  { %851 = vmatpush3.bf16.msra.mxu0 %v949_v18  ;;  %v983_v6 = vld [vmem:[%s1225_s1 + $0x1a0] sm:$0xff]   ;;  %v987_v10 = vld [vmem:[%s1225_s1 + $0x1a8] sm:$0xff]   ;;  %v990_v12 = vld [vmem:[%s1225_s1 + $0x130] sm:$0xff]  }
  0x15   :  { %873 = vmatpush3.bf16.msra.mxu1 %v950_v19  ;;  %852 = vmatprep.subr.bf16.mxu0 %v951_v20  ;;  %v992_v13 = vld [vmem:[%s1225_s1 + $0x178] sm:$0xff]   ;;  %v991_v14 = vld [vmem:[%s1225_s1 + $0x1b0] sm:$0xff]   ;;  %v188_v19 = vcombine.high %v172_v17, %v172_v17 }
  0x16   :  { %874 = vmatprep.subr.bf16.mxu1 %v952_v21  ;;  %v993_v15 = vld [vmem:[%s1225_s1 + $0x1f8] sm:$0xff]  }
  0x17   :  { %v994_v16 = vld [vmem:[%s1225_s1 + $0x138] sm:$0xff]  }
  0x18   :  { %853 = vmatpush3.bf16.msra.mxu0 %v953_v25  ;;  %v995_v18 = vld [vmem:[%s1225_s1 + $0x1b8] sm:$0xff]  }
  0x19   :  { %875 = vmatpush3.bf16.msra.mxu1 %v954_v26  ;;  %854 = vmatprep.subr.bf16.mxu0 %v955_v27 }
  0x1a   :  { %876 = vmatprep.subr.bf16.mxu1 %v956_v28 }
  0x1c   :  { %855 = vmatpush3.bf16.msra.mxu0 %v957_v31 }
  0x1d   :  { %877 = vmatpush3.bf16.msra.mxu1 %v958_v32  ;;  %856 = vmatprep.subr.bf16.mxu0 %v959_v33 }
  0x1e   :  { %878 = vmatprep.subr.bf16.mxu1 %v960_v34 }
  0x20   :  { %857 = vmatpush3.bf16.msra.mxu0 %v961_v36 }
  0x21   :  { %879 = vmatpush3.bf16.msra.mxu1 %v962_v37  ;;  %886 = vmatprep.subr.bf16.mxu0 %v964_v41 }
  0x22   :  { %908 = vmatprep.subr.bf16.mxu1 %v965_v42 }
  0x23   :  { %616 = vmatmul.mubr.bf16.vlgmr.msra.gmra.mrb[0].mxu0 %v165_v44 }
  0x24   :  { %887 = vmatpush3.bf16.msra.mxu0 %v966_v47  ;;  %656 = vmatmul.mubr.bf16.vlgmr.msra.gmra.mrb[0].mxu1 %v187_v49 }
  0x25   :  { %888 = vmatprep.subr.bf16.mxu0 %v968_v50  ;;  %909 = vmatpush3.bf16.msra.mxu1 %v967_v52 }
  0x26   :  { %695 = vmatprep.mubr.bf16.mxu0 %v186_v53  ;;  %910 = vmatprep.subr.bf16.mxu1 %v969_v54 }
  0x27   :  { %735 = vmatprep.mubr.bf16.mxu1 %v190_v56 }
  0x28   :  { %889 = vmatpush3.bf16.msra.mxu0 %v970_v55 }
  0x29   :  { %890 = vmatprep.subr.bf16.mxu0 %v972_v57  ;;  %911 = vmatpush3.bf16.msra.mxu1 %v971_v58 }
  0x2a   :  { %912 = vmatprep.subr.bf16.mxu1 %v973_v59 }
  0x2c   :  { %891 = vmatpush3.bf16.msra.mxu0 %v974_v60 }
  0x2d   :  { %892 = vmatprep.subr.bf16.mxu0 %v976_v61  ;;  %913 = vmatpush3.bf16.msra.mxu1 %v975_v62 }
  0x2e   :  { %914 = vmatprep.subr.bf16.mxu1 %v977_v63 }
  0x30   :  { %893 = vmatpush3.bf16.msra.mxu0 %v978_v0 }
  0x31   :  { %894 = vmatprep.subr.bf16.mxu0 %v980_v1  ;;  %915 = vmatpush3.bf16.msra.mxu1 %v979_v2 }
  0x32   :  { %916 = vmatprep.subr.bf16.mxu1 %v981_v3 }
  0x34   :  { %895 = vmatpush3.bf16.msra.mxu0 %v982_v4 }
  0x35   :  { %896 = vmatprep.subr.bf16.mxu0 %v984_v5  ;;  %917 = vmatpush3.bf16.msra.mxu1 %v983_v6 }
  0x36   :  { %918 = vmatprep.subr.bf16.mxu1 %v985_v7 }
  0x38   :  { %897 = vmatpush3.bf16.msra.mxu0 %v986_v8 }
  0x39   :  { %898 = vmatprep.subr.bf16.mxu0 %v988_v9  ;;  %919 = vmatpush3.bf16.msra.mxu1 %v987_v10 }
  0x3a   :  { %920 = vmatprep.subr.bf16.mxu1 %v989_v11 }
  0x3c   :  { %899 = vmatpush3.bf16.msra.mxu0 %v990_v12 }
  0x3d   :  { %900 = vmatprep.subr.bf16.mxu0 %v992_v13  ;;  %921 = vmatpush3.bf16.msra.mxu1 %v991_v14 }
  0x3e   :  { %922 = vmatprep.subr.bf16.mxu1 %v993_v15 }
  0x40   :  { %901 = vmatpush3.bf16.msra.mxu0 %v994_v16 }
  0x41   :  { %923 = vmatpush3.bf16.msra.mxu1 %v995_v18 }
  0x43   :  { %696 = vmatmul.mubr.bf16.vlgmr.msra.gmra.mrb[4].mxu0 %v172_v17 }
  0x44   :  { %736 = vmatmul.mubr.bf16.vlgmr.msra.gmra.mrb[4].mxu1 %v188_v19 }
  0xf6   :  { %v858_v20 = vpop.f32.mrb[0].mxu0 }
  0xf7   :  { %v859_v21 = vpop.f32.mrb[1].mxu0  ;;  %v880_v22 = vpop.f32.mrb[0].mxu1 }
  0xf8   :  { %v860_v23 = vadd.f32 %v859_v21, %v858_v20  ;;  %v861_v24 = vpop.f32.mrb[2].mxu0  ;;  %v881_v25 = vpop.f32.mrb[1].mxu1 }
  0xf9   :  { %v862_v26 = vpop.f32.mrb[3].mxu0  ;;  %v882_v27 = vadd.f32 %v881_v25, %v880_v22  ;;  %v883_v28 = vpop.f32.mrb[2].mxu1 }
  0xfa   :  { %v884_v29 = vpop.f32.mrb[3].mxu1 }
  0xfb   :  { %v658_v30 = vadd.f32 %v882_v27, %v860_v23 }
 0x116   :  { %v902_v31 = vpop.f32.mrb[4].mxu0 }
 0x117   :  { %v903_v32 = vpop.f32.mrb[5].mxu0  ;;  %v924_v33 = vpop.f32.mrb[4].mxu1 }
 0x118   :  { %v904_v34 = vadd.f32 %v903_v32, %v902_v31  ;;  %v905_v35 = vpop.f32.mrb[6].mxu0  ;;  %v925_v36 = vpop.f32.mrb[5].mxu1 }
 0x119   :  { %v906_v37 = vpop.f32.mrb[7].mxu0  ;;  %v926_v39 = vadd.f32 %v925_v36, %v924_v33  ;;  %v927_v40 = vpop.f32.mrb[6].mxu1 }
 0x11a   :  { %v698_v38 = vadd.f32 %v904_v34, %v658_v30  ;;  %v928_v41 = vpop.f32.mrb[7].mxu1 }
 0x11c   :  { %v738_v42 = vadd.f32 %v926_v39, %v698_v38 }
 0x11e   :  { %v744_v43 = vsel %vm743_vm0, %v738_v42, 0.0  ;;  %v753_v44 = vmul.f32 %v738_v42, %v738_v42 }
 0x11f   :  { %v745_v45 = vrot.slane %v744_v43, 4 }
 0x120   :  { %v754_v46 = vsel %vm743_vm0, %v753_v44, 0.0 }
 0x121   :  { %v746_v47 = vadd.f32 %v745_v45, %v744_v43  ;;  %v755_v48 = vrot.slane %v754_v46, 4 }
 0x123   :  { %v747_v49 = vrot.slane %v746_v47, 2  ;;  %v756_v50 = vadd.f32 %v755_v48, %v754_v46 }
 0x125   :  { %v748_v51 = vadd.f32 %v747_v49, %v746_v47  ;;  %v757_v52 = vrot.slane %v756_v50, 2 }
 0x127   :  { %v749_v53 = vrot.slane %v748_v51, 1  ;;  %v758_v54 = vadd.f32 %v757_v52, %v756_v50 }
 0x129   :  { %v750_v55 = vadd.f32 %v749_v53, %v748_v51  ;;  %v759_v56 = vrot.slane %v758_v54, 1 }
 0x12b   :  { %v752_v57 = vmul.f32 0.5, %v750_v55  ;;  %v760_v58 = vadd.f32 %v759_v56, %v758_v54 }
 0x12d   :  { %v761_v59 = vmul.f32 0.5, %v760_v58  ;;  %v762_v60 = vmul.f32 %v752_v57, %v752_v57  ;;  %v767_v0 = vsub.f32 %v738_v42, %v752_v57 }
 0x12f   :  { %v763_v61 = vsub.f32 %v761_v59, %v762_v60 }
 0x131   :  { %v764_v62 = vmax.f32 %v763_v61, 0.0 }
 0x133   :  { %v765_v63 = vadd.f32 1e-05, %v764_v62 }
 0x135   :  { %996 = vrsqrt.f32 %v765_v63 }
 0x13f   :  { %v997_v1 = vpop.eup %996 }
 0x140   :  { %v768_v2 = vmul.f32 %v997_v1, %v767_v0 }
 0x142   :  { %vm769_vm1 = vcmp.ge.f32.partialorder %v768_v2, 0.0  ;;  %v770_v3 = vmul.f32 0.2, %v768_v2 }
 0x144   :  { %v771_v4 = vsel %vm769_vm1, %v768_v2, %v770_v3 }
 0x145   :  { %v772_v5 = vpack.c.bf16 %v771_v4, %v771_v4 }
 0x147   :  { %773 = vst [vmem:[%s1227_s2] sm:$0x1] %v772_v5 }

// kernel: unet_forward.12
= control target key start
LH: loop header
LB: loop body
LE: loop exit
PB: predicated region body
PF: predicated region fallthrough
CT: control target
= control target key end

     0   :  { %v1222_v23 = vmov 1966171168   ;;  %v57_v25 = vlaneseq  ;;  %vm794_vm0 = vcmask 1041408   ;;  %s1484_s1 = inlined_call_operand.vmem [shape: bf16[4,256,128], index: 1, kind: input, shape index: {}]   ;;  %s1485_s0 = inlined_call_operand.vmem [shape: bf16[4,2,256], index: 0, kind: input, shape index: {}]   ;;  %s1486_s2 = inlined_call_operand.vmem [shape: bf16[4,2,128], index: 2, kind: output, shape index: {}]  }
   0x1   :  { %v1156_v0 = vld [vmem:[%s1484_s1 + $0x40] sm:$0xff]   ;;  %v1160_v4 = vld [vmem:[%s1484_s1 + $0x48] sm:$0xff]   ;;  %v1164_v8 = vld [vmem:[%s1484_s1 + $0x50] sm:$0xff]   ;;  %v55_v24 = vunpack.c.l.s4 %v1222_v23 }
   0x2   :  { %v1157_v1 = vld [vmem:[%s1484_s1 + $0xc0] sm:$0xff]   ;;  %1067 = vmatprep.subr.bf16.mxu0 %v1156_v0  ;;  %v1161_v5 = vld [vmem:[%s1484_s1 + $0xc8] sm:$0xff]   ;;  %v1165_v9 = vld [vmem:[%s1484_s1 + $0xd0] sm:$0xff]   ;;  %v58_v31 = vshrl.u32 %v57_v25, 7 }
   0x3   :  { %v1158_v2 = vld [vmem:[%s1484_s1] sm:$0xff]   ;;  %1089 = vmatprep.subr.bf16.mxu1 %v1157_v1  ;;  %v1162_v6 = vld [vmem:[%s1484_s1 + $0x8] sm:$0xff]   ;;  %v1166_v10 = vld [vmem:[%s1484_s1 + $0x10] sm:$0xff]   ;;  %v56_v30 = vunpack.c.0.s8 %v55_v24 }
   0x4   :  { %v1159_v3 = vld [vmem:[%s1484_s1 + $0x80] sm:$0xff]   ;;  %1068 = vmatpush3.bf16.msra.mxu0 %v1158_v2  ;;  %v1163_v7 = vld [vmem:[%s1484_s1 + $0x88] sm:$0xff]   ;;  %v1167_v11 = vld [vmem:[%s1484_s1 + $0x90] sm:$0xff]  }
   0x5   :  { %1090 = vmatpush3.bf16.msra.mxu1 %v1159_v3  ;;  %1069 = vmatprep.subr.bf16.mxu0 %v1160_v4  ;;  %v1168_v12 = vld [vmem:[%s1484_s1 + $0x58] sm:$0xff]   ;;  %v1172_v16 = vld [vmem:[%s1484_s1 + $0x60] sm:$0xff]   ;;  %v1176_v20 = vld [vmem:[%s1484_s1 + $0x68] sm:$0xff]   ;;  %v1331_v36 = vsub.s32 %v56_v30, %v58_v31 }
   0x6   :  { %1091 = vmatprep.subr.bf16.mxu1 %v1161_v5  ;;  %v1169_v13 = vld [vmem:[%s1484_s1 + $0xd8] sm:$0xff]   ;;  %v1173_v17 = vld [vmem:[%s1484_s1 + $0xe0] sm:$0xff]   ;;  %v1177_v21 = vld [vmem:[%s1484_s1 + $0xe8] sm:$0xff]  }
   0x7   :  { %v1170_v14 = vld [vmem:[%s1484_s1 + $0x18] sm:$0xff]   ;;  %v1174_v18 = vld [vmem:[%s1484_s1 + $0x20] sm:$0xff]   ;;  %v1178_v22 = vld [vmem:[%s1484_s1 + $0x28] sm:$0xff]  }
   0x8   :  { %1070 = vmatpush3.bf16.msra.mxu0 %v1162_v6  ;;  %v1171_v15 = vld [vmem:[%s1484_s1 + $0x98] sm:$0xff]   ;;  %v1175_v19 = vld [vmem:[%s1484_s1 + $0xa0] sm:$0xff]   ;;  %v1179_v26 = vld [vmem:[%s1484_s1 + $0xa8] sm:$0xff]  }
   0x9   :  { %1092 = vmatpush3.bf16.msra.mxu1 %v1163_v7  ;;  %1071 = vmatprep.subr.bf16.mxu0 %v1164_v8  ;;  %v1180_v27 = vld [vmem:[%s1484_s1 + $0x70] sm:$0xff]   ;;  %v1184_v33 = vld [vmem:[%s1484_s1 + $0x78] sm:$0xff]   ;;  %v897_v38 = vld.sshfl [vmem:[%s1485_s0] sm:$0x11 pattern:$0x75316420] }
   0xa   :  { %1093 = vmatprep.subr.bf16.mxu1 %v1165_v9  ;;  %v1181_v28 = vld [vmem:[%s1484_s1 + $0xf0] sm:$0xff]   ;;  %v1185_v34 = vld [vmem:[%s1484_s1 + $0xf8] sm:$0xff]   ;;  %v53_v39 = vcombine.high %v897_v38, %v897_v38  ;;  %v947_v40 = vld.sshfl [vmem:[%s1485_s0 + $0x2] sm:$0x11 pattern:$0x75316420]  ;;  %v60_v42 = vrot.slane %v897_v38, %v1331_v36 }
   0xb   :  { %v1182_v29 = vld [vmem:[%s1484_s1 + $0x30] sm:$0xff]   ;;  %v1186_v35 = vld [vmem:[%s1484_s1 + $0x38] sm:$0xff]   ;;  %v249_v41 = vcombine.high %v947_v40, %v947_v40  ;;  %v1188_v43 = vld [vmem:[%s1484_s1 + $0x140] sm:$0xff]   ;;  %v256_v45 = vrot.slane %v947_v40, %v1331_v36 }
   0xc   :  { %1072 = vmatpush3.bf16.msra.mxu0 %v1166_v10  ;;  %v1183_v32 = vld [vmem:[%s1484_s1 + $0xb0] sm:$0xff]   ;;  %v1187_v37 = vld [vmem:[%s1484_s1 + $0xb8] sm:$0xff]   ;;  %v67_v44 = vrot.slane %v53_v39, %v1331_v36  ;;  %v1189_v46 = vld [vmem:[%s1484_s1 + $0x1c0] sm:$0xff]  }
   0xd   :  { %1094 = vmatpush3.bf16.msra.mxu1 %v1167_v11  ;;  %1073 = vmatprep.subr.bf16.mxu0 %v1168_v12  ;;  %v263_v47 = vrot.slane %v249_v41, %v1331_v36  ;;  %v1190_v48 = vld [vmem:[%s1484_s1 + $0x100] sm:$0xff]   ;;  %v1192_v50 = vld [vmem:[%s1484_s1 + $0x148] sm:$0xff]   ;;  %v1196_v54 = vld [vmem:[%s1484_s1 + $0x150] sm:$0xff]  }
   0xe   :  { %1095 = vmatprep.subr.bf16.mxu1 %v1169_v13  ;;  %198 = vmatprep.mubr.bf16.mxu0 %v67_v44  ;;  %v1191_v49 = vld [vmem:[%s1484_s1 + $0x180] sm:$0xff]   ;;  %v1193_v51 = vld [vmem:[%s1484_s1 + $0x1c8] sm:$0xff]   ;;  %v1197_v55 = vld [vmem:[%s1484_s1 + $0x1d0] sm:$0xff]  }
   0xf   :  { %394 = vmatprep.mubr.bf16.mxu1 %v263_v47  ;;  %v1194_v52 = vld [vmem:[%s1484_s1 + $0x108] sm:$0xff]   ;;  %v1198_v56 = vld [vmem:[%s1484_s1 + $0x110] sm:$0xff]   ;;  %v1200_v58 = vld [vmem:[%s1484_s1 + $0x158] sm:$0xff]  }
  0x10   :  { %1074 = vmatpush3.bf16.msra.mxu0 %v1170_v14  ;;  %v1195_v53 = vld [vmem:[%s1484_s1 + $0x188] sm:$0xff]   ;;  %v1199_v57 = vld [vmem:[%s1484_s1 + $0x190] sm:$0xff]   ;;  %v1201_v59 = vld [vmem:[%s1484_s1 + $0x1d8] sm:$0xff]  }
  0x11   :  { %1096 = vmatpush3.bf16.msra.mxu1 %v1171_v15  ;;  %1075 = vmatprep.subr.bf16.mxu0 %v1172_v16  ;;  %v1202_v60 = vld [vmem:[%s1484_s1 + $0x118] sm:$0xff]   ;;  %v1204_v62 = vld [vmem:[%s1484_s1 + $0x160] sm:$0xff]   ;;  %v1208_v2 = vld [vmem:[%s1484_s1 + $0x168] sm:$0xff]  }
  0x12   :  { %1097 = vmatprep.subr.bf16.mxu1 %v1173_v17  ;;  %v1203_v61 = vld [vmem:[%s1484_s1 + $0x198] sm:$0xff]   ;;  %v1205_v63 = vld [vmem:[%s1484_s1 + $0x1e0] sm:$0xff]   ;;  %v1209_v3 = vld [vmem:[%s1484_s1 + $0x1e8] sm:$0xff]  }
  0x13   :  { %v1206_v0 = vld [vmem:[%s1484_s1 + $0x120] sm:$0xff]   ;;  %v1210_v4 = vld [vmem:[%s1484_s1 + $0x128] sm:$0xff]   ;;  %v1212_v6 = vld [vmem:[%s1484_s1 + $0x170] sm:$0xff]  }
  0x14   :  { %1076 = vmatpush3.bf16.msra.mxu0 %v1174_v18  ;;  %v1207_v1 = vld [vmem:[%s1484_s1 + $0x1a0] sm:$0xff]   ;;  %v1211_v5 = vld [vmem:[%s1484_s1 + $0x1a8] sm:$0xff]   ;;  %v1213_v7 = vld [vmem:[%s1484_s1 + $0x1f0] sm:$0xff]  }
  0x15   :  { %1098 = vmatpush3.bf16.msra.mxu1 %v1175_v19  ;;  %1077 = vmatprep.subr.bf16.mxu0 %v1176_v20  ;;  %v1214_v8 = vld [vmem:[%s1484_s1 + $0x130] sm:$0xff]   ;;  %v1216_v10 = vld [vmem:[%s1484_s1 + $0x178] sm:$0xff]   ;;  %v997_v14 = vld.sshfl [vmem:[%s1485_s0 + $0x4] sm:$0x11 pattern:$0x75316420] }
  0x16   :  { %1099 = vmatprep.subr.bf16.mxu1 %v1177_v21  ;;  %v1215_v9 = vld [vmem:[%s1484_s1 + $0x1b0] sm:$0xff]   ;;  %v1217_v11 = vld [vmem:[%s1484_s1 + $0x1f8] sm:$0xff]   ;;  %v445_v15 = vcombine.high %v997_v14, %v997_v14  ;;  %v1047_v16 = vld.sshfl [vmem:[%s1485_s0 + $0x6] sm:$0x11 pattern:$0x75316420]  ;;  %v452_v18 = vrot.slane %v997_v14, %v1331_v36 }
  0x17   :  { %v1218_v12 = vld [vmem:[%s1484_s1 + $0x138] sm:$0xff]   ;;  %v641_v17 = vcombine.high %v1047_v16, %v1047_v16  ;;  %v648_v20 = vrot.slane %v1047_v16, %v1331_v36 }
  0x18   :  { %1078 = vmatpush3.bf16.msra.mxu0 %v1178_v22  ;;  %v1219_v13 = vld [vmem:[%s1484_s1 + $0x1b8] sm:$0xff]   ;;  %v459_v19 = vrot.slane %v445_v15, %v1331_v36 }
  0x19   :  { %1100 = vmatpush3.bf16.msra.mxu1 %v1179_v26  ;;  %1079 = vmatprep.subr.bf16.mxu0 %v1180_v27  ;;  %v655_v21 = vrot.slane %v641_v17, %v1331_v36 }
  0x1a   :  { %1101 = vmatprep.subr.bf16.mxu1 %v1181_v28 }
  0x1c   :  { %1080 = vmatpush3.bf16.msra.mxu0 %v1182_v29 }
  0x1d   :  { %1102 = vmatpush3.bf16.msra.mxu1 %v1183_v32  ;;  %1081 = vmatprep.subr.bf16.mxu0 %v1184_v33 }
  0x1e   :  { %1103 = vmatprep.subr.bf16.mxu1 %v1185_v34 }
  0x20   :  { %1082 = vmatpush3.bf16.msra.mxu0 %v1186_v35 }
  0x21   :  { %1104 = vmatpush3.bf16.msra.mxu1 %v1187_v37  ;;  %1111 = vmatprep.subr.bf16.mxu0 %v1188_v43 }
  0x22   :  { %1133 = vmatprep.subr.bf16.mxu1 %v1189_v46 }
  0x23   :  { %199 = vmatmul.mubr.bf16.vlgmr.msra.gmra.mrb[0].mxu0 %v60_v42 }
  0x24   :  { %395 = vmatmul.mubr.bf16.vlgmr.msra.gmra.mrb[0].mxu1 %v256_v45  ;;  %1112 = vmatpush3.bf16.msra.mxu0 %v1190_v48 }
  0x25   :  { %1134 = vmatpush3.bf16.msra.mxu1 %v1191_v49  ;;  %1113 = vmatprep.subr.bf16.mxu0 %v1192_v50 }
  0x26   :  { %1135 = vmatprep.subr.bf16.mxu1 %v1193_v51  ;;  %590 = vmatprep.mubr.bf16.mxu0 %v459_v19 }
  0x27   :  { %786 = vmatprep.mubr.bf16.mxu1 %v655_v21 }
  0x28   :  { %1114 = vmatpush3.bf16.msra.mxu0 %v1194_v52 }
  0x29   :  { %1136 = vmatpush3.bf16.msra.mxu1 %v1195_v53  ;;  %1115 = vmatprep.subr.bf16.mxu0 %v1196_v54 }
  0x2a   :  { %1137 = vmatprep.subr.bf16.mxu1 %v1197_v55 }
  0x2c   :  { %1116 = vmatpush3.bf16.msra.mxu0 %v1198_v56 }
  0x2d   :  { %1138 = vmatpush3.bf16.msra.mxu1 %v1199_v57  ;;  %1117 = vmatprep.subr.bf16.mxu0 %v1200_v58 }
  0x2e   :  { %1139 = vmatprep.subr.bf16.mxu1 %v1201_v59 }
  0x30   :  { %1118 = vmatpush3.bf16.msra.mxu0 %v1202_v60 }
  0x31   :  { %1140 = vmatpush3.bf16.msra.mxu1 %v1203_v61  ;;  %1119 = vmatprep.subr.bf16.mxu0 %v1204_v62 }
  0x32   :  { %1141 = vmatprep.subr.bf16.mxu1 %v1205_v63 }
  0x34   :  { %1120 = vmatpush3.bf16.msra.mxu0 %v1206_v0 }
  0x35   :  { %1142 = vmatpush3.bf16.msra.mxu1 %v1207_v1  ;;  %1121 = vmatprep.subr.bf16.mxu0 %v1208_v2 }
  0x36   :  { %1143 = vmatprep.subr.bf16.mxu1 %v1209_v3 }
  0x38   :  { %1122 = vmatpush3.bf16.msra.mxu0 %v1210_v4 }
  0x39   :  { %1144 = vmatpush3.bf16.msra.mxu1 %v1211_v5  ;;  %1123 = vmatprep.subr.bf16.mxu0 %v1212_v6 }
  0x3a   :  { %1145 = vmatprep.subr.bf16.mxu1 %v1213_v7 }
  0x3c   :  { %1124 = vmatpush3.bf16.msra.mxu0 %v1214_v8 }
  0x3d   :  { %1146 = vmatpush3.bf16.msra.mxu1 %v1215_v9  ;;  %1125 = vmatprep.subr.bf16.mxu0 %v1216_v10 }
  0x3e   :  { %1147 = vmatprep.subr.bf16.mxu1 %v1217_v11 }
  0x40   :  { %1126 = vmatpush3.bf16.msra.mxu0 %v1218_v12 }
  0x41   :  { %1148 = vmatpush3.bf16.msra.mxu1 %v1219_v13 }
  0x43   :  { %591 = vmatmul.mubr.bf16.vlgmr.msra.gmra.mrb[4].mxu0 %v452_v18 }
  0x44   :  { %787 = vmatmul.mubr.bf16.vlgmr.msra.gmra.mrb[4].mxu1 %v648_v20 }
  0xf6   :  { %v1083_v22 = vpop.f32.mrb[0].mxu0 }
  0xf7   :  { %v1105_v23 = vpop.f32.mrb[0].mxu1  ;;  %v1084_v24 = vpop.f32.mrb[1].mxu0 }
  0xf8   :  { %v1452_v25 = vadd.f32 %v1084_v24, %v1083_v22  ;;  %v1106_v26 = vpop.f32.mrb[1].mxu1  ;;  %v1086_v27 = vpop.f32.mrb[2].mxu0 }
  0xf9   :  { %v1454_v28 = vadd.f32 %v1106_v26, %v1105_v23  ;;  %v1108_v29 = vpop.f32.mrb[2].mxu1  ;;  %v1087_v30 = vpop.f32.mrb[3].mxu0 }
  0xfa   :  { %v795_v31 = vsel %vm794_vm0, %v1452_v25, 0.0  ;;  %v827_v32 = vmul.f32 %v1452_v25, %v1452_v25  ;;  %v1109_v33 = vpop.f32.mrb[3].mxu1 }
  0xfb   :  { %v796_v34 = vrot.slane %v795_v31, 4  ;;  %v803_v35 = vsel %vm794_vm0, %v1454_v28, 0.0  ;;  %v836_v36 = vmul.f32 %v1454_v28, %v1454_v28 }
  0xfc   :  { %v828_v37 = vsel %vm794_vm0, %v827_v32, 0.0  ;;  %v804_v38 = vrot.slane %v803_v35, 4 }
  0xfd   :  { %v797_v39 = vadd.f32 %v796_v34, %v795_v31  ;;  %v829_v40 = vrot.slane %v828_v37, 4  ;;  %v837_v41 = vsel %vm794_vm0, %v836_v36, 0.0 }
  0xfe   :  { %v805_v42 = vadd.f32 %v804_v38, %v803_v35  ;;  %v838_v43 = vrot.slane %v837_v41, 4 }
  0xff   :  { %v798_v44 = vrot.slane %v797_v39, 2  ;;  %v830_v45 = vadd.f32 %v829_v40, %v828_v37 }
 0x100   :  { %v806_v46 = vrot.slane %v805_v42, 2  ;;  %v839_v47 = vadd.f32 %v838_v43, %v837_v41 }
 0x101   :  { %v799_v48 = vadd.f32 %v798_v44, %v797_v39  ;;  %v831_v49 = vrot.slane %v830_v45, 2 }
 0x102   :  { %v807_v50 = vadd.f32 %v806_v46, %v805_v42  ;;  %v840_v51 = vrot.slane %v839_v47, 2 }
 0x103   :  { %v800_v52 = vrot.slane %v799_v48, 1  ;;  %v832_v53 = vadd.f32 %v831_v49, %v830_v45 }
 0x104   :  { %v808_v54 = vrot.slane %v807_v50, 1  ;;  %v841_v55 = vadd.f32 %v840_v51, %v839_v47 }
 0x105   :  { %v801_v56 = vadd.f32 %v800_v52, %v799_v48  ;;  %v833_v57 = vrot.slane %v832_v53, 1 }
 0x106   :  { %v809_v58 = vadd.f32 %v808_v54, %v807_v50  ;;  %v842_v59 = vrot.slane %v841_v55, 1 }
 0x107   :  { %v834_v60 = vadd.f32 %v833_v57, %v832_v53 }
 0x108   :  { %v810_v61 = vadd.f32 %v809_v58, %v801_v56  ;;  %v843_v62 = vadd.f32 %v842_v59, %v841_v55 }
 0x10a   :  { %v844_v63 = vadd.f32 %v843_v62, %v834_v60 }
 0x116   :  { %v1127_v0 = vpop.f32.mrb[4].mxu0 }
 0x117   :  { %v1149_v1 = vpop.f32.mrb[4].mxu1  ;;  %v1128_v2 = vpop.f32.mrb[5].mxu0 }
 0x118   :  { %v1129_v3 = vadd.f32 %v1128_v2, %v1127_v0  ;;  %v1150_v4 = vpop.f32.mrb[5].mxu1  ;;  %v1130_v5 = vpop.f32.mrb[6].mxu0 }
 0x119   :  { %v1151_v6 = vadd.f32 %v1150_v4, %v1149_v1  ;;  %v1152_v7 = vpop.f32.mrb[6].mxu1  ;;  %v1131_v8 = vpop.f32.mrb[7].mxu0 }
 0x11a   :  { %v811_v9 = vsel %vm794_vm0, %v1129_v3, 0.0  ;;  %v845_v10 = vmul.f32 %v1129_v3, %v1129_v3  ;;  %v1153_v11 = vpop.f32.mrb[7].mxu1 }
 0x11b   :  { %v812_v12 = vrot.slane %v811_v9, 4  ;;  %v819_v13 = vsel %vm794_vm0, %v1151_v6, 0.0  ;;  %v854_v14 = vmul.f32 %v1151_v6, %v1151_v6 }
 0x11c   :  { %v846_v15 = vsel %vm794_vm0, %v845_v10, 0.0  ;;  %v820_v16 = vrot.slane %v819_v13, 4 }
 0x11d   :  { %v813_v17 = vadd.f32 %v812_v12, %v811_v9  ;;  %v847_v18 = vrot.slane %v846_v15, 4  ;;  %v855_v19 = vsel %vm794_vm0, %v854_v14, 0.0 }
 0x11e   :  { %v821_v20 = vadd.f32 %v820_v16, %v819_v13  ;;  %v856_v21 = vrot.slane %v855_v19, 4 }
 0x11f   :  { %v814_v22 = vrot.slane %v813_v17, 2  ;;  %v848_v23 = vadd.f32 %v847_v18, %v846_v15 }
 0x120   :  { %v822_v24 = vrot.slane %v821_v20, 2  ;;  %v857_v26 = vadd.f32 %v856_v21, %v855_v19 }
 0x121   :  { %v815_v27 = vadd.f32 %v814_v22, %v813_v17  ;;  %v849_v29 = vrot.slane %v848_v23, 2 }
 0x122   :  { %v823_v30 = vadd.f32 %v822_v24, %v821_v20  ;;  %v858_v31 = vrot.slane %v857_v26, 2 }
 0x123   :  { %v816_v32 = vrot.slane %v815_v27, 1  ;;  %v850_v33 = vadd.f32 %v849_v29, %v848_v23 }
 0x124   :  { %v824_v34 = vrot.slane %v823_v30, 1  ;;  %v859_v35 = vadd.f32 %v858_v31, %v857_v26 }
 0x125   :  { %v817_v36 = vadd.f32 %v816_v32, %v815_v27  ;;  %v851_v37 = vrot.slane %v850_v33, 1 }
 0x126   :  { %v860_v38 = vrot.slane %v859_v35, 1  ;;  %v825_v41 = vadd.f32 %v824_v34, %v823_v30 }
 0x127   :  { %v818_v39 = vadd.f32 %v817_v36, %v810_v61  ;;  %v852_v40 = vadd.f32 %v851_v37, %v850_v33 }
 0x128   :  { %v861_v44 = vadd.f32 %v860_v38, %v859_v35 }
 0x129   :  { %v853_v42 = vadd.f32 %v852_v40, %v844_v63  ;;  %v826_v43 = vadd.f32 %v825_v41, %v818_v39 }
 0x12b   :  { %v862_v45 = vadd.f32 %v861_v44, %v853_v42  ;;  %v863_v46 = vmul.f32 0.125, %v826_v43 }
 0x12d   :  { %v864_v47 = vmul.f32 0.125, %v862_v45  ;;  %v865_v48 = vmul.f32 %v863_v46, %v863_v46  ;;  %v870_v49 = vsub.f32 %v1452_v25, %v863_v46  ;;  %v875_v50 = vsub.f32 %v1454_v28, %v863_v46 }
 0x12e   :  { %v881_v51 = vsub.f32 %v1129_v3, %v863_v46  ;;  %v887_v52 = vsub.f32 %v1151_v6, %v863_v46 }
 0x12f   :  { %v866_v53 = vsub.f32 %v864_v47, %v865_v48 }
 0x131   :  { %v867_v54 = vmax.f32 %v866_v53, 0.0 }
 0x133   :  { %v868_v55 = vadd.f32 1e-05, %v867_v54 }
 0x135   :  { %1220 = vrsqrt.f32 %v868_v55 }
 0x13f   :  { %v1221_v56 = vpop.eup %1220 }
 0x140   :  { %v871_v57 = vmul.f32 %v1221_v56, %v870_v49  ;;  %v876_v58 = vmul.f32 %v1221_v56, %v875_v50  ;;  %v882_v59 = vmul.f32 %v1221_v56, %v881_v51  ;;  %v888_v60 = vmul.f32 %v1221_v56, %v887_v52 }
 0x142   :  { %v872_v61 = vmax.f32 %v871_v57, 0.0  ;;  %v877_v62 = vmax.f32 %v876_v58, 0.0  ;;  %v883_v63 = vmax.f32 %v882_v59, 0.0  ;;  %v889_v0 = vmax.f32 %v888_v60, 0.0 }
 0x144   :  { %v873_v1 = vpack.c.bf16 %v872_v61, %v872_v61  ;;  %v878_v2 = vpack.c.bf16 %v877_v62, %v877_v62  ;;  %v884_v25 = vpack.c.bf16 %v883_v63, %v883_v63  ;;  %v890_v4 = vpack.c.bf16 %v889_v0, %v889_v0 }
 0x146   :  { %874 = vst [vmem:[%s1486_s2] sm:$0x1] %v873_v1  ;;  %1064 = vst [vmem:[%s1486_s2 + $0x1] sm:$0x1] %v878_v2 }
 0x147   :  { %1065 = vst [vmem:[%s1486_s2 + $0x2] sm:$0x1] %v884_v25  ;;  %1066 = vst [vmem:[%s1486_s2 + $0x3] sm:$0x1] %v890_v4 }

// kernel: unet_forward.13
= control target key start
LH: loop header
LB: loop body
LE: loop exit
PB: predicated region body
PF: predicated region fallthrough
CT: control target
= control target key end

     0   :  { %s2636_s1 = inlined_call_operand.vmem [shape: bf16[4,512,128], index: 1, kind: input, shape index: {}]   ;;  %s2637_s0 = inlined_call_operand.vmem [shape: bf16[4,8,512], index: 0, kind: input, shape index: {}]   ;;  %s2638_s2 = inlined_call_operand.vmem [shape: bf16[4,8,128], index: 2, kind: output, shape index: {}]  }
   0x1   :  { %v2041_v0 = vld [vmem:[%s2636_s1 + $0x40] sm:$0xff]   ;;  %v2045_v4 = vld [vmem:[%s2636_s1 + $0x48] sm:$0xff]   ;;  %v2049_v8 = vld [vmem:[%s2636_s1 + $0x50] sm:$0xff]  }
   0x2   :  { %v2042_v1 = vld [vmem:[%s2636_s1 + $0xc0] sm:$0xff]   ;;  %1865 = vmatprep.subr.bf16.mxu0 %v2041_v0  ;;  %v2046_v5 = vld [vmem:[%s2636_s1 + $0xc8] sm:$0xff]   ;;  %v2050_v9 = vld [vmem:[%s2636_s1 + $0xd0] sm:$0xff]  }
   0x3   :  { %v2043_v2 = vld [vmem:[%s2636_s1] sm:$0xff]   ;;  %1887 = vmatprep.subr.bf16.mxu1 %v2042_v1  ;;  %v2047_v6 = vld [vmem:[%s2636_s1 + $0x8] sm:$0xff]   ;;  %v2051_v10 = vld [vmem:[%s2636_s1 + $0x10] sm:$0xff]  }
   0x4   :  { %v2044_v3 = vld [vmem:[%s2636_s1 + $0x80] sm:$0xff]   ;;  %1866 = vmatpush3.bf16.msra.mxu0 %v2043_v2  ;;  %v2048_v7 = vld [vmem:[%s2636_s1 + $0x88] sm:$0xff]   ;;  %v2052_v11 = vld [vmem:[%s2636_s1 + $0x90] sm:$0xff]  }
   0x5   :  { %1888 = vmatpush3.bf16.msra.mxu1 %v2044_v3  ;;  %1867 = vmatprep.subr.bf16.mxu0 %v2045_v4  ;;  %v2053_v12 = vld [vmem:[%s2636_s1 + $0x58] sm:$0xff]   ;;  %v2057_v16 = vld [vmem:[%s2636_s1 + $0x60] sm:$0xff]   ;;  %v2061_v20 = vld [vmem:[%s2636_s1 + $0x68] sm:$0xff]  }
   0x6   :  { %1889 = vmatprep.subr.bf16.mxu1 %v2046_v5  ;;  %v2054_v13 = vld [vmem:[%s2636_s1 + $0xd8] sm:$0xff]   ;;  %v2058_v17 = vld [vmem:[%s2636_s1 + $0xe0] sm:$0xff]   ;;  %v2062_v21 = vld [vmem:[%s2636_s1 + $0xe8] sm:$0xff]  }
   0x7   :  { %v2055_v14 = vld [vmem:[%s2636_s1 + $0x18] sm:$0xff]   ;;  %v2059_v18 = vld [vmem:[%s2636_s1 + $0x20] sm:$0xff]   ;;  %v2063_v22 = vld [vmem:[%s2636_s1 + $0x28] sm:$0xff]  }
   0x8   :  { %1868 = vmatpush3.bf16.msra.mxu0 %v2047_v6  ;;  %v2056_v15 = vld [vmem:[%s2636_s1 + $0x98] sm:$0xff]   ;;  %v2060_v19 = vld [vmem:[%s2636_s1 + $0xa0] sm:$0xff]   ;;  %v2064_v23 = vld [vmem:[%s2636_s1 + $0xa8] sm:$0xff]  }
   0x9   :  { %1890 = vmatpush3.bf16.msra.mxu1 %v2048_v7  ;;  %1869 = vmatprep.subr.bf16.mxu0 %v2049_v8  ;;  %v2065_v24 = vld [vmem:[%s2636_s1 + $0x70] sm:$0xff]   ;;  %v2069_v28 = vld [vmem:[%s2636_s1 + $0x78] sm:$0xff]   ;;  %v12_v32 = vld [vmem:[%s2637_s0] sm:$0xff] }
   0xa   :  { %1891 = vmatprep.subr.bf16.mxu1 %v2050_v9  ;;  %v2066_v25 = vld [vmem:[%s2636_s1 + $0xf0] sm:$0xff]   ;;  %v2070_v29 = vld [vmem:[%s2636_s1 + $0xf8] sm:$0xff]   ;;  %v13_v33 = vld [vmem:[%s2637_s0 + $0x8] sm:$0xff]  ;;  %v1520_v34 = vcombine.low %v12_v32, %v12_v32  ;;  %v1521_v35 = vcombine.high %v12_v32, %v12_v32 }
   0xb   :  { %v2067_v26 = vld [vmem:[%s2636_s1 + $0x30] sm:$0xff]   ;;  %v2071_v30 = vld [vmem:[%s2636_s1 + $0x38] sm:$0xff]   ;;  %v1522_v36 = vcombine.low %v13_v33, %v13_v33  ;;  %v1523_v37 = vcombine.high %v13_v33, %v13_v33  ;;  %v2077_v38 = vld [vmem:[%s2636_s1 + $0x140] sm:$0xff]  }
   0xc   :  { %1870 = vmatpush3.bf16.msra.mxu0 %v2051_v10  ;;  %v2068_v27 = vld [vmem:[%s2636_s1 + $0xb0] sm:$0xff]   ;;  %v2072_v31 = vld [vmem:[%s2636_s1 + $0xb8] sm:$0xff]   ;;  %v2078_v39 = vld [vmem:[%s2636_s1 + $0x1c0] sm:$0xff]   ;;  %316 = vmatprep.mubr.bf16.mxu0 %v1521_v35 }
   0xd   :  { %1892 = vmatpush3.bf16.msra.mxu1 %v2052_v11  ;;  %1871 = vmatprep.subr.bf16.mxu0 %v2053_v12  ;;  %v2079_v40 = vld [vmem:[%s2636_s1 + $0x100] sm:$0xff]   ;;  %v2081_v42 = vld [vmem:[%s2636_s1 + $0x148] sm:$0xff]   ;;  %v2085_v46 = vld [vmem:[%s2636_s1 + $0x150] sm:$0xff]  }
   0xe   :  { %1893 = vmatprep.subr.bf16.mxu1 %v2054_v13  ;;  %356 = vmatprep.mubr.bf16.mxu1 %v1523_v37  ;;  %v2080_v41 = vld [vmem:[%s2636_s1 + $0x180] sm:$0xff]   ;;  %v2082_v43 = vld [vmem:[%s2636_s1 + $0x1c8] sm:$0xff]   ;;  %v2086_v47 = vld [vmem:[%s2636_s1 + $0x1d0] sm:$0xff]  }
   0xf   :  { %v2083_v44 = vld [vmem:[%s2636_s1 + $0x108] sm:$0xff]   ;;  %v2087_v48 = vld [vmem:[%s2636_s1 + $0x110] sm:$0xff]   ;;  %v2089_v50 = vld [vmem:[%s2636_s1 + $0x158] sm:$0xff]  }
  0x10   :  { %1872 = vmatpush3.bf16.msra.mxu0 %v2055_v14  ;;  %v2084_v45 = vld [vmem:[%s2636_s1 + $0x188] sm:$0xff]   ;;  %v2088_v49 = vld [vmem:[%s2636_s1 + $0x190] sm:$0xff]   ;;  %v2090_v51 = vld [vmem:[%s2636_s1 + $0x1d8] sm:$0xff]  }
  0x11   :  { %1894 = vmatpush3.bf16.msra.mxu1 %v2056_v15  ;;  %1873 = vmatprep.subr.bf16.mxu0 %v2057_v16  ;;  %v2091_v52 = vld [vmem:[%s2636_s1 + $0x118] sm:$0xff]   ;;  %v2093_v54 = vld [vmem:[%s2636_s1 + $0x160] sm:$0xff]   ;;  %v2097_v58 = vld [vmem:[%s2636_s1 + $0x168] sm:$0xff]  }
  0x12   :  { %1895 = vmatprep.subr.bf16.mxu1 %v2058_v17  ;;  %v2092_v53 = vld [vmem:[%s2636_s1 + $0x198] sm:$0xff]   ;;  %v2094_v55 = vld [vmem:[%s2636_s1 + $0x1e0] sm:$0xff]   ;;  %v2098_v59 = vld [vmem:[%s2636_s1 + $0x1e8] sm:$0xff]  }
  0x13   :  { %v2095_v56 = vld [vmem:[%s2636_s1 + $0x120] sm:$0xff]   ;;  %v2099_v60 = vld [vmem:[%s2636_s1 + $0x128] sm:$0xff]   ;;  %v2101_v62 = vld [vmem:[%s2636_s1 + $0x170] sm:$0xff]  }
  0x14   :  { %1874 = vmatpush3.bf16.msra.mxu0 %v2059_v18  ;;  %v2096_v57 = vld [vmem:[%s2636_s1 + $0x1a0] sm:$0xff]   ;;  %v2100_v61 = vld [vmem:[%s2636_s1 + $0x1a8] sm:$0xff]   ;;  %v2102_v63 = vld [vmem:[%s2636_s1 + $0x1f0] sm:$0xff]  }
  0x15   :  { %1896 = vmatpush3.bf16.msra.mxu1 %v2060_v19  ;;  %1875 = vmatprep.subr.bf16.mxu0 %v2061_v20  ;;  %v2103_v0 = vld [vmem:[%s2636_s1 + $0x130] sm:$0xff]   ;;  %v2105_v2 = vld [vmem:[%s2636_s1 + $0x178] sm:$0xff]   ;;  %v2113_v12 = vld [vmem:[%s2636_s1 + $0x240] sm:$0xff]  }
  0x16   :  { %1897 = vmatprep.subr.bf16.mxu1 %v2062_v21  ;;  %v2104_v1 = vld [vmem:[%s2636_s1 + $0x1b0] sm:$0xff]   ;;  %v2106_v3 = vld [vmem:[%s2636_s1 + $0x1f8] sm:$0xff]   ;;  %v2114_v13 = vld [vmem:[%s2636_s1 + $0x2c0] sm:$0xff]  }
  0x17   :  { %v2107_v4 = vld [vmem:[%s2636_s1 + $0x138] sm:$0xff]   ;;  %v1556_v6 = vld [vmem:[%s2637_s0 + $0x10] sm:$0xff]  ;;  %v2115_v14 = vld [vmem:[%s2636_s1 + $0x200] sm:$0xff]  }
  0x18   :  { %1876 = vmatpush3.bf16.msra.mxu0 %v2063_v22  ;;  %v2108_v5 = vld [vmem:[%s2636_s1 + $0x1b8] sm:$0xff]   ;;  %v1622_v7 = vcombine.low %v1556_v6, %v1556_v6  ;;  %v1623_v8 = vcombine.high %v1556_v6, %v1556_v6  ;;  %v2116_v15 = vld [vmem:[%s2636_s1 + $0x280] sm:$0xff]   ;;  %v2117_v16 = vld [vmem:[%s2636_s1 + $0x248] sm:$0xff]  }
  0x19   :  { %1898 = vmatpush3.bf16.msra.mxu1 %v2064_v23  ;;  %1877 = vmatprep.subr.bf16.mxu0 %v2065_v24  ;;  %v1557_v9 = vld [vmem:[%s2637_s0 + $0x18] sm:$0xff]  ;;  %v2118_v17 = vld [vmem:[%s2636_s1 + $0x2c8] sm:$0xff]   ;;  %v2121_v20 = vld [vmem:[%s2636_s1 + $0x250] sm:$0xff]  }
  0x1a   :  { %1899 = vmatprep.subr.bf16.mxu1 %v2066_v25  ;;  %v1624_v10 = vcombine.low %v1557_v9, %v1557_v9  ;;  %v1625_v11 = vcombine.high %v1557_v9, %v1557_v9  ;;  %v2119_v18 = vld [vmem:[%s2636_s1 + $0x208] sm:$0xff]   ;;  %v2122_v21 = vld [vmem:[%s2636_s1 + $0x2d0] sm:$0xff]   ;;  %v2125_v24 = vld [vmem:[%s2636_s1 + $0x258] sm:$0xff]  }
  0x1b   :  { %v2120_v19 = vld [vmem:[%s2636_s1 + $0x288] sm:$0xff]   ;;  %v2123_v22 = vld [vmem:[%s2636_s1 + $0x210] sm:$0xff]   ;;  %v2126_v25 = vld [vmem:[%s2636_s1 + $0x2d8] sm:$0xff]  }
  0x1c   :  { %1878 = vmatpush3.bf16.msra.mxu0 %v2067_v26  ;;  %v2124_v23 = vld [vmem:[%s2636_s1 + $0x290] sm:$0xff]   ;;  %v2127_v26 = vld [vmem:[%s2636_s1 + $0x218] sm:$0xff]   ;;  %v2133_v32 = vld [vmem:[%s2636_s1 + $0x268] sm:$0xff]  }
  0x1d   :  { %1900 = vmatpush3.bf16.msra.mxu1 %v2068_v27  ;;  %1879 = vmatprep.subr.bf16.mxu0 %v2069_v28  ;;  %v2128_v27 = vld [vmem:[%s2636_s1 + $0x298] sm:$0xff]   ;;  %v2129_v28 = vld [vmem:[%s2636_s1 + $0x260] sm:$0xff]   ;;  %v2134_v33 = vld [vmem:[%s2636_s1 + $0x2e8] sm:$0xff]  }
  0x1e   :  { %1901 = vmatprep.subr.bf16.mxu1 %v2070_v29  ;;  %v2130_v29 = vld [vmem:[%s2636_s1 + $0x2e0] sm:$0xff]   ;;  %v2136_v35 = vld [vmem:[%s2636_s1 + $0x2a8] sm:$0xff]   ;;  %v2138_v37 = vld [vmem:[%s2636_s1 + $0x2f0] sm:$0xff]  }
  0x1f   :  { %v2169_v6 = vld [vmem:[%s2636_s1 + $0x368] sm:$0xff]  }
  0x20   :  { %1880 = vmatpush3.bf16.msra.mxu0 %v2071_v30  ;;  %v2131_v30 = vld [vmem:[%s2636_s1 + $0x220] sm:$0xff]   ;;  %v2172_v9 = vld [vmem:[%s2636_s1 + $0x3a8] sm:$0xff]  }
  0x21   :  { %1902 = vmatpush3.bf16.msra.mxu1 %v2072_v31  ;;  %1909 = vmatprep.subr.bf16.mxu0 %v2077_v38  ;;  %v2132_v31 = vld [vmem:[%s2636_s1 + $0x2a0] sm:$0xff]   ;;  %v2139_v38 = vld [vmem:[%s2636_s1 + $0x230] sm:$0xff]  }
  0x22   :  { %1931 = vmatprep.subr.bf16.mxu1 %v2078_v39  ;;  %v2140_v39 = vld [vmem:[%s2636_s1 + $0x2b0] sm:$0xff]  }
  0x23   :  { %317 = vmatmul.mubr.bf16.vlgmr.msra.gmra.mrb[0].mxu0 %v1520_v34  ;;  %v2135_v34 = vld [vmem:[%s2636_s1 + $0x228] sm:$0xff]  }
  0x24   :  { %357 = vmatmul.mubr.bf16.vlgmr.msra.gmra.mrb[0].mxu1 %v1522_v36  ;;  %1910 = vmatpush3.bf16.msra.mxu0 %v2079_v40  ;;  %v2137_v36 = vld [vmem:[%s2636_s1 + $0x270] sm:$0xff]   ;;  %v2141_v40 = vld [vmem:[%s2636_s1 + $0x278] sm:$0xff]  }
  0x25   :  { %1932 = vmatpush3.bf16.msra.mxu1 %v2080_v41  ;;  %1911 = vmatprep.subr.bf16.mxu0 %v2081_v42  ;;  %v2142_v41 = vld [vmem:[%s2636_s1 + $0x2f8] sm:$0xff]  }
  0x26   :  { %1933 = vmatprep.subr.bf16.mxu1 %v2082_v43  ;;  %670 = vmatprep.mubr.bf16.mxu0 %v1623_v8  ;;  %v2143_v42 = vld [vmem:[%s2636_s1 + $0x238] sm:$0xff]   ;;  %v2171_v8 = vld [vmem:[%s2636_s1 + $0x328] sm:$0xff]  }
  0x27   :  { %710 = vmatprep.mubr.bf16.mxu1 %v1625_v11  ;;  %v2144_v43 = vld [vmem:[%s2636_s1 + $0x2b8] sm:$0xff]   ;;  %v2174_v11 = vld [vmem:[%s2636_s1 + $0x3f0] sm:$0xff]  }
  0x28   :  { %1912 = vmatpush3.bf16.msra.mxu0 %v2083_v44  ;;  %v1658_v44 = vld [vmem:[%s2637_s0 + $0x20] sm:$0xff] }
  0x29   :  { %1934 = vmatpush3.bf16.msra.mxu1 %v2084_v45  ;;  %1913 = vmatprep.subr.bf16.mxu0 %v2085_v46  ;;  %v1659_v45 = vld [vmem:[%s2637_s0 + $0x28] sm:$0xff]  ;;  %v1724_v46 = vcombine.low %v1658_v44, %v1658_v44 }
  0x2a   :  { %1935 = vmatprep.subr.bf16.mxu1 %v2086_v47  ;;  %v1725_v47 = vcombine.high %v1658_v44, %v1658_v44 }
  0x2c   :  { %1914 = vmatpush3.bf16.msra.mxu0 %v2087_v48  ;;  %v1726_v48 = vcombine.low %v1659_v45, %v1659_v45 }
  0x2d   :  { %1936 = vmatpush3.bf16.msra.mxu1 %v2088_v49  ;;  %1915 = vmatprep.subr.bf16.mxu0 %v2089_v50  ;;  %v1727_v49 = vcombine.high %v1659_v45, %v1659_v45  ;;  %v2149_v50 = vld [vmem:[%s2636_s1 + $0x340] sm:$0xff]  }
  0x2e   :  { %1937 = vmatprep.subr.bf16.mxu1 %v2090_v51  ;;  %v2150_v51 = vld [vmem:[%s2636_s1 + $0x3c0] sm:$0xff]  }
  0x30   :  { %1916 = vmatpush3.bf16.msra.mxu0 %v2091_v52  ;;  %v2151_v52 = vld [vmem:[%s2636_s1 + $0x300] sm:$0xff]  }
  0x31   :  { %1938 = vmatpush3.bf16.msra.mxu1 %v2092_v53  ;;  %1917 = vmatprep.subr.bf16.mxu0 %v2093_v54  ;;  %v2152_v53 = vld [vmem:[%s2636_s1 + $0x380] sm:$0xff]   ;;  %v2153_v54 = vld [vmem:[%s2636_s1 + $0x348] sm:$0xff]  }
  0x32   :  { %1939 = vmatprep.subr.bf16.mxu1 %v2094_v55  ;;  %v2154_v55 = vld [vmem:[%s2636_s1 + $0x3c8] sm:$0xff]  }
  0x34   :  { %1918 = vmatpush3.bf16.msra.mxu0 %v2095_v56  ;;  %v2155_v56 = vld [vmem:[%s2636_s1 + $0x308] sm:$0xff]  }
  0x35   :  { %1940 = vmatpush3.bf16.msra.mxu1 %v2096_v57  ;;  %1919 = vmatprep.subr.bf16.mxu0 %v2097_v58  ;;  %v2156_v57 = vld [vmem:[%s2636_s1 + $0x388] sm:$0xff]   ;;  %v2157_v58 = vld [vmem:[%s2636_s1 + $0x350] sm:$0xff]  }
  0x36   :  { %1941 = vmatprep.subr.bf16.mxu1 %v2098_v59  ;;  %v2158_v59 = vld [vmem:[%s2636_s1 + $0x3d0] sm:$0xff]  }
  0x38   :  { %1920 = vmatpush3.bf16.msra.mxu0 %v2099_v60  ;;  %v2159_v60 = vld [vmem:[%s2636_s1 + $0x310] sm:$0xff]  }
  0x39   :  { %1942 = vmatpush3.bf16.msra.mxu1 %v2100_v61  ;;  %1921 = vmatprep.subr.bf16.mxu0 %v2101_v62  ;;  %v2160_v61 = vld [vmem:[%s2636_s1 + $0x390] sm:$0xff]   ;;  %v2161_v62 = vld [vmem:[%s2636_s1 + $0x358] sm:$0xff]  }
  0x3a   :  { %1943 = vmatprep.subr.bf16.mxu1 %v2102_v63  ;;  %v2162_v63 = vld [vmem:[%s2636_s1 + $0x3d8] sm:$0xff]  }
  0x3c   :  { %1922 = vmatpush3.bf16.msra.mxu0 %v2103_v0  ;;  %v2163_v0 = vld [vmem:[%s2636_s1 + $0x318] sm:$0xff]  }
  0x3d   :  { %1944 = vmatpush3.bf16.msra.mxu1 %v2104_v1  ;;  %1923 = vmatprep.subr.bf16.mxu0 %v2105_v2  ;;  %v2164_v1 = vld [vmem:[%s2636_s1 + $0x398] sm:$0xff]   ;;  %v2165_v2 = vld [vmem:[%s2636_s1 + $0x360] sm:$0xff]  }
  0x3e   :  { %1945 = vmatprep.subr.bf16.mxu1 %v2106_v3  ;;  %v2166_v3 = vld [vmem:[%s2636_s1 + $0x3e0] sm:$0xff]  }
  0x40   :  { %1924 = vmatpush3.bf16.msra.mxu0 %v2107_v4  ;;  %v2167_v4 = vld [vmem:[%s2636_s1 + $0x320] sm:$0xff]  }
  0x41   :  { %1946 = vmatpush3.bf16.msra.mxu1 %v2108_v5  ;;  %1953 = vmatprep.subr.bf16.mxu0 %v2113_v12  ;;  %v2168_v5 = vld [vmem:[%s2636_s1 + $0x3a0] sm:$0xff]   ;;  %v2175_v12 = vld [vmem:[%s2636_s1 + $0x330] sm:$0xff]  }
  0x42   :  { %1975 = vmatprep.subr.bf16.mxu1 %v2114_v13  ;;  %v2176_v13 = vld [vmem:[%s2636_s1 + $0x3b0] sm:$0xff]  }
  0x43   :  { %671 = vmatmul.mubr.bf16.vlgmr.msra.gmra.mrb[4].mxu0 %v1622_v7  ;;  %v2170_v7 = vld [vmem:[%s2636_s1 + $0x3e8] sm:$0xff]  }
  0x44   :  { %711 = vmatmul.mubr.bf16.vlgmr.msra.gmra.mrb[4].mxu1 %v1624_v10  ;;  %1954 = vmatpush3.bf16.msra.mxu0 %v2115_v14  ;;  %v2173_v10 = vld [vmem:[%s2636_s1 + $0x370] sm:$0xff]   ;;  %v2177_v14 = vld [vmem:[%s2636_s1 + $0x378] sm:$0xff]  }
  0x45   :  { %1976 = vmatpush3.bf16.msra.mxu1 %v2116_v15  ;;  %1955 = vmatprep.subr.bf16.mxu0 %v2117_v16  ;;  %v2178_v15 = vld [vmem:[%s2636_s1 + $0x3f8] sm:$0xff]  }
  0x46   :  { %1977 = vmatprep.subr.bf16.mxu1 %v2118_v17  ;;  %1024 = vmatprep.mubr.bf16.mxu0 %v1725_v47  ;;  %v2179_v16 = vld [vmem:[%s2636_s1 + $0x338] sm:$0xff]  }
  0x47   :  { %1064 = vmatprep.mubr.bf16.mxu1 %v1727_v49  ;;  %v2180_v17 = vld [vmem:[%s2636_s1 + $0x3b8] sm:$0xff]  }
  0x48   :  { %1956 = vmatpush3.bf16.msra.mxu0 %v2119_v18  ;;  %v1760_v18 = vld [vmem:[%s2637_s0 + $0x30] sm:$0xff] }
  0x49   :  { %1978 = vmatpush3.bf16.msra.mxu1 %v2120_v19  ;;  %1957 = vmatprep.subr.bf16.mxu0 %v2121_v20  ;;  %v1761_v19 = vld [vmem:[%s2637_s0 + $0x38] sm:$0xff]  ;;  %v1826_v20 = vcombine.low %v1760_v18, %v1760_v18 }
  0x4a   :  { %1979 = vmatprep.subr.bf16.mxu1 %v2122_v21  ;;  %v1827_v21 = vcombine.high %v1760_v18, %v1760_v18 }
  0x4c   :  { %1958 = vmatpush3.bf16.msra.mxu0 %v2123_v22  ;;  %v1828_v22 = vcombine.low %v1761_v19, %v1761_v19 }
  0x4d   :  { %1980 = vmatpush3.bf16.msra.mxu1 %v2124_v23  ;;  %1959 = vmatprep.subr.bf16.mxu0 %v2125_v24  ;;  %v1829_v23 = vcombine.high %v1761_v19, %v1761_v19 }
  0x4e   :  { %1981 = vmatprep.subr.bf16.mxu1 %v2126_v25 }
  0x50   :  { %1960 = vmatpush3.bf16.msra.mxu0 %v2127_v26 }
  0x51   :  { %1982 = vmatpush3.bf16.msra.mxu1 %v2128_v27  ;;  %1961 = vmatprep.subr.bf16.mxu0 %v2129_v28 }
  0x52   :  { %1983 = vmatprep.subr.bf16.mxu1 %v2130_v29 }
  0x54   :  { %1962 = vmatpush3.bf16.msra.mxu0 %v2131_v30 }
  0x55   :  { %1984 = vmatpush3.bf16.msra.mxu1 %v2132_v31  ;;  %1963 = vmatprep.subr.bf16.mxu0 %v2133_v32 }
  0x56   :  { %1985 = vmatprep.subr.bf16.mxu1 %v2134_v33 }
  0x58   :  { %1964 = vmatpush3.bf16.msra.mxu0 %v2135_v34 }
  0x59   :  { %1986 = vmatpush3.bf16.msra.mxu1 %v2136_v35  ;;  %1965 = vmatprep.subr.bf16.mxu0 %v2137_v36 }
  0x5a   :  { %1987 = vmatprep.subr.bf16.mxu1 %v2138_v37 }
  0x5c   :  { %1966 = vmatpush3.bf16.msra.mxu0 %v2139_v38 }
  0x5d   :  { %1988 = vmatpush3.bf16.msra.mxu1 %v2140_v39  ;;  %1967 = vmatprep.subr.bf16.mxu0 %v2141_v40 }
  0x5e   :  { %1989 = vmatprep.subr.bf16.mxu1 %v2142_v41 }
  0x60   :  { %1968 = vmatpush3.bf16.msra.mxu0 %v2143_v42 }
  0x61   :  { %1990 = vmatpush3.bf16.msra.mxu1 %v2144_v43  ;;  %1997 = vmatprep.subr.bf16.mxu0 %v2149_v50 }
  0x62   :  { %2019 = vmatprep.subr.bf16.mxu1 %v2150_v51 }
  0x63   :  { %1025 = vmatmul.mubr.bf16.vlgmr.msra.gmra.mrb[8].mxu0 %v1724_v46 }
  0x64   :  { %1065 = vmatmul.mubr.bf16.vlgmr.msra.gmra.mrb[8].mxu1 %v1726_v48  ;;  %1998 = vmatpush3.bf16.msra.mxu0 %v2151_v52 }
  0x65   :  { %2020 = vmatpush3.bf16.msra.mxu1 %v2152_v53  ;;  %1999 = vmatprep.subr.bf16.mxu0 %v2153_v54 }
  0x66   :  { %2021 = vmatprep.subr.bf16.mxu1 %v2154_v55  ;;  %1378 = vmatprep.mubr.bf16.mxu0 %v1827_v21 }
  0x67   :  { %1418 = vmatprep.mubr.bf16.mxu1 %v1829_v23 }
  0x68   :  { %2000 = vmatpush3.bf16.msra.mxu0 %v2155_v56 }
  0x69   :  { %2022 = vmatpush3.bf16.msra.mxu1 %v2156_v57  ;;  %2001 = vmatprep.subr.bf16.mxu0 %v2157_v58 }
  0x6a   :  { %2023 = vmatprep.subr.bf16.mxu1 %v2158_v59 }
  0x6c   :  { %2002 = vmatpush3.bf16.msra.mxu0 %v2159_v60 }
  0x6d   :  { %2024 = vmatpush3.bf16.msra.mxu1 %v2160_v61  ;;  %2003 = vmatprep.subr.bf16.mxu0 %v2161_v62 }
  0x6e   :  { %2025 = vmatprep.subr.bf16.mxu1 %v2162_v63 }
  0x70   :  { %2004 = vmatpush3.bf16.msra.mxu0 %v2163_v0 }
  0x71   :  { %2026 = vmatpush3.bf16.msra.mxu1 %v2164_v1  ;;  %2005 = vmatprep.subr.bf16.mxu0 %v2165_v2 }
  0x72   :  { %2027 = vmatprep.subr.bf16.mxu1 %v2166_v3 }
  0x74   :  { %2006 = vmatpush3.bf16.msra.mxu0 %v2167_v4 }
  0x75   :  { %2028 = vmatpush3.bf16.msra.mxu1 %v2168_v5  ;;  %2007 = vmatprep.subr.bf16.mxu0 %v2169_v6 }
  0x76   :  { %2029 = vmatprep.subr.bf16.mxu1 %v2170_v7 }
  0x78   :  { %2008 = vmatpush3.bf16.msra.mxu0 %v2171_v8 }
  0x79   :  { %2030 = vmatpush3.bf16.msra.mxu1 %v2172_v9  ;;  %2009 = vmatprep.subr.bf16.mxu0 %v2173_v10 }
  0x7a   :  { %2031 = vmatprep.subr.bf16.mxu1 %v2174_v11 }
  0x7c   :  { %2010 = vmatpush3.bf16.msra.mxu0 %v2175_v12 }
  0x7d   :  { %2032 = vmatpush3.bf16.msra.mxu1 %v2176_v13  ;;  %2011 = vmatprep.subr.bf16.mxu0 %v2177_v14 }
  0x7e   :  { %2033 = vmatprep.subr.bf16.mxu1 %v2178_v15 }
  0x80   :  { %2012 = vmatpush3.bf16.msra.mxu0 %v2179_v16 }
  0x81   :  { %2034 = vmatpush3.bf16.msra.mxu1 %v2180_v17 }
  0x83   :  { %1379 = vmatmul.mubr.bf16.vlgmr.msra.gmra.mrb[12].mxu0 %v1826_v20 }
  0x84   :  { %1419 = vmatmul.mubr.bf16.vlgmr.msra.gmra.mrb[12].mxu1 %v1828_v22 }
  0xf6   :  { %v1881_v24 = vpop.f32.mrb[0].mxu0 }
  0xf7   :  { %v1903_v25 = vpop.f32.mrb[0].mxu1  ;;  %v1882_v26 = vpop.f32.mrb[1].mxu0 }
  0xf8   :  { %v1904_v27 = vpop.f32.mrb[1].mxu1  ;;  %v1883_v28 = vadd.f32 %v1882_v26, %v1881_v24  ;;  %v1884_v30 = vpop.f32.mrb[2].mxu0 }
  0xf9   :  { %v1905_v29 = vadd.f32 %v1904_v27, %v1903_v25  ;;  %v1906_v31 = vpop.f32.mrb[2].mxu1  ;;  %v1885_v32 = vpop.f32.mrb[3].mxu0 }
  0xfa   :  { %v1907_v33 = vpop.f32.mrb[3].mxu1 }
  0xfb   :  { %v2610_v34 = vadd.f32 %v1905_v29, %v1883_v28 }
  0xfd   :  { %v1454_v35 = vmul.f32 %v2610_v34, %v2610_v34  ;;  %v1426_v36 = vrot.slane %v2610_v34, 4 }
  0xff   :  { %v1455_v37 = vrot.slane %v1454_v35, 4  ;;  %v1427_v38 = vadd.f32 %v1426_v36, %v2610_v34 }
 0x101   :  { %v1456_v43 = vadd.f32 %v1455_v37, %v1454_v35  ;;  %v1428_v50 = vrot.slane %v1427_v38, 2 }
 0x103   :  { %v1457_v52 = vrot.slane %v1456_v43, 2  ;;  %v1429_v55 = vadd.f32 %v1428_v50, %v1427_v38 }
 0x105   :  { %v1458_v58 = vadd.f32 %v1457_v52, %v1456_v43  ;;  %v1430_v61 = vrot.slane %v1429_v55, 1 }
 0x107   :  { %v1459_v0 = vrot.slane %v1458_v58, 1  ;;  %v1431_v3 = vadd.f32 %v1430_v61, %v1429_v55 }
 0x109   :  { %v1460_v6 = vadd.f32 %v1459_v0, %v1458_v58 }
 0x116   :  { %v1925_v39 = vpop.f32.mrb[4].mxu0 }
 0x117   :  { %v1947_v40 = vpop.f32.mrb[4].mxu1  ;;  %v1926_v41 = vpop.f32.mrb[5].mxu0 }
 0x118   :  { %v1948_v42 = vpop.f32.mrb[5].mxu1  ;;  %v1927_v44 = vadd.f32 %v1926_v41, %v1925_v39  ;;  %v1928_v46 = vpop.f32.mrb[6].mxu0 }
 0x119   :  { %v1949_v45 = vadd.f32 %v1948_v42, %v1947_v40  ;;  %v1950_v47 = vpop.f32.mrb[6].mxu1  ;;  %v1929_v48 = vpop.f32.mrb[7].mxu0 }
 0x11a   :  { %v1951_v49 = vpop.f32.mrb[7].mxu1 }
 0x11b   :  { %v2616_v51 = vadd.f32 %v1949_v45, %v1927_v44 }
 0x11d   :  { %v1433_v53 = vrot.slane %v2616_v51, 4  ;;  %v1462_v54 = vmul.f32 %v2616_v51, %v2616_v51 }
 0x11f   :  { %v1434_v56 = vadd.f32 %v1433_v53, %v2616_v51  ;;  %v1463_v57 = vrot.slane %v1462_v54, 4 }
 0x121   :  { %v1435_v59 = vrot.slane %v1434_v56, 2  ;;  %v1464_v60 = vadd.f32 %v1463_v57, %v1462_v54 }
 0x123   :  { %v1436_v62 = vadd.f32 %v1435_v59, %v1434_v56  ;;  %v1465_v63 = vrot.slane %v1464_v60, 2 }
 0x125   :  { %v1437_v1 = vrot.slane %v1436_v62, 1  ;;  %v1466_v2 = vadd.f32 %v1465_v63, %v1464_v60 }
 0x127   :  { %v1438_v4 = vadd.f32 %v1437_v1, %v1436_v62  ;;  %v1467_v5 = vrot.slane %v1466_v2, 1 }
 0x129   :  { %v1439_v7 = vadd.f32 %v1438_v4, %v1431_v3  ;;  %v1468_v8 = vadd.f32 %v1467_v5, %v1466_v2 }
 0x12b   :  { %v1469_v9 = vadd.f32 %v1468_v8, %v1460_v6 }
 0x136   :  { %v1969_v10 = vpop.f32.mrb[8].mxu0 }
 0x137   :  { %v1991_v11 = vpop.f32.mrb[8].mxu1  ;;  %v1970_v12 = vpop.f32.mrb[9].mxu0 }
 0x138   :  { %v1971_v13 = vadd.f32 %v1970_v12, %v1969_v10  ;;  %v1992_v14 = vpop.f32.mrb[9].mxu1  ;;  %v1972_v15 = vpop.f32.mrb[10].mxu0 }
 0x139   :  { %v1993_v16 = vadd.f32 %v1992_v14, %v1991_v11  ;;  %v1994_v17 = vpop.f32.mrb[10].mxu1  ;;  %v1973_v18 = vpop.f32.mrb[11].mxu0 }
 0x13a   :  { %v1995_v19 = vpop.f32.mrb[11].mxu1 }
 0x13b   :  { %v1067_v20 = vadd.f32 %v1993_v16, %v1971_v13 }
 0x13d   :  { %v1440_v21 = vrot.slane %v1067_v20, 4  ;;  %v1470_v22 = vmul.f32 %v1067_v20, %v1067_v20 }
 0x13f   :  { %v1441_v23 = vadd.f32 %v1440_v21, %v1067_v20  ;;  %v1471_v24 = vrot.slane %v1470_v22, 4 }
 0x141   :  { %v1442_v25 = vrot.slane %v1441_v23, 2  ;;  %v1472_v26 = vadd.f32 %v1471_v24, %v1470_v22 }
 0x143   :  { %v1443_v27 = vadd.f32 %v1442_v25, %v1441_v23  ;;  %v1473_v28 = vrot.slane %v1472_v26, 2 }
 0x145   :  { %v1444_v29 = vrot.slane %v1443_v27, 1  ;;  %v1474_v30 = vadd.f32 %v1473_v28, %v1472_v26 }
 0x147   :  { %v1445_v31 = vadd.f32 %v1444_v29, %v1443_v27  ;;  %v1475_v32 = vrot.slane %v1474_v30, 1 }
 0x149   :  { %v1446_v33 = vadd.f32 %v1445_v31, %v1439_v7  ;;  %v1476_v35 = vadd.f32 %v1475_v32, %v1474_v30 }
 0x14b   :  { %v1477_v36 = vadd.f32 %v1476_v35, %v1469_v9 }
 0x156   :  { %v2013_v37 = vpop.f32.mrb[12].mxu0 }
 0x157   :  { %v2035_v38 = vpop.f32.mrb[12].mxu1  ;;  %v2014_v39 = vpop.f32.mrb[13].mxu0 }
 0x158   :  { %v2015_v40 = vadd.f32 %v2014_v39, %v2013_v37  ;;  %v2036_v41 = vpop.f32.mrb[13].mxu1  ;;  %v2016_v42 = vpop.f32.mrb[14].mxu0 }
 0x159   :  { %v2037_v43 = vadd.f32 %v2036_v41, %v2035_v38  ;;  %v2038_v44 = vpop.f32.mrb[14].mxu1  ;;  %v2017_v45 = vpop.f32.mrb[15].mxu0 }
 0x15a   :  { %v2039_v46 = vpop.f32.mrb[15].mxu1 }
 0x15b   :  { %v1421_v47 = vadd.f32 %v2037_v43, %v2015_v40 }
 0x15d   :  { %v1447_v48 = vrot.slane %v1421_v47, 4  ;;  %v1478_v49 = vmul.f32 %v1421_v47, %v1421_v47 }
 0x15f   :  { %v1448_v50 = vadd.f32 %v1447_v48, %v1421_v47  ;;  %v1479_v52 = vrot.slane %v1478_v49, 4 }
 0x161   :  { %v1449_v53 = vrot.slane %v1448_v50, 2  ;;  %v1480_v54 = vadd.f32 %v1479_v52, %v1478_v49 }
 0x163   :  { %v1450_v55 = vadd.f32 %v1449_v53, %v1448_v50  ;;  %v1481_v56 = vrot.slane %v1480_v54, 2 }
 0x165   :  { %v1451_v57 = vrot.slane %v1450_v55, 1  ;;  %v1482_v58 = vadd.f32 %v1481_v56, %v1480_v54 }
 0x167   :  { %v1452_v59 = vadd.f32 %v1451_v57, %v1450_v55  ;;  %v1483_v60 = vrot.slane %v1482_v58, 1 }
 0x169   :  { %v1453_v61 = vadd.f32 %v1452_v59, %v1446_v33  ;;  %v1484_v62 = vadd.f32 %v1483_v60, %v1482_v58 }
 0x16b   :  { %v1485_v63 = vadd.f32 %v1484_v62, %v1477_v36  ;;  %v1486_v0 = vmul.f32 0.03125, %v1453_v61 }
 0x16d   :  { %v1487_v1 = vmul.f32 0.03125, %v1485_v63  ;;  %v1488_v2 = vmul.f32 %v1486_v0, %v1486_v0  ;;  %v1493_v3 = vsub.f32 %v2610_v34, %v1486_v0  ;;  %v1498_v4 = vsub.f32 %v2616_v51, %v1486_v0 }
 0x16e   :  { %v1504_v5 = vsub.f32 %v1067_v20, %v1486_v0  ;;  %v1510_v6 = vsub.f32 %v1421_v47, %v1486_v0 }
 0x16f   :  { %v1489_v7 = vsub.f32 %v1487_v1, %v1488_v2 }
 0x171   :  { %v1490_v8 = vmax.f32 %v1489_v7, 0.0 }
 0x173   :  { %v1491_v9 = vadd.f32 1e-05, %v1490_v8 }
 0x175   :  { %2185 = vrsqrt.f32 %v1491_v9 }
 0x17f   :  { %v2186_v10 = vpop.eup %2185 }
 0x180   :  { %v1494_v11 = vmul.f32 %v2186_v10, %v1493_v3  ;;  %v1499_v12 = vmul.f32 %v2186_v10, %v1498_v4  ;;  %v1505_v13 = vmul.f32 %v2186_v10, %v1504_v5  ;;  %v1511_v14 = vmul.f32 %v2186_v10, %v1510_v6 }
 0x182   :  { %v1495_v15 = vmax.f32 %v1494_v11, 0.0  ;;  %v1500_v16 = vmax.f32 %v1499_v12, 0.0  ;;  %v1506_v17 = vmax.f32 %v1505_v13, 0.0  ;;  %v1512_v18 = vmax.f32 %v1511_v14, 0.0 }
 0x184   :  { %v1496_v19 = vpack.c.bf16 %v1495_v15, %v1495_v15  ;;  %v1501_v21 = vpack.c.bf16 %v1500_v16, %v1500_v16  ;;  %v1507_v34 = vpack.c.bf16 %v1506_v17, %v1506_v17  ;;  %v1513_v22 = vpack.c.bf16 %v1512_v18, %v1512_v18 }
 0x186   :  { %1497 = vst [vmem:[%s2638_s2] sm:$0xf] %v1496_v19  ;;  %1862 = vst [vmem:[%s2638_s2 + $0x4] sm:$0xf] %v1501_v21 }
 0x187   :  { %1863 = vst [vmem:[%s2638_s2 + $0x8] sm:$0xf] %v1507_v34  ;;  %1864 = vst [vmem:[%s2638_s2 + $0xc] sm:$0xf] %v1513_v22 }

// kernel: unet_forward.14
= control target key start
LH: loop header
LB: loop body
LE: loop exit
PB: predicated region body
PF: predicated region fallthrough
CT: control target
= control target key end

     0   :  { %s1922_s1 = inlined_call_operand.vmem [shape: bf16[4,256,128], index: 1, kind: input, shape index: {}]   ;;  %s1923_s0 = inlined_call_operand.vmem [shape: bf16[4,32,256], index: 0, kind: input, shape index: {}]   ;;  %s1924_s2 = inlined_call_operand.vmem [shape: bf16[4,32,128], index: 2, kind: output, shape index: {}]  }
   0x1   :  { %v1451_v0 = vld [vmem:[%s1922_s1 + $0x40] sm:$0xff]   ;;  %v1455_v4 = vld [vmem:[%s1922_s1 + $0x48] sm:$0xff]   ;;  %v1459_v8 = vld [vmem:[%s1922_s1 + $0x50] sm:$0xff]  }
   0x2   :  { %v1452_v1 = vld [vmem:[%s1922_s1 + $0xc0] sm:$0xff]   ;;  %1339 = vmatprep.subr.bf16.mxu0 %v1451_v0  ;;  %v1456_v5 = vld [vmem:[%s1922_s1 + $0xc8] sm:$0xff]   ;;  %v1460_v9 = vld [vmem:[%s1922_s1 + $0xd0] sm:$0xff]  }
   0x3   :  { %v1453_v2 = vld [vmem:[%s1922_s1] sm:$0xff]   ;;  %1367 = vmatprep.subr.bf16.mxu1 %v1452_v1  ;;  %v1457_v6 = vld [vmem:[%s1922_s1 + $0x8] sm:$0xff]   ;;  %v1461_v10 = vld [vmem:[%s1922_s1 + $0x10] sm:$0xff]  }
   0x4   :  { %v1454_v3 = vld [vmem:[%s1922_s1 + $0x80] sm:$0xff]   ;;  %1340 = vmatpush3.bf16.msra.mxu0 %v1453_v2  ;;  %v1458_v7 = vld [vmem:[%s1922_s1 + $0x88] sm:$0xff]   ;;  %v1462_v11 = vld [vmem:[%s1922_s1 + $0x90] sm:$0xff]  }
   0x5   :  { %1368 = vmatpush3.bf16.msra.mxu1 %v1454_v3  ;;  %1341 = vmatprep.subr.bf16.mxu0 %v1455_v4  ;;  %v1463_v12 = vld [vmem:[%s1922_s1 + $0x58] sm:$0xff]   ;;  %v1467_v16 = vld [vmem:[%s1922_s1 + $0x60] sm:$0xff]   ;;  %v1471_v20 = vld [vmem:[%s1922_s1 + $0x68] sm:$0xff]  }
   0x6   :  { %1369 = vmatprep.subr.bf16.mxu1 %v1456_v5  ;;  %v1464_v13 = vld [vmem:[%s1922_s1 + $0xd8] sm:$0xff]   ;;  %v1468_v17 = vld [vmem:[%s1922_s1 + $0xe0] sm:$0xff]   ;;  %v1472_v21 = vld [vmem:[%s1922_s1 + $0xe8] sm:$0xff]  }
   0x7   :  { %v1465_v14 = vld [vmem:[%s1922_s1 + $0x18] sm:$0xff]   ;;  %v1469_v18 = vld [vmem:[%s1922_s1 + $0x20] sm:$0xff]   ;;  %v1473_v22 = vld [vmem:[%s1922_s1 + $0x28] sm:$0xff]  }
   0x8   :  { %1342 = vmatpush3.bf16.msra.mxu0 %v1457_v6  ;;  %v1466_v15 = vld [vmem:[%s1922_s1 + $0x98] sm:$0xff]   ;;  %v1470_v19 = vld [vmem:[%s1922_s1 + $0xa0] sm:$0xff]   ;;  %v1474_v23 = vld [vmem:[%s1922_s1 + $0xa8] sm:$0xff]  }
   0x9   :  { %1370 = vmatpush3.bf16.msra.mxu1 %v1458_v7  ;;  %1343 = vmatprep.subr.bf16.mxu0 %v1459_v8  ;;  %v1475_v24 = vld [vmem:[%s1922_s1 + $0x70] sm:$0xff]   ;;  %v1479_v28 = vld [vmem:[%s1922_s1 + $0x78] sm:$0xff]   ;;  %v1483_v32 = vld [vmem:[%s1923_s0] ss:$8 sps:$4 sm:$0xff]  }
   0xa   :  { %1371 = vmatprep.subr.bf16.mxu1 %v1460_v9  ;;  %v1476_v25 = vld [vmem:[%s1922_s1 + $0xf0] sm:$0xff]   ;;  %v1480_v29 = vld [vmem:[%s1922_s1 + $0xf8] sm:$0xff]   ;;  %v1485_v33 = vld [vmem:[%s1923_s0 + $0x4] ss:$8 sps:$4 sm:$0xff]  }
   0xb   :  { %v1477_v26 = vld [vmem:[%s1922_s1 + $0x30] sm:$0xff]   ;;  %v1481_v30 = vld [vmem:[%s1922_s1 + $0x38] sm:$0xff]   ;;  %v1486_v34 = vld [vmem:[%s1923_s0 + $0x20] ss:$8 sps:$4 sm:$0xff]   ;;  %196 = vmatprep.mubr.bf16.mxu0 %v1485_v33 }
   0xc   :  { %1344 = vmatpush3.bf16.msra.mxu0 %v1461_v10  ;;  %v1478_v27 = vld [vmem:[%s1922_s1 + $0xb0] sm:$0xff]   ;;  %v1482_v31 = vld [vmem:[%s1922_s1 + $0xb8] sm:$0xff]   ;;  %v1488_v35 = vld [vmem:[%s1923_s0 + $0x24] ss:$8 sps:$4 sm:$0xff]  }
   0xd   :  { %1372 = vmatpush3.bf16.msra.mxu1 %v1462_v11  ;;  %1345 = vmatprep.subr.bf16.mxu0 %v1463_v12  ;;  %v1489_v36 = vld [vmem:[%s1922_s1 + $0x140] sm:$0xff]   ;;  %v1493_v40 = vld [vmem:[%s1922_s1 + $0x148] sm:$0xff]   ;;  %v1497_v44 = vld [vmem:[%s1923_s0 + $0x14] ss:$8 sps:$4 sm:$0xff]  }
   0xe   :  { %1373 = vmatprep.subr.bf16.mxu1 %v1464_v13  ;;  %399 = vmatprep.mubr.bf16.mxu1 %v1488_v35  ;;  %v1490_v37 = vld [vmem:[%s1922_s1 + $0x1c0] sm:$0xff]   ;;  %v1494_v41 = vld [vmem:[%s1922_s1 + $0x1c8] sm:$0xff]   ;;  %v1499_v45 = vld [vmem:[%s1923_s0 + $0x34] ss:$8 sps:$4 sm:$0xff]  }
   0xf   :  { %v1491_v38 = vld [vmem:[%s1922_s1 + $0x100] sm:$0xff]   ;;  %v1495_v42 = vld [vmem:[%s1922_s1 + $0x108] sm:$0xff]   ;;  %v1501_v46 = vld [vmem:[%s1923_s0 + $0x10] ss:$8 sps:$4 sm:$0xff]  }
  0x10   :  { %1346 = vmatpush3.bf16.msra.mxu0 %v1465_v14  ;;  %v1492_v39 = vld [vmem:[%s1922_s1 + $0x180] sm:$0xff]   ;;  %v1496_v43 = vld [vmem:[%s1922_s1 + $0x188] sm:$0xff]   ;;  %v1502_v47 = vld [vmem:[%s1923_s0 + $0x30] ss:$8 sps:$4 sm:$0xff]  }
  0x11   :  { %1374 = vmatpush3.bf16.msra.mxu1 %v1466_v15  ;;  %1347 = vmatprep.subr.bf16.mxu0 %v1467_v16  ;;  %v1503_v48 = vld [vmem:[%s1922_s1 + $0x150] sm:$0xff]   ;;  %v1507_v52 = vld [vmem:[%s1922_s1 + $0x158] sm:$0xff]   ;;  %v1511_v56 = vld [vmem:[%s1922_s1 + $0x160] sm:$0xff]  }
  0x12   :  { %1375 = vmatprep.subr.bf16.mxu1 %v1468_v17  ;;  %v1504_v49 = vld [vmem:[%s1922_s1 + $0x1d0] sm:$0xff]   ;;  %v1508_v53 = vld [vmem:[%s1922_s1 + $0x1d8] sm:$0xff]   ;;  %v1512_v57 = vld [vmem:[%s1922_s1 + $0x1e0] sm:$0xff]  }
  0x13   :  { %v1505_v50 = vld [vmem:[%s1922_s1 + $0x110] sm:$0xff]   ;;  %v1509_v54 = vld [vmem:[%s1922_s1 + $0x118] sm:$0xff]   ;;  %v1513_v58 = vld [vmem:[%s1922_s1 + $0x120] sm:$0xff]  }
  0x14   :  { %1348 = vmatpush3.bf16.msra.mxu0 %v1469_v18  ;;  %v1506_v51 = vld [vmem:[%s1922_s1 + $0x190] sm:$0xff]   ;;  %v1510_v55 = vld [vmem:[%s1922_s1 + $0x198] sm:$0xff]   ;;  %v1514_v59 = vld [vmem:[%s1922_s1 + $0x1a0] sm:$0xff]  }
  0x15   :  { %1376 = vmatpush3.bf16.msra.mxu1 %v1470_v19  ;;  %1349 = vmatprep.subr.bf16.mxu0 %v1471_v20  ;;  %v1515_v60 = vld [vmem:[%s1922_s1 + $0x168] sm:$0xff]   ;;  %v1519_v0 = vld [vmem:[%s1922_s1 + $0x170] sm:$0xff]   ;;  %v1523_v4 = vld [vmem:[%s1922_s1 + $0x178] sm:$0xff]  }
  0x16   :  { %1377 = vmatprep.subr.bf16.mxu1 %v1472_v21  ;;  %v1516_v61 = vld [vmem:[%s1922_s1 + $0x1e8] sm:$0xff]   ;;  %v1520_v1 = vld [vmem:[%s1922_s1 + $0x1f0] sm:$0xff]   ;;  %v1524_v5 = vld [vmem:[%s1922_s1 + $0x1f8] sm:$0xff]  }
  0x17   :  { %v1517_v62 = vld [vmem:[%s1922_s1 + $0x128] sm:$0xff]   ;;  %v1521_v2 = vld [vmem:[%s1922_s1 + $0x130] sm:$0xff]   ;;  %v1525_v6 = vld [vmem:[%s1922_s1 + $0x138] sm:$0xff]  }
  0x18   :  { %1350 = vmatpush3.bf16.msra.mxu0 %v1473_v22  ;;  %v1518_v63 = vld [vmem:[%s1922_s1 + $0x1a8] sm:$0xff]   ;;  %v1522_v3 = vld [vmem:[%s1922_s1 + $0x1b0] sm:$0xff]   ;;  %v1526_v7 = vld [vmem:[%s1922_s1 + $0x1b8] sm:$0xff]  }
  0x19   :  { %1378 = vmatpush3.bf16.msra.mxu1 %v1474_v23  ;;  %1351 = vmatprep.subr.bf16.mxu0 %v1475_v24  ;;  %v1527_v8 = vld [vmem:[%s1923_s0 + $0x40] ss:$8 sps:$4 sm:$0xff]   ;;  %v1529_v9 = vld [vmem:[%s1923_s0 + $0x44] ss:$8 sps:$4 sm:$0xff]   ;;  %v1533_v12 = vld [vmem:[%s1923_s0 + $0x54] ss:$8 sps:$4 sm:$0xff]  }
  0x1a   :  { %1379 = vmatprep.subr.bf16.mxu1 %v1476_v25  ;;  %v1530_v10 = vld [vmem:[%s1923_s0 + $0x60] ss:$8 sps:$4 sm:$0xff]   ;;  %v1532_v11 = vld [vmem:[%s1923_s0 + $0x64] ss:$8 sps:$4 sm:$0xff]   ;;  %v1535_v13 = vld [vmem:[%s1923_s0 + $0x74] ss:$8 sps:$4 sm:$0xff]  }
  0x1b   :  { %v1537_v14 = vld [vmem:[%s1923_s0 + $0x50] ss:$8 sps:$4 sm:$0xff]  }
  0x1c   :  { %1352 = vmatpush3.bf16.msra.mxu0 %v1477_v26  ;;  %v1538_v15 = vld [vmem:[%s1923_s0 + $0x70] ss:$8 sps:$4 sm:$0xff]  }
  0x1d   :  { %1380 = vmatpush3.bf16.msra.mxu1 %v1478_v27  ;;  %1353 = vmatprep.subr.bf16.mxu0 %v1479_v28 }
  0x1e   :  { %1381 = vmatprep.subr.bf16.mxu1 %v1480_v29 }
  0x20   :  { %1354 = vmatpush3.bf16.msra.mxu0 %v1481_v30 }
  0x21   :  { %1382 = vmatpush3.bf16.msra.mxu1 %v1482_v31  ;;  %1395 = vmatprep.subr.bf16.mxu0 %v1489_v36 }
  0x22   :  { %1423 = vmatprep.subr.bf16.mxu1 %v1490_v37 }
  0x23   :  { %197 = vmatmul.mubr.bf16.vlgmr.msra.gmra.mrb[0].mxu0 %v1483_v32 }
  0x24   :  { %400 = vmatmul.mubr.bf16.vlgmr.msra.gmra.mrb[0].mxu1 %v1486_v34  ;;  %1396 = vmatpush3.bf16.msra.mxu0 %v1491_v38 }
  0x25   :  { %1424 = vmatpush3.bf16.msra.mxu1 %v1492_v39  ;;  %1397 = vmatprep.subr.bf16.mxu0 %v1493_v40 }
  0x26   :  { %1425 = vmatprep.subr.bf16.mxu1 %v1494_v41  ;;  %204 = vmatprep.mubr.bf16.mxu0 %v1497_v44 }
  0x27   :  { %407 = vmatprep.mubr.bf16.mxu1 %v1499_v45 }
  0x28   :  { %1398 = vmatpush3.bf16.msra.mxu0 %v1495_v42 }
  0x29   :  { %1426 = vmatpush3.bf16.msra.mxu1 %v1496_v43  ;;  %1399 = vmatprep.subr.bf16.mxu0 %v1503_v48 }
  0x2a   :  { %1427 = vmatprep.subr.bf16.mxu1 %v1504_v49 }
  0x2b   :  { %205 = vmatmul.mubr.bf16.gmra.mrb[4].mxu0 %v1501_v46 }
  0x2c   :  { %408 = vmatmul.mubr.bf16.gmra.mrb[4].mxu1 %v1502_v47  ;;  %1400 = vmatpush3.bf16.msra.mxu0 %v1505_v50 }
  0x2d   :  { %1428 = vmatpush3.bf16.msra.mxu1 %v1506_v51  ;;  %1401 = vmatprep.subr.bf16.mxu0 %v1507_v52 }
  0x2e   :  { %1429 = vmatprep.subr.bf16.mxu1 %v1508_v53  ;;  %602 = vmatprep.mubr.bf16.mxu0 %v1529_v9 }
  0x2f   :  { %805 = vmatprep.mubr.bf16.mxu1 %v1532_v11 }
  0x30   :  { %1402 = vmatpush3.bf16.msra.mxu0 %v1509_v54 }
  0x31   :  { %1430 = vmatpush3.bf16.msra.mxu1 %v1510_v55  ;;  %1403 = vmatprep.subr.bf16.mxu0 %v1511_v56 }
  0x32   :  { %1431 = vmatprep.subr.bf16.mxu1 %v1512_v57 }
  0x34   :  { %1404 = vmatpush3.bf16.msra.mxu0 %v1513_v58 }
  0x35   :  { %1432 = vmatpush3.bf16.msra.mxu1 %v1514_v59  ;;  %1405 = vmatprep.subr.bf16.mxu0 %v1515_v60 }
  0x36   :  { %1433 = vmatprep.subr.bf16.mxu1 %v1516_v61 }
  0x38   :  { %1406 = vmatpush3.bf16.msra.mxu0 %v1517_v62 }
  0x39   :  { %1434 = vmatpush3.bf16.msra.mxu1 %v1518_v63  ;;  %1407 = vmatprep.subr.bf16.mxu0 %v1519_v0 }
  0x3a   :  { %1435 = vmatprep.subr.bf16.mxu1 %v1520_v1 }
  0x3c   :  { %1408 = vmatpush3.bf16.msra.mxu0 %v1521_v2 }
  0x3d   :  { %1436 = vmatpush3.bf16.msra.mxu1 %v1522_v3  ;;  %1409 = vmatprep.subr.bf16.mxu0 %v1523_v4 }
  0x3e   :  { %1437 = vmatprep.subr.bf16.mxu1 %v1524_v5 }
  0x40   :  { %1410 = vmatpush3.bf16.msra.mxu0 %v1525_v6 }
  0x41   :  { %1438 = vmatpush3.bf16.msra.mxu1 %v1526_v7 }
  0x43   :  { %603 = vmatmul.mubr.bf16.vlgmr.msra.gmra.mrb[8].mxu0 %v1527_v8 }
  0x44   :  { %806 = vmatmul.mubr.bf16.vlgmr.msra.gmra.mrb[8].mxu1 %v1530_v10  ;;  %610 = vmatprep.mubr.bf16.mxu0 %v1533_v12 }
  0x45   :  { %813 = vmatprep.mubr.bf16.mxu1 %v1535_v13 }
  0x4b   :  { %611 = vmatmul.mubr.bf16.gmra.mrb[12].mxu0 %v1537_v14 }
  0x4c   :  { %814 = vmatmul.mubr.bf16.gmra.mrb[12].mxu1 %v1538_v15 }
  0xf6   :  { %v1355_v16 = vpop.f32.mrb[0].mxu0 }
  0xf7   :  { %v1383_v17 = vpop.f32.mrb[0].mxu1  ;;  %v1356_v18 = vpop.f32.mrb[1].mxu0 }
  0xf8   :  { %v1796_v19 = vadd.f32 %v1356_v18, %v1355_v16  ;;  %v1384_v20 = vpop.f32.mrb[1].mxu1  ;;  %v1358_v21 = vpop.f32.mrb[2].mxu0 }
  0xf9   :  { %v1798_v22 = vadd.f32 %v1384_v20, %v1383_v17  ;;  %v1386_v23 = vpop.f32.mrb[2].mxu1  ;;  %v1359_v24 = vpop.f32.mrb[3].mxu0 }
  0xfa   :  { %v1800_v25 = vadd.f32 %v1359_v24, %v1358_v21  ;;  %v1387_v26 = vpop.f32.mrb[3].mxu1  ;;  %v862_v29 = vmul.f32 %v1796_v19, %v1796_v19 }
  0xfb   :  { %v876_v27 = vmul.f32 %v1798_v22, %v1798_v22  ;;  %v1804_v28 = vadd.f32 %v1387_v26, %v1386_v23 }
  0xfc   :  { %v822_v30 = vadd.f32 %v1800_v25, %v1796_v19  ;;  %v863_v31 = vmul.f32 %v1800_v25, %v1800_v25 }
  0xfd   :  { %v832_v32 = vadd.f32 %v1804_v28, %v1798_v22  ;;  %v877_v33 = vmul.f32 %v1804_v28, %v1804_v28 }
  0xfe   :  { %v866_v34 = vadd.f32 %v863_v31, %v862_v29  ;;  %v1361_v36 = vpop.f32.mrb[4].mxu0 }
  0xff   :  { %v880_v35 = vadd.f32 %v877_v33, %v876_v27  ;;  %v1389_v37 = vpop.f32.mrb[4].mxu1  ;;  %v1362_v38 = vpop.f32.mrb[5].mxu0 }
 0x100   :  { %v1816_v39 = vadd.f32 %v1362_v38, %v1361_v36  ;;  %v1390_v40 = vpop.f32.mrb[5].mxu1  ;;  %v1364_v41 = vpop.f32.mrb[6].mxu0 }
 0x101   :  { %v1818_v42 = vadd.f32 %v1390_v40, %v1389_v37  ;;  %v1392_v43 = vpop.f32.mrb[6].mxu1  ;;  %v1365_v44 = vpop.f32.mrb[7].mxu0 }
 0x102   :  { %v823_v45 = vadd.f32 %v1816_v39, %v822_v30  ;;  %v864_v46 = vmul.f32 %v1816_v39, %v1816_v39  ;;  %v1823_v47 = vadd.f32 %v1365_v44, %v1364_v41  ;;  %v1393_v48 = vpop.f32.mrb[7].mxu1 }
 0x103   :  { %v833_v49 = vadd.f32 %v1818_v42, %v832_v32  ;;  %v878_v50 = vmul.f32 %v1818_v42, %v1818_v42  ;;  %v1828_v51 = vadd.f32 %v1393_v48, %v1392_v43 }
 0x104   :  { %v867_v52 = vadd.f32 %v866_v34, %v864_v46  ;;  %v824_v53 = vadd.f32 %v1823_v47, %v823_v45  ;;  %v865_v54 = vmul.f32 %v1823_v47, %v1823_v47 }
 0x105   :  { %v881_v55 = vadd.f32 %v880_v35, %v878_v50  ;;  %v834_v56 = vadd.f32 %v1828_v51, %v833_v49  ;;  %v879_v57 = vmul.f32 %v1828_v51, %v1828_v51 }
 0x106   :  { %v825_v58 = vrot.slane %v824_v53, 4  ;;  %v868_v59 = vadd.f32 %v867_v52, %v865_v54 }
 0x107   :  { %v835_v60 = vrot.slane %v834_v56, 4  ;;  %v882_v61 = vadd.f32 %v881_v55, %v879_v57 }
 0x108   :  { %v826_v62 = vadd.f32 %v825_v58, %v824_v53  ;;  %v869_v63 = vrot.slane %v868_v59, 4 }
 0x109   :  { %v836_v0 = vadd.f32 %v835_v60, %v834_v56  ;;  %v883_v1 = vrot.slane %v882_v61, 4 }
 0x10a   :  { %v827_v2 = vrot.slane %v826_v62, 2  ;;  %v870_v3 = vadd.f32 %v869_v63, %v868_v59 }
 0x10b   :  { %v837_v4 = vrot.slane %v836_v0, 2  ;;  %v884_v5 = vadd.f32 %v883_v1, %v882_v61 }
 0x10c   :  { %v828_v6 = vadd.f32 %v827_v2, %v826_v62  ;;  %v871_v7 = vrot.slane %v870_v3, 2 }
 0x10d   :  { %v838_v8 = vadd.f32 %v837_v4, %v836_v0  ;;  %v885_v9 = vrot.slane %v884_v5, 2 }
 0x10e   :  { %v829_v10 = vrot.slane %v828_v6, 1  ;;  %v872_v11 = vadd.f32 %v871_v7, %v870_v3 }
 0x10f   :  { %v839_v12 = vrot.slane %v838_v8, 1  ;;  %v886_v13 = vadd.f32 %v885_v9, %v884_v5 }
 0x110   :  { %v830_v14 = vadd.f32 %v829_v10, %v828_v6  ;;  %v873_v15 = vrot.slane %v872_v11, 1 }
 0x111   :  { %v840_v16 = vadd.f32 %v839_v12, %v838_v8  ;;  %v887_v17 = vrot.slane %v886_v13, 1 }
 0x112   :  { %v874_v18 = vadd.f32 %v873_v15, %v872_v11 }
 0x113   :  { %v1836_v20 = vadd.f32 %v840_v16, %v830_v14  ;;  %v888_v21 = vadd.f32 %v887_v17, %v886_v13 }
 0x115   :  { %v1838_v23 = vadd.f32 %v888_v21, %v874_v18 }
 0x116   :  { %v1411_v24 = vpop.f32.mrb[8].mxu0 }
 0x117   :  { %v1439_v26 = vpop.f32.mrb[8].mxu1  ;;  %v1412_v27 = vpop.f32.mrb[9].mxu0 }
 0x118   :  { %v1840_v29 = vadd.f32 %v1412_v27, %v1411_v24  ;;  %v1440_v30 = vpop.f32.mrb[9].mxu1  ;;  %v1414_v31 = vpop.f32.mrb[10].mxu0 }
 0x119   :  { %v1842_v32 = vadd.f32 %v1440_v30, %v1439_v26  ;;  %v1442_v33 = vpop.f32.mrb[10].mxu1  ;;  %v1415_v34 = vpop.f32.mrb[11].mxu0 }
 0x11a   :  { %v1844_v35 = vadd.f32 %v1415_v34, %v1414_v31  ;;  %v1443_v36 = vpop.f32.mrb[11].mxu1  ;;  %v890_v40 = vmul.f32 %v1840_v29, %v1840_v29 }
 0x11b   :  { %v904_v37 = vmul.f32 %v1842_v32, %v1842_v32  ;;  %v1848_v38 = vadd.f32 %v1443_v36, %v1442_v33 }
 0x11c   :  { %v842_v41 = vadd.f32 %v1844_v35, %v1840_v29  ;;  %v891_v43 = vmul.f32 %v1844_v35, %v1844_v35 }
 0x11d   :  { %v852_v44 = vadd.f32 %v1848_v38, %v1842_v32  ;;  %v905_v45 = vmul.f32 %v1848_v38, %v1848_v38 }
 0x11e   :  { %v894_v46 = vadd.f32 %v891_v43, %v890_v40  ;;  %v1417_v48 = vpop.f32.mrb[12].mxu0 }
 0x11f   :  { %v908_v49 = vadd.f32 %v905_v45, %v904_v37  ;;  %v1445_v50 = vpop.f32.mrb[12].mxu1  ;;  %v1418_v52 = vpop.f32.mrb[13].mxu0 }
 0x120   :  { %v1860_v53 = vadd.f32 %v1418_v52, %v1417_v48  ;;  %v1446_v54 = vpop.f32.mrb[13].mxu1  ;;  %v1420_v55 = vpop.f32.mrb[14].mxu0 }
 0x121   :  { %v1862_v56 = vadd.f32 %v1446_v54, %v1445_v50  ;;  %v1448_v57 = vpop.f32.mrb[14].mxu1  ;;  %v1421_v58 = vpop.f32.mrb[15].mxu0 }
 0x122   :  { %v843_v59 = vadd.f32 %v1860_v53, %v842_v41  ;;  %v892_v60 = vmul.f32 %v1860_v53, %v1860_v53  ;;  %v1867_v61 = vadd.f32 %v1421_v58, %v1420_v55  ;;  %v1449_v62 = vpop.f32.mrb[15].mxu1 }
 0x123   :  { %v853_v63 = vadd.f32 %v1862_v56, %v852_v44  ;;  %v906_v0 = vmul.f32 %v1862_v56, %v1862_v56  ;;  %v1872_v1 = vadd.f32 %v1449_v62, %v1448_v57 }
 0x124   :  { %v895_v2 = vadd.f32 %v894_v46, %v892_v60  ;;  %v844_v3 = vadd.f32 %v1867_v61, %v843_v59  ;;  %v893_v4 = vmul.f32 %v1867_v61, %v1867_v61 }
 0x125   :  { %v909_v5 = vadd.f32 %v908_v49, %v906_v0  ;;  %v854_v6 = vadd.f32 %v1872_v1, %v853_v63  ;;  %v907_v7 = vmul.f32 %v1872_v1, %v1872_v1 }
 0x126   :  { %v845_v8 = vrot.slane %v844_v3, 4  ;;  %v896_v9 = vadd.f32 %v895_v2, %v893_v4 }
 0x127   :  { %v855_v10 = vrot.slane %v854_v6, 4  ;;  %v910_v11 = vadd.f32 %v909_v5, %v907_v7 }
 0x128   :  { %v846_v12 = vadd.f32 %v845_v8, %v844_v3  ;;  %v897_v13 = vrot.slane %v896_v9, 4 }
 0x129   :  { %v856_v14 = vadd.f32 %v855_v10, %v854_v6  ;;  %v911_v15 = vrot.slane %v910_v11, 4 }
 0x12a   :  { %v847_v16 = vrot.slane %v846_v12, 2  ;;  %v898_v17 = vadd.f32 %v897_v13, %v896_v9 }
 0x12b   :  { %v857_v18 = vrot.slane %v856_v14, 2  ;;  %v912_v21 = vadd.f32 %v911_v15, %v910_v11 }
 0x12c   :  { %v848_v24 = vadd.f32 %v847_v16, %v846_v12  ;;  %v899_v26 = vrot.slane %v898_v17, 2 }
 0x12d   :  { %v858_v27 = vadd.f32 %v857_v18, %v856_v14  ;;  %v913_v30 = vrot.slane %v912_v21, 2 }
 0x12e   :  { %v849_v31 = vrot.slane %v848_v24, 1  ;;  %v900_v33 = vadd.f32 %v899_v26, %v898_v17 }
 0x12f   :  { %v859_v34 = vrot.slane %v858_v27, 1  ;;  %v914_v36 = vadd.f32 %v913_v30, %v912_v21 }
 0x130   :  { %v850_v37 = vadd.f32 %v849_v31, %v848_v24  ;;  %v901_v40 = vrot.slane %v900_v33, 1 }
 0x131   :  { %v915_v41 = vrot.slane %v914_v36, 1  ;;  %v860_v45 = vadd.f32 %v859_v34, %v858_v27 }
 0x132   :  { %v851_v43 = vadd.f32 %v850_v37, %v1836_v20  ;;  %v902_v44 = vadd.f32 %v901_v40, %v900_v33 }
 0x133   :  { %v916_v49 = vadd.f32 %v915_v41, %v914_v36 }
 0x134   :  { %v903_v46 = vadd.f32 %v902_v44, %v1838_v23  ;;  %v861_v48 = vadd.f32 %v860_v45, %v851_v43 }
 0x136   :  { %v917_v50 = vadd.f32 %v916_v49, %v903_v46  ;;  %v918_v52 = vmul.f32 0.0078125, %v861_v48 }
 0x138   :  { %v919_v54 = vmul.f32 0.0078125, %v917_v50  ;;  %v920_v55 = vmul.f32 %v918_v52, %v918_v52  ;;  %v925_v57 = vsub.f32 %v1796_v19, %v918_v52  ;;  %v926_v58 = vsub.f32 %v1800_v25, %v918_v52 }
 0x139   :  { %v927_v59 = vsub.f32 %v1816_v39, %v918_v52  ;;  %v928_v60 = vsub.f32 %v1823_v47, %v918_v52  ;;  %v957_v20 = vsub.f32 %v1798_v22, %v918_v52  ;;  %v958_v62 = vsub.f32 %v1804_v28, %v918_v52 }
 0x13a   :  { %v921_v63 = vsub.f32 %v919_v54, %v920_v55  ;;  %v959_v23 = vsub.f32 %v1818_v42, %v918_v52  ;;  %v960_v0 = vsub.f32 %v1828_v51, %v918_v52  ;;  %v990_v2 = vsub.f32 %v1840_v29, %v918_v52 }
 0x13b   :  { %v991_v3 = vsub.f32 %v1844_v35, %v918_v52  ;;  %v992_v19 = vsub.f32 %v1860_v53, %v918_v52  ;;  %v993_v25 = vsub.f32 %v1867_v61, %v918_v52  ;;  %v1023_v39 = vsub.f32 %v1842_v32, %v918_v52 }
 0x13c   :  { %v922_v47 = vmax.f32 %v921_v63, 0.0  ;;  %v1024_v22 = vsub.f32 %v1848_v38, %v918_v52  ;;  %v1025_v28 = vsub.f32 %v1862_v56, %v918_v52  ;;  %v1026_v4 = vsub.f32 %v1872_v1, %v918_v52 }
 0x13e   :  { %v923_v42 = vadd.f32 1e-05, %v922_v47 }
 0x140   :  { %1539 = vrsqrt.f32 %v923_v42 }
 0x14a   :  { %v1540_v51 = vpop.eup %1539 }
 0x14b   :  { %v929_v5 = vmul.f32 %v1540_v51, %v925_v57  ;;  %v930_v29 = vmul.f32 %v1540_v51, %v926_v58  ;;  %v931_v6 = vmul.f32 %v1540_v51, %v927_v59  ;;  %v932_v35 = vmul.f32 %v1540_v51, %v928_v60 }
 0x14c   :  { %v961_v7 = vmul.f32 %v1540_v51, %v957_v20  ;;  %v962_v53 = vmul.f32 %v1540_v51, %v958_v62  ;;  %v963_v8 = vmul.f32 %v1540_v51, %v959_v23  ;;  %v964_v61 = vmul.f32 %v1540_v51, %v960_v0 }
 0x14d   :  { %v933_v9 = vmax.f32 %v929_v5, 0.0  ;;  %v934_v32 = vmax.f32 %v930_v29, 0.0  ;;  %v935_v10 = vmax.f32 %v931_v6, 0.0  ;;  %v936_v11 = vmax.f32 %v932_v35, 0.0 }
 0x14e   :  { %v965_v38 = vmax.f32 %v961_v7, 0.0  ;;  %v966_v12 = vmax.f32 %v962_v53, 0.0  ;;  %v967_v56 = vmax.f32 %v963_v8, 0.0  ;;  %v968_v13 = vmax.f32 %v964_v61, 0.0 }
 0x14f   :  { %v1295_v1 = vpack.c.bf16 %v934_v32, %v933_v9  ;;  %v1300_v14 = vpack.c.bf16 %v936_v11, %v935_v10  ;;  %v994_v15 = vmul.f32 %v1540_v51, %v990_v2  ;;  %v995_v16 = vmul.f32 %v1540_v51, %v991_v3 }
 0x150   :  { %v1305_v17 = vpack.c.bf16 %v966_v12, %v965_v38  ;;  %v1310_v18 = vpack.c.bf16 %v968_v13, %v967_v56  ;;  %v996_v21 = vmul.f32 %v1540_v51, %v992_v19  ;;  %v997_v24 = vmul.f32 %v1540_v51, %v993_v25 }
 0x151   :  { %1296 = vst [vmem:[%s1924_s2] sm:$0xff] %v1295_v1   ;;  %1332 = vst [vmem:[%s1924_s2 + $0x8] sm:$0xff] %v1300_v14   ;;  %v998_v26 = vmax.f32 %v994_v15, 0.0  ;;  %v999_v27 = vmax.f32 %v995_v16, 0.0  ;;  %v1027_v30 = vmul.f32 %v1540_v51, %v1023_v39  ;;  %v1028_v31 = vmul.f32 %v1540_v51, %v1024_v22 }
 0x152   :  { %1333 = vst [vmem:[%s1924_s2 + $0x10] sm:$0xff] %v1305_v17   ;;  %1334 = vst [vmem:[%s1924_s2 + $0x18] sm:$0xff] %v1310_v18   ;;  %v1000_v33 = vmax.f32 %v996_v21, 0.0  ;;  %v1001_v34 = vmax.f32 %v997_v24, 0.0  ;;  %v1029_v36 = vmul.f32 %v1540_v51, %v1025_v28  ;;  %v1030_v37 = vmul.f32 %v1540_v51, %v1026_v4 }
 0x153   :  { %v1315_v40 = vpack.c.bf16 %v999_v27, %v998_v26  ;;  %v1031_v41 = vmax.f32 %v1027_v30, 0.0  ;;  %v1032_v43 = vmax.f32 %v1028_v31, 0.0 }
 0x154   :  { %v1320_v44 = vpack.c.bf16 %v1001_v34, %v1000_v33  ;;  %v1033_v45 = vmax.f32 %v1029_v36, 0.0  ;;  %v1034_v46 = vmax.f32 %v1030_v37, 0.0 }
 0x155   :  { %1335 = vst [vmem:[%s1924_s2 + $0x20] sm:$0xff] %v1315_v40   ;;  %v1325_v48 = vpack.c.bf16 %v1032_v43, %v1031_v41 }
 0x156   :  { %1336 = vst [vmem:[%s1924_s2 + $0x28] sm:$0xff] %v1320_v44   ;;  %v1330_v49 = vpack.c.bf16 %v1034_v46, %v1033_v45 }
 0x157   :  { %1337 = vst [vmem:[%s1924_s2 + $0x30] sm:$0xff] %v1325_v48  }
 0x158   :  { %1338 = vst [vmem:[%s1924_s2 + $0x38] sm:$0xff] %v1330_v49  }

// kernel: unet_forward.15
= control target key start
LH: loop header
LB: loop body
LE: loop exit
PB: predicated region body
PF: predicated region fallthrough
CT: control target
= control target key end

     0   :  { %s4272_s1 = inlined_call_operand.vmem [shape: bf16[4,128,128], index: 1, kind: input, shape index: {}]   ;;  %s4273_s0 = inlined_call_operand.vmem [shape: bf16[4,128,128], index: 0, kind: input, shape index: {}]   ;;  %s4274_s2 = inlined_call_operand.vmem [shape: bf16[4,128,128], index: 2, kind: output, shape index: {}]  }
   0x1   :  { %v2787_v0 = vld [vmem:[%s4272_s1] sm:$0xff]   ;;  %v2789_v2 = vld [vmem:[%s4272_s1 + $0x8] sm:$0xff]   ;;  %v2791_v4 = vld [vmem:[%s4272_s1 + $0x10] sm:$0xff]  }
   0x2   :  { %v2788_v1 = vld [vmem:[%s4272_s1 + $0x40] sm:$0xff]   ;;  %2659 = vmatprep.subr.bf16.mxu0 %v2787_v0  ;;  %v2790_v3 = vld [vmem:[%s4272_s1 + $0x48] sm:$0xff]   ;;  %v2792_v5 = vld [vmem:[%s4272_s1 + $0x50] sm:$0xff]  }
   0x3   :  { %2691 = vmatprep.subr.bf16.mxu1 %v2788_v1  ;;  %2660 = vmatpush3.bf16.msra.mxu0 %v2787_v0  ;;  %v2793_v6 = vld [vmem:[%s4272_s1 + $0x18] sm:$0xff]   ;;  %v2795_v8 = vld [vmem:[%s4272_s1 + $0x20] sm:$0xff]   ;;  %v2797_v10 = vld [vmem:[%s4272_s1 + $0x28] sm:$0xff]  }
   0x4   :  { %2692 = vmatpush3.bf16.msra.mxu1 %v2788_v1  ;;  %2661 = vmatprep.subr.bf16.mxu0 %v2789_v2  ;;  %v2794_v7 = vld [vmem:[%s4272_s1 + $0x58] sm:$0xff]   ;;  %v2796_v9 = vld [vmem:[%s4272_s1 + $0x60] sm:$0xff]   ;;  %v2798_v11 = vld [vmem:[%s4272_s1 + $0x68] sm:$0xff]  }
   0x5   :  { %2693 = vmatprep.subr.bf16.mxu1 %v2790_v3  ;;  %v2803_v12 = vld [vmem:[%s4273_s0] sm:$0xff]   ;;  %v2799_v14 = vld [vmem:[%s4272_s1 + $0x30] sm:$0xff]   ;;  %v2801_v16 = vld [vmem:[%s4272_s1 + $0x38] sm:$0xff]  }
   0x6   :  { %v2804_v13 = vld [vmem:[%s4273_s0 + $0x40] sm:$0xff]   ;;  %2675 = vmatprep.mubr.bf16.mxu0 %v2803_v12  ;;  %v2800_v15 = vld [vmem:[%s4272_s1 + $0x70] sm:$0xff]   ;;  %v2802_v17 = vld [vmem:[%s4272_s1 + $0x78] sm:$0xff]  }
   0x7   :  { %2662 = vmatpush3.bf16.msra.mxu0 %v2789_v2  ;;  %2707 = vmatprep.mubr.bf16.mxu1 %v2804_v13  ;;  %v2805_v18 = vld [vmem:[%s4273_s0 + $0x8] sm:$0xff]   ;;  %v2807_v19 = vld [vmem:[%s4272_s1 + $0x80] sm:$0xff]   ;;  %v2811_v24 = vld [vmem:[%s4273_s0 + $0x10] sm:$0xff]  }
   0x8   :  { %2694 = vmatpush3.bf16.msra.mxu1 %v2790_v3  ;;  %2663 = vmatprep.subr.bf16.mxu0 %v2791_v4  ;;  %v2808_v20 = vld [vmem:[%s4272_s1 + $0xc0] sm:$0xff]   ;;  %v2806_v21 = vld [vmem:[%s4273_s0 + $0x48] sm:$0xff]   ;;  %v2812_v25 = vld [vmem:[%s4273_s0 + $0x50] sm:$0xff]  }
   0x9   :  { %2695 = vmatprep.subr.bf16.mxu1 %v2792_v5  ;;  %v2809_v22 = vld [vmem:[%s4272_s1 + $0x88] sm:$0xff]   ;;  %v2813_v26 = vld [vmem:[%s4273_s0 + $0x18] sm:$0xff]   ;;  %v2815_v27 = vld [vmem:[%s4272_s1 + $0x90] sm:$0xff]  }
   0xa   :  { %v2810_v23 = vld [vmem:[%s4272_s1 + $0xc8] sm:$0xff]   ;;  %v2816_v28 = vld [vmem:[%s4272_s1 + $0xd0] sm:$0xff]   ;;  %v2814_v29 = vld [vmem:[%s4273_s0 + $0x58] sm:$0xff]  }
   0xb   :  { %2664 = vmatpush3.bf16.msra.mxu0 %v2791_v4  ;;  %v2817_v30 = vld [vmem:[%s4272_s1 + $0x98] sm:$0xff]   ;;  %v2819_v32 = vld [vmem:[%s4273_s0 + $0x20] sm:$0xff]   ;;  %v2821_v34 = vld [vmem:[%s4273_s0 + $0x28] sm:$0xff]  }
   0xc   :  { %2696 = vmatpush3.bf16.msra.mxu1 %v2792_v5  ;;  %2665 = vmatprep.subr.bf16.mxu0 %v2793_v6  ;;  %v2818_v31 = vld [vmem:[%s4272_s1 + $0xd8] sm:$0xff]   ;;  %v2820_v33 = vld [vmem:[%s4273_s0 + $0x60] sm:$0xff]   ;;  %v2822_v37 = vld [vmem:[%s4273_s0 + $0x68] sm:$0xff]  }
   0xd   :  { %2697 = vmatprep.subr.bf16.mxu1 %v2794_v7  ;;  %v2823_v35 = vld [vmem:[%s4272_s1 + $0xa0] sm:$0xff]   ;;  %v2825_v38 = vld [vmem:[%s4272_s1 + $0xa8] sm:$0xff]   ;;  %v2827_v40 = vld [vmem:[%s4273_s0 + $0x30] sm:$0xff]  }
   0xe   :  { %v2824_v36 = vld [vmem:[%s4272_s1 + $0xe0] sm:$0xff]   ;;  %v2826_v39 = vld [vmem:[%s4272_s1 + $0xe8] sm:$0xff]   ;;  %v2828_v41 = vld [vmem:[%s4273_s0 + $0x70] sm:$0xff]  }
   0xf   :  { %2666 = vmatpush3.bf16.msra.mxu0 %v2793_v6  ;;  %v2829_v42 = vld [vmem:[%s4273_s0 + $0x38] sm:$0xff]   ;;  %v2831_v43 = vld [vmem:[%s4272_s1 + $0xb0] sm:$0xff]   ;;  %v2835_v48 = vld [vmem:[%s4273_s0 + $0x80] sm:$0xff]  }
  0x10   :  { %2698 = vmatpush3.bf16.msra.mxu1 %v2794_v7  ;;  %2667 = vmatprep.subr.bf16.mxu0 %v2795_v8  ;;  %v2832_v44 = vld [vmem:[%s4272_s1 + $0xf0] sm:$0xff]   ;;  %v2830_v45 = vld [vmem:[%s4273_s0 + $0x78] sm:$0xff]   ;;  %v2836_v49 = vld [vmem:[%s4273_s0 + $0xc0] sm:$0xff]  }
  0x11   :  { %2699 = vmatprep.subr.bf16.mxu1 %v2796_v9  ;;  %v2833_v46 = vld [vmem:[%s4272_s1 + $0xb8] sm:$0xff]   ;;  %v2837_v50 = vld [vmem:[%s4273_s0 + $0x88] sm:$0xff]   ;;  %v2839_v52 = vld [vmem:[%s4273_s0 + $0x90] sm:$0xff]  }
  0x12   :  { %v2834_v47 = vld [vmem:[%s4272_s1 + $0xf8] sm:$0xff]   ;;  %v2838_v51 = vld [vmem:[%s4273_s0 + $0xc8] sm:$0xff]   ;;  %v2840_v53 = vld [vmem:[%s4273_s0 + $0xd0] sm:$0xff]  }
  0x13   :  { %2668 = vmatpush3.bf16.msra.mxu0 %v2795_v8  ;;  %v2841_v54 = vld [vmem:[%s4273_s0 + $0x98] sm:$0xff]   ;;  %v2843_v56 = vld [vmem:[%s4273_s0 + $0xa0] sm:$0xff]   ;;  %v2845_v58 = vld [vmem:[%s4273_s0 + $0xa8] sm:$0xff]  }
  0x14   :  { %2700 = vmatpush3.bf16.msra.mxu1 %v2796_v9  ;;  %2669 = vmatprep.subr.bf16.mxu0 %v2797_v10  ;;  %v2842_v55 = vld [vmem:[%s4273_s0 + $0xd8] sm:$0xff]   ;;  %v2844_v57 = vld [vmem:[%s4273_s0 + $0xe0] sm:$0xff]   ;;  %v2846_v59 = vld [vmem:[%s4273_s0 + $0xe8] sm:$0xff]  }
  0x15   :  { %2701 = vmatprep.subr.bf16.mxu1 %v2798_v11  ;;  %v2847_v60 = vld [vmem:[%s4273_s0 + $0xb0] sm:$0xff]   ;;  %v2849_v62 = vld [vmem:[%s4273_s0 + $0xb8] sm:$0xff]  }
  0x16   :  { %v2848_v61 = vld [vmem:[%s4273_s0 + $0xf0] sm:$0xff]   ;;  %v2850_v63 = vld [vmem:[%s4273_s0 + $0xf8] sm:$0xff]  }
  0x17   :  { %2670 = vmatpush3.bf16.msra.mxu0 %v2797_v10 }
  0x18   :  { %2702 = vmatpush3.bf16.msra.mxu1 %v2798_v11  ;;  %2671 = vmatprep.subr.bf16.mxu0 %v2799_v14 }
  0x19   :  { %2703 = vmatprep.subr.bf16.mxu1 %v2800_v15 }
  0x1b   :  { %2672 = vmatpush3.bf16.msra.mxu0 %v2799_v14 }
  0x1c   :  { %2704 = vmatpush3.bf16.msra.mxu1 %v2800_v15  ;;  %2673 = vmatprep.subr.bf16.mxu0 %v2801_v16 }
  0x1d   :  { %2705 = vmatprep.subr.bf16.mxu1 %v2802_v17 }
  0x1f   :  { %2674 = vmatpush3.bf16.msra.mxu0 %v2801_v16 }
  0x20   :  { %2706 = vmatpush3.bf16.msra.mxu1 %v2802_v17  ;;  %2723 = vmatprep.subr.bf16.mxu0 %v2807_v19 }
  0x21   :  { %2755 = vmatprep.subr.bf16.mxu1 %v2808_v20 }
  0x22   :  { %2676 = vmatmul.mubr.bf16.vlgmr.msra.gmra.mrb[0].mxu0 %v2805_v18 }
  0x23   :  { %2708 = vmatmul.mubr.bf16.vlgmr.msra.gmra.mrb[0].mxu1 %v2806_v21  ;;  %2724 = vmatpush3.bf16.msra.mxu0 %v2807_v19 }
  0x24   :  { %2756 = vmatpush3.bf16.msra.mxu1 %v2808_v20  ;;  %2725 = vmatprep.subr.bf16.mxu0 %v2809_v22 }
  0x25   :  { %2757 = vmatprep.subr.bf16.mxu1 %v2810_v23  ;;  %2679 = vmatprep.mubr.bf16.mxu0 %v2811_v24 }
  0x26   :  { %2711 = vmatprep.mubr.bf16.mxu1 %v2812_v25 }
  0x27   :  { %2726 = vmatpush3.bf16.msra.mxu0 %v2809_v22 }
  0x28   :  { %2758 = vmatpush3.bf16.msra.mxu1 %v2810_v23  ;;  %2727 = vmatprep.subr.bf16.mxu0 %v2815_v27 }
  0x29   :  { %2759 = vmatprep.subr.bf16.mxu1 %v2816_v28 }
  0x2a   :  { %2680 = vmatmul.mubr.bf16.gmra.mrb[4].mxu0 %v2813_v26 }
  0x2b   :  { %2712 = vmatmul.mubr.bf16.gmra.mrb[4].mxu1 %v2814_v29  ;;  %2728 = vmatpush3.bf16.msra.mxu0 %v2815_v27 }
  0x2c   :  { %2760 = vmatpush3.bf16.msra.mxu1 %v2816_v28  ;;  %2729 = vmatprep.subr.bf16.mxu0 %v2817_v30 }
  0x2d   :  { %2761 = vmatprep.subr.bf16.mxu1 %v2818_v31  ;;  %2683 = vmatprep.mubr.bf16.mxu0 %v2819_v32 }
  0x2e   :  { %2715 = vmatprep.mubr.bf16.mxu1 %v2820_v33 }
  0x2f   :  { %2730 = vmatpush3.bf16.msra.mxu0 %v2817_v30 }
  0x30   :  { %2762 = vmatpush3.bf16.msra.mxu1 %v2818_v31  ;;  %2731 = vmatprep.subr.bf16.mxu0 %v2823_v35 }
  0x31   :  { %2763 = vmatprep.subr.bf16.mxu1 %v2824_v36 }
  0x32   :  { %2684 = vmatmul.mubr.bf16.gmra.mrb[8].mxu0 %v2821_v34 }
  0x33   :  { %2716 = vmatmul.mubr.bf16.gmra.mrb[8].mxu1 %v2822_v37  ;;  %2732 = vmatpush3.bf16.msra.mxu0 %v2823_v35 }
  0x34   :  { %2764 = vmatpush3.bf16.msra.mxu1 %v2824_v36  ;;  %2733 = vmatprep.subr.bf16.mxu0 %v2825_v38 }
  0x35   :  { %2765 = vmatprep.subr.bf16.mxu1 %v2826_v39  ;;  %2687 = vmatprep.mubr.bf16.mxu0 %v2827_v40 }
  0x36   :  { %2719 = vmatprep.mubr.bf16.mxu1 %v2828_v41 }
  0x37   :  { %2734 = vmatpush3.bf16.msra.mxu0 %v2825_v38 }
  0x38   :  { %2766 = vmatpush3.bf16.msra.mxu1 %v2826_v39  ;;  %2735 = vmatprep.subr.bf16.mxu0 %v2831_v43 }
  0x39   :  { %2767 = vmatprep.subr.bf16.mxu1 %v2832_v44 }
  0x3a   :  { %2688 = vmatmul.mubr.bf16.gmra.mrb[12].mxu0 %v2829_v42 }
  0x3b   :  { %2720 = vmatmul.mubr.bf16.gmra.mrb[12].mxu1 %v2830_v45  ;;  %2736 = vmatpush3.bf16.msra.mxu0 %v2831_v43 }
  0x3c   :  { %2768 = vmatpush3.bf16.msra.mxu1 %v2832_v44  ;;  %2737 = vmatprep.subr.bf16.mxu0 %v2833_v46 }
  0x3d   :  { %2769 = vmatprep.subr.bf16.mxu1 %v2834_v47  ;;  %2739 = vmatprep.mubr.bf16.mxu0 %v2835_v48 }
  0x3e   :  { %2771 = vmatprep.mubr.bf16.mxu1 %v2836_v49 }
  0x3f   :  { %2738 = vmatpush3.bf16.msra.mxu0 %v2833_v46 }
  0x40   :  { %2770 = vmatpush3.bf16.msra.mxu1 %v2834_v47 }
  0x42   :  { %2740 = vmatmul.mubr.bf16.vlgmr.msra.gmra.mrb[16].mxu0 %v2837_v50 }
  0x43   :  { %2772 = vmatmul.mubr.bf16.vlgmr.msra.gmra.mrb[16].mxu1 %v2838_v51  ;;  %2743 = vmatprep.mubr.bf16.mxu0 %v2839_v52 }
  0x44   :  { %2775 = vmatprep.mubr.bf16.mxu1 %v2840_v53 }
  0x4a   :  { %2744 = vmatmul.mubr.bf16.gmra.mrb[20].mxu0 %v2841_v54 }
  0x4b   :  { %2776 = vmatmul.mubr.bf16.gmra.mrb[20].mxu1 %v2842_v55  ;;  %2747 = vmatprep.mubr.bf16.mxu0 %v2843_v56 }
  0x4c   :  { %2779 = vmatprep.mubr.bf16.mxu1 %v2844_v57 }
  0x52   :  { %2748 = vmatmul.mubr.bf16.gmra.mrb[24].mxu0 %v2845_v58 }
  0x53   :  { %2780 = vmatmul.mubr.bf16.gmra.mrb[24].mxu1 %v2846_v59  ;;  %2751 = vmatprep.mubr.bf16.mxu0 %v2847_v60 }
  0x54   :  { %2783 = vmatprep.mubr.bf16.mxu1 %v2848_v61 }
  0x5a   :  { %2752 = vmatmul.mubr.bf16.gmra.mrb[28].mxu0 %v2849_v62 }
  0x5b   :  { %2784 = vmatmul.mubr.bf16.gmra.mrb[28].mxu1 %v2850_v63 }
  0xf5   :  { %v3316_v0 = vpop.f32.mrb[0].mxu0 }
  0xf6   :  { %v3318_v1 = vpop.f32.mrb[0].mxu1  ;;  %v3320_v2 = vpop.f32.mrb[1].mxu0  ;;  %v1008_v14 = vmul.f32 %v3316_v0, %v3316_v0 }
  0xf7   :  { %v3322_v3 = vpop.f32.mrb[1].mxu1  ;;  %v3324_v4 = vpop.f32.mrb[2].mxu0  ;;  %v1006_v8 = vmul.f32 %v3320_v2, %v3320_v2  ;;  %v1046_v17 = vmul.f32 %v3318_v1, %v3318_v1 }
  0xf8   :  { %v1044_v5 = vmul.f32 %v3322_v3, %v3322_v3  ;;  %v3328_v6 = vpop.f32.mrb[2].mxu1  ;;  %v3330_v7 = vpop.f32.mrb[3].mxu0  ;;  %v1009_v20 = vmul.f32 %v3324_v4, %v3324_v4 }
  0xf9   :  { %v918_v9 = vadd.f32 %v3330_v7, %v3320_v2  ;;  %v1007_v10 = vmul.f32 %v3330_v7, %v3330_v7  ;;  %v3338_v11 = vpop.f32.mrb[3].mxu1  ;;  %v1047_v24 = vmul.f32 %v3328_v6, %v3328_v6 }
  0xfa   :  { %v940_v12 = vadd.f32 %v3338_v11, %v3322_v3  ;;  %v1045_v13 = vmul.f32 %v3338_v11, %v3338_v11 }
  0xfb   :  { %v919_v15 = vadd.f32 %v3316_v0, %v918_v9  ;;  %v1022_v16 = vadd.f32 %v1007_v10, %v1006_v8 }
  0xfc   :  { %v941_v18 = vadd.f32 %v3318_v1, %v940_v12  ;;  %v1060_v19 = vadd.f32 %v1045_v13, %v1044_v5 }
  0xfd   :  { %v1023_v21 = vadd.f32 %v1022_v16, %v1008_v14  ;;  %v3352_v22 = vpop.f32.mrb[4].mxu0  ;;  %v920_v23 = vadd.f32 %v3324_v4, %v919_v15 }
  0xfe   :  { %v1061_v25 = vadd.f32 %v1060_v19, %v1046_v17  ;;  %v3357_v26 = vpop.f32.mrb[4].mxu1  ;;  %v3359_v27 = vpop.f32.mrb[5].mxu0  ;;  %v942_v28 = vadd.f32 %v3328_v6, %v941_v18  ;;  %v1012_v46 = vmul.f32 %v3352_v22, %v3352_v22 }
  0xff   :  { %v921_v29 = vadd.f32 %v920_v23, %v3359_v27  ;;  %v1010_v30 = vmul.f32 %v3359_v27, %v3359_v27  ;;  %v1024_v31 = vadd.f32 %v1023_v21, %v1009_v20  ;;  %v3365_v32 = vpop.f32.mrb[5].mxu1  ;;  %v3367_v33 = vpop.f32.mrb[6].mxu0  ;;  %v1050_v49 = vmul.f32 %v3357_v26, %v3357_v26 }
 0x100   :  { %v943_v34 = vadd.f32 %v942_v28, %v3365_v32  ;;  %v1048_v35 = vmul.f32 %v3365_v32, %v3365_v32  ;;  %v1062_v36 = vadd.f32 %v1061_v25, %v1047_v24  ;;  %v3372_v37 = vpop.f32.mrb[6].mxu1  ;;  %v3374_v38 = vpop.f32.mrb[7].mxu0  ;;  %v1013_v52 = vmul.f32 %v3367_v33, %v3367_v33 }
 0x101   :  { %v1025_v39 = vadd.f32 %v1024_v31, %v1010_v30  ;;  %v922_v40 = vadd.f32 %v921_v29, %v3374_v38  ;;  %v1011_v41 = vmul.f32 %v3374_v38, %v3374_v38  ;;  %v3379_v42 = vpop.f32.mrb[7].mxu1  ;;  %v1051_v56 = vmul.f32 %v3372_v37, %v3372_v37 }
 0x102   :  { %v1063_v43 = vadd.f32 %v1062_v36, %v1048_v35  ;;  %v944_v44 = vadd.f32 %v943_v34, %v3379_v42  ;;  %v1049_v45 = vmul.f32 %v3379_v42, %v3379_v42 }
 0x103   :  { %v923_v47 = vadd.f32 %v3352_v22, %v922_v40  ;;  %v1026_v48 = vadd.f32 %v1025_v39, %v1011_v41 }
 0x104   :  { %v945_v50 = vadd.f32 %v3357_v26, %v944_v44  ;;  %v1064_v51 = vadd.f32 %v1063_v43, %v1049_v45 }
 0x105   :  { %v1027_v53 = vadd.f32 %v1026_v48, %v1012_v46  ;;  %v3392_v54 = vpop.f32.mrb[8].mxu0  ;;  %v924_v55 = vadd.f32 %v3367_v33, %v923_v47 }
 0x106   :  { %v1065_v57 = vadd.f32 %v1064_v51, %v1050_v49  ;;  %v3397_v58 = vpop.f32.mrb[8].mxu1  ;;  %v3399_v59 = vpop.f32.mrb[9].mxu0  ;;  %v946_v60 = vadd.f32 %v3372_v37, %v945_v50  ;;  %v1016_v23 = vmul.f32 %v3392_v54, %v3392_v54 }
 0x107   :  { %v925_v61 = vadd.f32 %v924_v55, %v3399_v59  ;;  %v1014_v62 = vmul.f32 %v3399_v59, %v3399_v59  ;;  %v1028_v63 = vadd.f32 %v1027_v53, %v1013_v52  ;;  %v3405_v5 = vpop.f32.mrb[9].mxu1  ;;  %v3407_v8 = vpop.f32.mrb[10].mxu0  ;;  %v1054_v28 = vmul.f32 %v3397_v58, %v3397_v58 }
 0x108   :  { %v947_v9 = vadd.f32 %v946_v60, %v3405_v5  ;;  %v1052_v10 = vmul.f32 %v3405_v5, %v3405_v5  ;;  %v1066_v12 = vadd.f32 %v1065_v57, %v1051_v56  ;;  %v3412_v13 = vpop.f32.mrb[10].mxu1  ;;  %v3414_v14 = vpop.f32.mrb[11].mxu0  ;;  %v1017_v31 = vmul.f32 %v3407_v8, %v3407_v8 }
 0x109   :  { %v1029_v15 = vadd.f32 %v1028_v63, %v1014_v62  ;;  %v926_v16 = vadd.f32 %v925_v61, %v3414_v14  ;;  %v1015_v17 = vmul.f32 %v3414_v14, %v3414_v14  ;;  %v3419_v18 = vpop.f32.mrb[11].mxu1  ;;  %v1055_v39 = vmul.f32 %v3412_v13, %v3412_v13 }
 0x10a   :  { %v1067_v19 = vadd.f32 %v1066_v12, %v1052_v10  ;;  %v948_v20 = vadd.f32 %v947_v9, %v3419_v18  ;;  %v1053_v21 = vmul.f32 %v3419_v18, %v3419_v18 }
 0x10b   :  { %v927_v24 = vadd.f32 %v3392_v54, %v926_v16  ;;  %v1030_v25 = vadd.f32 %v1029_v15, %v1015_v17 }
 0x10c   :  { %v949_v29 = vadd.f32 %v3397_v58, %v948_v20  ;;  %v1068_v30 = vadd.f32 %v1067_v19, %v1053_v21 }
 0x10d   :  { %v1031_v34 = vadd.f32 %v1030_v25, %v1016_v23  ;;  %v3432_v35 = vpop.f32.mrb[12].mxu0  ;;  %v928_v36 = vadd.f32 %v3407_v8, %v927_v24 }
 0x10e   :  { %v1069_v40 = vadd.f32 %v1068_v30, %v1054_v28  ;;  %v3437_v41 = vpop.f32.mrb[12].mxu1  ;;  %v3439_v43 = vpop.f32.mrb[13].mxu0  ;;  %v950_v44 = vadd.f32 %v3412_v13, %v949_v29  ;;  %v1020_v10 = vmul.f32 %v3432_v35, %v3432_v35 }
 0x10f   :  { %4334 = vst [vmem:[#allocation2_spill] sm:$0xff] %v3437_v41  ;;  %v929_v45 = vadd.f32 %v928_v36, %v3439_v43  ;;  %v1018_v46 = vmul.f32 %v3439_v43, %v3439_v43  ;;  %v1032_v47 = vadd.f32 %v1031_v34, %v1017_v31  ;;  %v3445_v48 = vpop.f32.mrb[13].mxu1  ;;  %v3447_v49 = vpop.f32.mrb[14].mxu0  ;;  %v1058_v16 = vmul.f32 %v3437_v41, %v3437_v41 }
 0x110   :  { %v951_v50 = vadd.f32 %v950_v44, %v3445_v48  ;;  %v1056_v51 = vmul.f32 %v3445_v48, %v3445_v48  ;;  %v1070_v52 = vadd.f32 %v1069_v40, %v1055_v39  ;;  %v3452_v53 = vpop.f32.mrb[14].mxu1  ;;  %v3454_v55 = vpop.f32.mrb[15].mxu0  ;;  %v1021_v20 = vmul.f32 %v3447_v49, %v3447_v49 }
 0x111   :  { %4335 = vst [vmem:[#allocation3_spill] sm:$0xff] %v3452_v53  ;;  %v1033_v56 = vadd.f32 %v1032_v47, %v1018_v46  ;;  %v930_v57 = vadd.f32 %v929_v45, %v3454_v55  ;;  %v1019_v60 = vmul.f32 %v3454_v55, %v3454_v55  ;;  %v3459_v61 = vpop.f32.mrb[15].mxu1  ;;  %v1059_v25 = vmul.f32 %v3452_v53, %v3452_v53 }
 0x112   :  { %v1071_v62 = vadd.f32 %v1070_v52, %v1056_v51  ;;  %v952_v63 = vadd.f32 %v951_v50, %v3459_v61  ;;  %v1057_v9 = vmul.f32 %v3459_v61, %v3459_v61 }
 0x113   :  { %v931_v12 = vadd.f32 %v3432_v35, %v930_v57  ;;  %v1034_v15 = vadd.f32 %v1033_v56, %v1019_v60 }
 0x114   :  { %v953_v17 = vadd.f32 %v3437_v41, %v952_v63  ;;  %v1072_v19 = vadd.f32 %v1071_v62, %v1057_v9 }
 0x115   :  { %v932_v21 = vadd.f32 %v3447_v49, %v931_v12  ;;  %v1035_v23 = vadd.f32 %v1034_v15, %v1020_v10  ;;  %v3473_v24 = vpop.f32.mrb[16].mxu0 }
 0x116   :  { %4336 = vst [vmem:[#allocation4_spill] sm:$0xff] %v3473_v24  ;;  %v954_v28 = vadd.f32 %v3452_v53, %v953_v17  ;;  %v1073_v29 = vadd.f32 %v1072_v19, %v1058_v16  ;;  %v3478_v30 = vpop.f32.mrb[16].mxu1  ;;  %v3480_v31 = vpop.f32.mrb[17].mxu0  ;;  %v1084_v39 = vmul.f32 %v3473_v24, %v3473_v24 }
 0x117   :  { %4337 = vst [vmem:[#allocation5_spill] sm:$0xff] %v3478_v30  ;;  %4338 = vst [vmem:[#allocation6_spill] sm:$0xff] %v3480_v31  ;;  %v933_v34 = vrot.slane %v932_v21, 4  ;;  %v1036_v36 = vadd.f32 %v1035_v23, %v1021_v20  ;;  %v3484_v40 = vpop.f32.mrb[17].mxu1  ;;  %v3486_v44 = vpop.f32.mrb[18].mxu0  ;;  %v1122_v47 = vmul.f32 %v3478_v30, %v3478_v30  ;;  %v1082_v50 = vmul.f32 %v3480_v31, %v3480_v31 }
 0x118   :  { %4339 = vst [vmem:[#allocation7_spill] sm:$0xff] %v3484_v40  ;;  %4340 = vst [vmem:[#allocation8_spill] sm:$0xff] %v3486_v44  ;;  %v955_v45 = vrot.slane %v954_v28, 4  ;;  %v1074_v46 = vadd.f32 %v1073_v29, %v1059_v25  ;;  %v3492_v51 = vpop.f32.mrb[18].mxu1  ;;  %v3494_v52 = vpop.f32.mrb[19].mxu0  ;;  %v1120_v60 = vmul.f32 %v3484_v40, %v3484_v40 }
 0x119   :  { %4341 = vst [vmem:[#allocation9_spill] sm:$0xff] %v3492_v51  ;;  %4342 = vst [vmem:[#allocation10_spill] sm:$0xff] %v3494_v52  ;;  %v934_v56 = vadd.f32 %v933_v34, %v932_v21  ;;  %v1037_v57 = vrot.slane %v1036_v36, 4  ;;  %v962_v62 = vadd.f32 %v3494_v52, %v3480_v31  ;;  %v3500_v63 = vpop.f32.mrb[19].mxu1  ;;  %v1083_v12 = vmul.f32 %v3494_v52, %v3494_v52 }
 0x11a   :  { %4343 = vst [vmem:[#allocation11_spill] sm:$0xff] %v3500_v63  ;;  %v956_v9 = vadd.f32 %v955_v45, %v954_v28  ;;  %v1075_v10 = vrot.slane %v1074_v46, 4  ;;  %v984_v15 = vadd.f32 %v3500_v63, %v3484_v40  ;;  %v1121_v20 = vmul.f32 %v3500_v63, %v3500_v63 }
 0x11b   :  { %v935_v16 = vrot.slane %v934_v56, 2  ;;  %v1038_v17 = vadd.f32 %v1037_v57, %v1036_v36  ;;  %v963_v19 = vadd.f32 %v3473_v24, %v962_v62  ;;  %v1098_v25 = vadd.f32 %v1083_v12, %v1082_v50 }
 0x11c   :  { %v957_v21 = vrot.slane %v956_v9, 2  ;;  %v1076_v23 = vadd.f32 %v1075_v10, %v1074_v46  ;;  %v985_v29 = vadd.f32 %v3478_v30, %v984_v15  ;;  %v1136_v45 = vadd.f32 %v1121_v20, %v1120_v60 }
 0x11d   :  { %v936_v28 = vadd.f32 %v935_v16, %v934_v56  ;;  %v1039_v34 = vrot.slane %v1038_v17, 2  ;;  %v3510_v31 = vpop.f32.mrb[20].mxu0  ;;  %v964_v52 = vadd.f32 %v3486_v44, %v963_v19  ;;  %v1085_v36 = vmul.f32 %v3486_v44, %v3486_v44 }
 0x11e   :  { %v958_v40 = vadd.f32 %v957_v21, %v956_v9  ;;  %v1077_v53 = vrot.slane %v1076_v23, 2  ;;  %v1099_v57 = vadd.f32 %v1098_v25, %v1084_v39  ;;  %v3515_v62 = vpop.f32.mrb[20].mxu1  ;;  %v3517_v63 = vpop.f32.mrb[21].mxu0  ;;  %v1123_v56 = vmul.f32 %v3492_v51, %v3492_v51 }
 0x11f   :  { %4344 = vst [vmem:[#allocation12_spill] sm:$0xff] %v3515_v62  ;;  %4345 = vst [vmem:[#allocation13_spill] sm:$0xff] %v3517_v63  ;;  %v937_v46 = vrot.slane %v936_v28, 1  ;;  %v1040_v50 = vadd.f32 %v1039_v34, %v1038_v17  ;;  %v1137_v60 = vadd.f32 %v1136_v45, %v1122_v47  ;;  %v3521_v10 = vpop.f32.mrb[21].mxu1  ;;  %v3523_v12 = vpop.f32.mrb[22].mxu0  ;;  %v965_v16 = vadd.f32 %v964_v52, %v3517_v63 }
 0x120   :  { %4346 = vst [vmem:[#allocation14_spill] sm:$0xff] %v3521_v10  ;;  %4347 = vst [vmem:[#allocation15_spill] sm:$0xff] %v3523_v12  ;;  %v959_v9 = vrot.slane %v958_v40, 1  ;;  %v1078_v15 = vadd.f32 %v1077_v53, %v1076_v23  ;;  %v1086_v39 = vmul.f32 %v3517_v63, %v3517_v63  ;;  %v3528_v19 = vpop.f32.mrb[22].mxu1  ;;  %v3530_v20 = vpop.f32.mrb[23].mxu0  ;;  %v1100_v25 = vadd.f32 %v1099_v57, %v1085_v36 }
 0x121   :  { %4348 = vst [vmem:[#allocation16_spill] sm:$0xff] %v3528_v19  ;;  %v938_v17 = vadd.f32 %v937_v46, %v936_v28  ;;  %v1041_v21 = vrot.slane %v1040_v50, 1  ;;  %v986_v47 = vadd.f32 %v3492_v51, %v985_v29  ;;  %v3533_v34 = vpop.f32.mrb[23].mxu1  ;;  %v1124_v53 = vmul.f32 %v3521_v10, %v3521_v10 }
 0x122   :  { %4349 = vst [vmem:[#allocation17_spill] sm:$0xff] %v3533_v34  ;;  %v960_v45 = vadd.f32 %v959_v9, %v958_v40  ;;  %v1079_v30 = vrot.slane %v1078_v15, 1  ;;  %v1138_v52 = vadd.f32 %v1137_v60, %v1123_v56  ;;  %v1101_v44 = vadd.f32 %v1100_v25, %v1086_v39 }
 0x123   :  { %v1042_v23 = vadd.f32 %v1041_v21, %v1040_v50  ;;  %v987_v63 = vadd.f32 %v986_v47, %v3521_v10  ;;  %v966_v36 = vadd.f32 %v965_v16, %v3530_v20  ;;  %v1087_v29 = vmul.f32 %v3530_v20, %v3530_v20 }
 0x124   :  { %v3538_v24 = vadd.f32 %v960_v45, %v938_v17  ;;  %v1080_v41 = vadd.f32 %v1079_v30, %v1078_v15  ;;  %v1139_v28 = vadd.f32 %v1138_v52, %v1124_v53  ;;  %v1125_v57 = vmul.f32 %v3533_v34, %v3533_v34 }
 0x125   :  { %v988_v40 = vadd.f32 %v987_v63, %v3533_v34  ;;  %v3546_v46 = vpop.f32.mrb[24].mxu0  ;;  %v1088_v56 = vmul.f32 %v3510_v31, %v3510_v31  ;;  %v1126_v30 = vmul.f32 %v3515_v62, %v3515_v62  ;;  %v967_v15 = vadd.f32 %v3510_v31, %v966_v36 }
 0x126   :  { %4350 = vst [vmem:[#allocation18_spill] sm:$0xff] %v3546_v46  ;;  %v3548_v50 = vadd.f32 %v1080_v41, %v1042_v23  ;;  %v3554_v60 = vpop.f32.mrb[24].mxu1  ;;  %v3556_v9 = vpop.f32.mrb[25].mxu0  ;;  %v1102_v63 = vadd.f32 %v1101_v44, %v1087_v29  ;;  %v1140_v39 = vadd.f32 %v1139_v28, %v1125_v57  ;;  %v1089_v21 = vmul.f32 %v3523_v12, %v3523_v12 }
 0x127   :  { %4351 = vst [vmem:[#allocation19_spill] sm:$0xff] %v3554_v60  ;;  %4352 = vst [vmem:[#allocation20_spill] sm:$0xff] %v3556_v9  ;;  %v989_v16 = vadd.f32 %v3515_v62, %v988_v40  ;;  %v3560_v17 = vpop.f32.mrb[25].mxu1  ;;  %v3562_v41 = vpop.f32.mrb[26].mxu0  ;;  %v1127_v25 = vmul.f32 %v3528_v19, %v3528_v19  ;;  %v1090_v47 = vmul.f32 %v3556_v9, %v3556_v9 }
 0x128   :  { %4353 = vst [vmem:[#allocation21_spill] sm:$0xff] %v3560_v17  ;;  %4354 = vst [vmem:[#allocation22_spill] sm:$0xff] %v3562_v41  ;;  %v1128_v45 = vmul.f32 %v3560_v17, %v3560_v17  ;;  %v3572_v44 = vpop.f32.mrb[26].mxu1  ;;  %v3574_v53 = vpop.f32.mrb[27].mxu0  ;;  %v1103_v52 = vadd.f32 %v1102_v63, %v1088_v56  ;;  %v1141_v23 = vadd.f32 %v1140_v39, %v1126_v30 }
 0x129   :  { %4355 = vst [vmem:[#allocation23_spill] sm:$0xff] %v3572_v44  ;;  %4356 = vst [vmem:[#allocation24_spill] sm:$0xff] %v3574_v53  ;;  %v968_v28 = vadd.f32 %v3523_v12, %v967_v15  ;;  %v990_v36 = vadd.f32 %v3528_v19, %v989_v16  ;;  %v3578_v29 = vpop.f32.mrb[27].mxu1  ;;  %v1091_v40 = vmul.f32 %v3574_v53, %v3574_v53 }
 0x12a   :  { %4357 = vst [vmem:[#allocation25_spill] sm:$0xff] %v3578_v29  ;;  %v1129_v57 = vmul.f32 %v3578_v29, %v3578_v29  ;;  %v1104_v34 = vadd.f32 %v1103_v52, %v1089_v21  ;;  %v1142_v51 = vadd.f32 %v1141_v23, %v1127_v25  ;;  %v1092_v39 = vmul.f32 %v3546_v46, %v3546_v46 }
 0x12b   :  { %v969_v62 = vadd.f32 %v968_v28, %v3556_v9  ;;  %v991_v10 = vadd.f32 %v990_v36, %v3560_v17  ;;  %v1130_v19 = vmul.f32 %v3554_v60, %v3554_v60  ;;  %v1131_v52 = vmul.f32 %v3572_v44, %v3572_v44 }
 0x12c   :  { %v1105_v56 = vadd.f32 %v1104_v34, %v1090_v47  ;;  %v1143_v30 = vadd.f32 %v1142_v51, %v1128_v45  ;;  %v1093_v45 = vmul.f32 %v3562_v41, %v3562_v41 }
 0x12d   :  { %v970_v15 = vadd.f32 %v969_v62, %v3574_v53  ;;  %v992_v63 = vadd.f32 %v991_v10, %v3578_v29  ;;  %v3588_v16 = vpop.f32.mrb[28].mxu0 }
 0x12e   :  { %4358 = vst [vmem:[#allocation26_spill] sm:$0xff] %v3588_v16  ;;  %v3594_v12 = vpop.f32.mrb[28].mxu1  ;;  %v3596_v21 = vpop.f32.mrb[29].mxu0  ;;  %v1106_v34 = vadd.f32 %v1105_v56, %v1091_v40  ;;  %v1144_v62 = vadd.f32 %v1143_v30, %v1129_v57 }
 0x12f   :  { %4359 = vst [vmem:[#allocation27_spill] sm:$0xff] %v3594_v12  ;;  %v971_v25 = vadd.f32 %v3546_v46, %v970_v15  ;;  %v993_v51 = vadd.f32 %v3554_v60, %v992_v63  ;;  %v3600_v47 = vpop.f32.mrb[29].mxu1  ;;  %v3602_v10 = vpop.f32.mrb[30].mxu0  ;;  %v1094_v23 = vmul.f32 %v3596_v21, %v3596_v21 }
 0x130   :  { %4360 = vst [vmem:[#allocation28_spill] sm:$0xff] %v3600_v47  ;;  %v1132_v28 = vmul.f32 %v3600_v47, %v3600_v47  ;;  %v3612_v36 = vpop.f32.mrb[30].mxu1  ;;  %v3614_v40 = vpop.f32.mrb[31].mxu0  ;;  %v1107_v57 = vadd.f32 %v1106_v34, %v1092_v39  ;;  %v1145_v56 = vadd.f32 %v1144_v62, %v1130_v19  ;;  %v1134_v62 = vmul.f32 %v3594_v12, %v3594_v12 }
 0x131   :  { %4361 = vst [vmem:[#allocation29_spill] sm:$0xff] %v3612_v36  ;;  %4362 = vst [vmem:[#allocation30_spill] sm:$0xff] %v3614_v40  ;;  %v972_v30 = vadd.f32 %v3562_v41, %v971_v25  ;;  %v994_v15 = vadd.f32 %v3572_v44, %v993_v51  ;;  %v3618_v63 = vpop.f32.mrb[31].mxu1  ;;  %v1095_v60 = vmul.f32 %v3614_v40, %v3614_v40 }
 0x132   :  { %4363 = vst [vmem:[#allocation31_spill] sm:$0xff] %v3618_v63  ;;  %v1133_v29 = vmul.f32 %v3618_v63, %v3618_v63  ;;  %v1108_v46 = vadd.f32 %v1107_v57, %v1093_v45  ;;  %v1146_v9 = vadd.f32 %v1145_v56, %v1131_v52  ;;  %v1096_v51 = vmul.f32 %v3588_v16, %v3588_v16 }
 0x133   :  { %v973_v17 = vadd.f32 %v972_v30, %v3596_v21  ;;  %v995_v53 = vadd.f32 %v994_v15, %v3600_v47 }
 0x134   :  { %v1109_v39 = vadd.f32 %v1108_v46, %v1094_v23  ;;  %v1147_v19 = vadd.f32 %v1146_v9, %v1132_v28  ;;  %v1097_v46 = vmul.f32 %v3602_v10, %v3602_v10  ;;  %v1135_v9 = vmul.f32 %v3612_v36, %v3612_v36 }
 0x135   :  { %v974_v25 = vadd.f32 %v973_v17, %v3614_v40  ;;  %v996_v34 = vadd.f32 %v995_v53, %v3618_v63 }
 0x136   :  { %v1110_v41 = vadd.f32 %v1109_v39, %v1095_v60  ;;  %v1148_v57 = vadd.f32 %v1147_v19, %v1133_v29 }
 0x137   :  { %v975_v44 = vadd.f32 %v3588_v16, %v974_v25  ;;  %v997_v45 = vadd.f32 %v3594_v12, %v996_v34 }
 0x138   :  { %v1111_v53 = vadd.f32 %v1110_v41, %v1096_v51  ;;  %v1149_v23 = vadd.f32 %v1148_v57, %v1134_v62 }
 0x139   :  { %v976_v17 = vadd.f32 %v3602_v10, %v975_v44  ;;  %v998_v52 = vadd.f32 %v3612_v36, %v997_v45 }
 0x13a   :  { %v1112_v56 = vadd.f32 %v1111_v53, %v1097_v46  ;;  %v1150_v15 = vadd.f32 %v1149_v23, %v1135_v9 }
 0x13b   :  { %v977_v28 = vrot.slane %v976_v17, 4  ;;  %v999_v30 = vrot.slane %v998_v52, 4 }
 0x13c   :  { %v1113_v39 = vrot.slane %v1112_v56, 4  ;;  %v1151_v29 = vrot.slane %v1150_v15, 4 }
 0x13d   :  { %v978_v60 = vadd.f32 %v977_v28, %v976_v17  ;;  %v1000_v25 = vadd.f32 %v999_v30, %v998_v52 }
 0x13e   :  { %v1114_v34 = vadd.f32 %v1113_v39, %v1112_v56  ;;  %v1152_v63 = vadd.f32 %v1151_v29, %v1150_v15 }
 0x13f   :  { %v979_v19 = vrot.slane %v978_v60, 2  ;;  %v1001_v12 = vrot.slane %v1000_v25, 2 }
 0x140   :  { %v1115_v16 = vrot.slane %v1114_v34, 2  ;;  %v1153_v44 = vrot.slane %v1152_v63, 2 }
 0x141   :  { %v980_v47 = vadd.f32 %v979_v19, %v978_v60  ;;  %v1002_v40 = vadd.f32 %v1001_v12, %v1000_v25 }
 0x142   :  { %v1116_v51 = vadd.f32 %v1115_v16, %v1114_v34  ;;  %v1154_v62 = vadd.f32 %v1153_v44, %v1152_v63 }
 0x143   :  { %v981_v41 = vrot.slane %v980_v47, 1  ;;  %v1003_v45 = vrot.slane %v1002_v40, 1 }
 0x144   :  { %v1117_v46 = vrot.slane %v1116_v51, 1  ;;  %v1155_v53 = vrot.slane %v1154_v62, 1 }
 0x145   :  { %v982_v57 = vadd.f32 %v981_v41, %v980_v47  ;;  %v1004_v52 = vadd.f32 %v1003_v45, %v1002_v40  ;;  %v4387_v40 = vld [vmem:[#allocation25_spill] sm:$0xff] }
 0x146   :  { %v1118_v17 = vadd.f32 %v1117_v46, %v1116_v51  ;;  %v1156_v56 = vadd.f32 %v1155_v53, %v1154_v62  ;;  %v4373_v53 = vld [vmem:[#allocation24_spill] sm:$0xff]  ;;  %v4374_v46 = vld [vmem:[#allocation18_spill] sm:$0xff] }
 0x147   :  { %v983_v9 = vadd.f32 %v982_v57, %v3538_v24  ;;  %v4375_v57 = vld [vmem:[#allocation22_spill] sm:$0xff]  ;;  %v4389_v24 = vld [vmem:[#allocation23_spill] sm:$0xff] }
 0x148   :  { %v1119_v23 = vadd.f32 %v1118_v17, %v3548_v50  ;;  %v4376_v17 = vld [vmem:[#allocation30_spill] sm:$0xff]  ;;  %v4388_v50 = vld [vmem:[#allocation19_spill] sm:$0xff] }
 0x149   :  { %v1005_v28 = vadd.f32 %v1004_v52, %v983_v9  ;;  %v4371_v9 = vld [vmem:[#allocation15_spill] sm:$0xff]  ;;  %v4377_v62 = vld [vmem:[#allocation26_spill] sm:$0xff] }
 0x14a   :  { %v1157_v30 = vadd.f32 %v1156_v56, %v1119_v23  ;;  %v4369_v56 = vld [vmem:[#allocation8_spill] sm:$0xff] }
 0x14b   :  { %v3642_v15 = vmul.f32 0.001953125, %v1005_v28  ;;  %v4368_v28 = vld [vmem:[#allocation4_spill] sm:$0xff] }
 0x14c   :  { %v1159_v12 = vmul.f32 0.001953125, %v1157_v30  ;;  %v4370_v30 = vld [vmem:[#allocation13_spill] sm:$0xff] }
 0x14d   :  { %v1160_v16 = vmul.f32 %v3642_v15, %v3642_v15  ;;  %v4393_v52 = vsub.f32 %v3320_v2, %v3642_v15  ;;  %v4394_v19 = vsub.f32 %v3330_v7, %v3642_v15  ;;  %v4395_v51 = vsub.f32 %v3316_v0, %v3642_v15 }
 0x14e   :  { %v4396_v44 = vsub.f32 %v3324_v4, %v3642_v15  ;;  %v4397_v2 = vsub.f32 %v3359_v27, %v3642_v15  ;;  %v4398_v7 = vsub.f32 %v3374_v38, %v3642_v15  ;;  %v4399_v0 = vsub.f32 %v3352_v22, %v3642_v15 }
 0x14f   :  { %v1161_v39 = vsub.f32 %v1159_v12, %v1160_v16  ;;  %v4364_v12 = vld [vmem:[#allocation2_spill] sm:$0xff]  ;;  %v4365_v16 = vld [vmem:[#allocation3_spill] sm:$0xff]  ;;  %v4400_v4 = vsub.f32 %v3367_v33, %v3642_v15  ;;  %v4401_v27 = vsub.f32 %v3399_v59, %v3642_v15  ;;  %v4402_v38 = vsub.f32 %v3414_v14, %v3642_v15 }
 0x150   :  { %v4403_v22 = vsub.f32 %v3392_v54, %v3642_v15  ;;  %v4404_v33 = vsub.f32 %v3407_v8, %v3642_v15  ;;  %v4405_v59 = vsub.f32 %v3439_v43, %v3642_v15  ;;  %v4406_v14 = vsub.f32 %v3454_v55, %v3642_v15 }
 0x151   :  { %v1162_v45 = vmax.f32 %v1161_v39, 0.0  ;;  %v4366_v39 = vld [vmem:[#allocation6_spill] sm:$0xff]  ;;  %v4407_v54 = vsub.f32 %v3432_v35, %v3642_v15  ;;  %v4408_v8 = vsub.f32 %v3447_v49, %v3642_v15  ;;  %v4410_v35 = vsub.f32 %v3338_v11, %v3642_v15 }
 0x153   :  { %v1163_v23 = vadd.f32 1e-05, %v1162_v45  ;;  %v4372_v45 = vld [vmem:[#allocation20_spill] sm:$0xff] }
 0x155   :  { %2851 = vrsqrt.f32 %v1163_v23  ;;  %v4367_v23 = vld [vmem:[#allocation10_spill] sm:$0xff] }
 0x15f   :  { %v3774_v60 = vpop.eup %2851 }
 0x160   :  { %v1181_v34 = vmul.f32 %v3774_v60, %v4393_v52  ;;  %v1182_v29 = vmul.f32 %v3774_v60, %v4394_v19  ;;  %v1183_v25 = vmul.f32 %v3774_v60, %v4395_v51  ;;  %v1184_v36 = vmul.f32 %v3774_v60, %v4396_v44 }
 0x161   :  { %v1185_v52 = vmul.f32 %v3774_v60, %v4397_v2  ;;  %v1186_v19 = vmul.f32 %v3774_v60, %v4398_v7  ;;  %v1187_v51 = vmul.f32 %v3774_v60, %v4399_v0  ;;  %v1188_v44 = vmul.f32 %v3774_v60, %v4400_v4 }
 0x162   :  { %v1189_v2 = vmul.f32 %v3774_v60, %v4401_v27  ;;  %v1190_v7 = vmul.f32 %v3774_v60, %v4402_v38  ;;  %v1191_v0 = vmul.f32 %v3774_v60, %v4403_v22  ;;  %v1192_v4 = vmul.f32 %v3774_v60, %v4404_v33 }
 0x163   :  { %v1193_v27 = vmul.f32 %v3774_v60, %v4405_v59  ;;  %v1194_v38 = vmul.f32 %v3774_v60, %v4406_v14  ;;  %v1195_v22 = vmul.f32 %v3774_v60, %v4407_v54  ;;  %v1196_v33 = vmul.f32 %v3774_v60, %v4408_v8 }
 0x164   :  { %v2164_v41 = vmul.f32 -1.442695, %v1181_v34  ;;  %v2165_v47 = vmul.f32 -1.442695, %v1182_v29  ;;  %v2166_v43 = vmul.f32 -1.442695, %v1183_v25  ;;  %v4409_v59 = vsub.f32 %v3322_v3, %v3642_v15 }
 0x165   :  { %v2167_v14 = vmul.f32 -1.442695, %v1184_v36  ;;  %v3850_v54 = vmul.f32 %v3774_v60, %v4410_v35  ;;  %v2168_v49 = vmul.f32 -1.442695, %v1185_v52  ;;  %v2169_v8 = vmul.f32 -1.442695, %v1186_v19 }
 0x166   :  { %v3844_v55 = vmul.f32 %v3774_v60, %v4409_v59  ;;  %2853 = vpow2.f32 %v2164_v41  ;;  %v2170_v34 = vmul.f32 -1.442695, %v1187_v51  ;;  %v2171_v29 = vmul.f32 -1.442695, %v1188_v44 }
 0x167   :  { %2855 = vpow2.f32 %v2165_v47  ;;  %v2172_v25 = vmul.f32 -1.442695, %v1189_v2  ;;  %v2173_v63 = vmul.f32 -1.442695, %v1190_v7  ;;  %v2174_v3 = vmul.f32 -1.442695, %v1191_v0 }
 0x168   :  { %2857 = vpow2.f32 %v2166_v43  ;;  %v2175_v59 = vmul.f32 -1.442695, %v1192_v4  ;;  %v4411_v36 = vsub.f32 %v3318_v1, %v3642_v15  ;;  %v4412_v41 = vsub.f32 %v3328_v6, %v3642_v15 }
 0x169   :  { %2859 = vpow2.f32 %v2167_v14  ;;  %v4413_v52 = vsub.f32 %v3365_v32, %v3642_v15  ;;  %v4414_v51 = vsub.f32 %v3379_v42, %v3642_v15  ;;  %v4415_v44 = vsub.f32 %v3357_v26, %v3642_v15 }
 0x16a   :  { %v3856_v11 = vmul.f32 %v3774_v60, %v4411_v36  ;;  %v3862_v47 = vmul.f32 %v3774_v60, %v4412_v41  ;;  %2861 = vpow2.f32 %v2168_v49  ;;  %v4416_v2 = vsub.f32 %v3372_v37, %v3642_v15 }
 0x16b   :  { %v3868_v19 = vmul.f32 %v3774_v60, %v4413_v52  ;;  %v3874_v1 = vmul.f32 %v3774_v60, %v4414_v51  ;;  %v3880_v6 = vmul.f32 %v3774_v60, %v4415_v44  ;;  %2863 = vpow2.f32 %v2169_v8 }
 0x16c   :  { %v3886_v32 = vmul.f32 %v3774_v60, %v4416_v2  ;;  %v4417_v7 = vsub.f32 %v3405_v5, %v3642_v15  ;;  %v4418_v0 = vsub.f32 %v3419_v18, %v3642_v15  ;;  %2865 = vpow2.f32 %v2170_v34 }
 0x16d   :  { %v4419_v4 = vsub.f32 %v3397_v58, %v3642_v15  ;;  %v4420_v43 = vsub.f32 %v3412_v13, %v3642_v15  ;;  %v4421_v14 = vsub.f32 %v3445_v48, %v3642_v15  ;;  %2867 = vpow2.f32 %v2171_v29 }
 0x16e   :  { %v3892_v42 = vmul.f32 %v3774_v60, %v4417_v7  ;;  %v3898_v26 = vmul.f32 %v3774_v60, %v4418_v0  ;;  %v4422_v35 = vsub.f32 %v3459_v61, %v3642_v15  ;;  %v4423_v49 = vsub.f32 %v4364_v12, %v3642_v15 }
 0x16f   :  { %v3904_v37 = vmul.f32 %v3774_v60, %v4419_v4  ;;  %v3910_v5 = vmul.f32 %v3774_v60, %v4420_v43  ;;  %v3916_v18 = vmul.f32 %v3774_v60, %v4421_v14  ;;  %v4424_v8 = vsub.f32 %v4365_v16, %v3642_v15 }
 0x170   :  { %v3922_v58 = vmul.f32 %v3774_v60, %v4422_v35  ;;  %v3928_v13 = vmul.f32 %v3774_v60, %v4423_v49  ;;  %2869 = vpow2.f32 %v2172_v25  ;;  %v2176_v34 = vmul.f32 -1.442695, %v1193_v27  ;;  %v2854_v61 = vpop.eup %2853 }
 0x171   :  { %v3934_v48 = vmul.f32 %v3774_v60, %v4424_v8  ;;  %2871 = vpow2.f32 %v2173_v63  ;;  %v2177_v29 = vmul.f32 -1.442695, %v1194_v38  ;;  %v2178_v36 = vmul.f32 -1.442695, %v1195_v22  ;;  %v2856_v41 = vpop.eup %2855 }
 0x172   :  { %2873 = vpow2.f32 %v2174_v3  ;;  %v2179_v52 = vmul.f32 -1.442695, %v1196_v33  ;;  %v2858_v12 = vpop.eup %2857  ;;  %v1245_v51 = vadd.f32 1.0, %v2854_v61  ;;  %v1246_v2 = vadd.f32 1.0, %v2856_v41 }
 0x173   :  { %2875 = vpow2.f32 %v2175_v59  ;;  %v2860_v44 = vpop.eup %2859  ;;  %v1247_v7 = vadd.f32 1.0, %v2858_v12  ;;  %v4425_v27 = vsub.f32 %v4366_v39, %v3642_v15  ;;  %v4426_v33 = vsub.f32 %v4367_v23, %v3642_v15 }
 0x174   :  { %2877 = vpow2.f32 %v2176_v34  ;;  %v2862_v16 = vpop.eup %2861  ;;  %v1248_v22 = vadd.f32 1.0, %v2860_v44  ;;  %v4427_v3 = vsub.f32 %v4368_v28, %v3642_v15  ;;  %v4428_v4 = vsub.f32 %v4369_v56, %v3642_v15 }
 0x175   :  { %2879 = vpow2.f32 %v2177_v29  ;;  %v3940_v63 = vmul.f32 %v3774_v60, %v4425_v27  ;;  %v2864_v38 = vpop.eup %2863  ;;  %v3946_v25 = vmul.f32 %v3774_v60, %v4426_v33  ;;  %v1249_v39 = vadd.f32 1.0, %v2862_v16 }
 0x176   :  { %2881 = vpow2.f32 %v2178_v36  ;;  %v3952_v59 = vmul.f32 %v3774_v60, %v4427_v3  ;;  %v2866_v0 = vpop.eup %2865  ;;  %v3958_v43 = vmul.f32 %v3774_v60, %v4428_v4  ;;  %v4429_v23 = vsub.f32 %v4370_v30, %v3642_v15 }
 0x177   :  { %2883 = vpow2.f32 %v2179_v52  ;;  %v2868_v35 = vpop.eup %2867  ;;  %v1250_v28 = vadd.f32 1.0, %v2864_v38  ;;  %v4430_v49 = vsub.f32 %v3530_v20, %v3642_v15  ;;  %v4431_v56 = vsub.f32 %v3510_v31, %v3642_v15 }
 0x178   :  { %2885 = vrcp.f32 %v1245_v51  ;;  %v3964_v14 = vmul.f32 %v3774_v60, %v4429_v23  ;;  %v1251_v30 = vadd.f32 1.0, %v2866_v0  ;;  %v4432_v61 = vsub.f32 %v4371_v9, %v3642_v15 }
 0x179   :  { %2887 = vrcp.f32 %v1246_v2  ;;  %v3970_v8 = vmul.f32 %v3774_v60, %v4430_v49  ;;  %v3976_v34 = vmul.f32 %v3774_v60, %v4431_v56  ;;  %v4433_v20 = vsub.f32 %v4372_v45, %v3642_v15 }
 0x17a   :  { %v2870_v29 = vpop.eup %2869  ;;  %2889 = vrcp.f32 %v1247_v7  ;;  %v3982_v36 = vmul.f32 %v3774_v60, %v4432_v61  ;;  %v1252_v31 = vadd.f32 1.0, %v2868_v35  ;;  %v4434_v12 = vsub.f32 %v4373_v53, %v3642_v15 }
 0x17b   :  { %v3988_v41 = vmul.f32 %v3774_v60, %v4433_v20  ;;  %v2872_v52 = vpop.eup %2871  ;;  %2891 = vrcp.f32 %v1248_v22  ;;  %v4435_v9 = vsub.f32 %v4374_v46, %v3642_v15  ;;  %v1253_v45 = vadd.f32 1.0, %v2870_v29 }
 0x17c   :  { %v3994_v51 = vmul.f32 %v3774_v60, %v4434_v12  ;;  %v2874_v2 = vpop.eup %2873  ;;  %2893 = vrcp.f32 %v1249_v39  ;;  %v4436_v16 = vsub.f32 %v4375_v57, %v3642_v15  ;;  %v4437_v53 = vsub.f32 %v3596_v21, %v3642_v15 }
 0x17d   :  { %v4000_v44 = vmul.f32 %v3774_v60, %v4435_v9  ;;  %v2876_v38 = vpop.eup %2875  ;;  %v1254_v46 = vadd.f32 1.0, %v2872_v52  ;;  %2895 = vrcp.f32 %v1250_v28  ;;  %v4438_v22 = vsub.f32 %v4376_v17, %v3642_v15 }
 0x17e   :  { %v4006_v7 = vmul.f32 %v3774_v60, %v4436_v16  ;;  %v4012_v27 = vmul.f32 %v3774_v60, %v4437_v53  ;;  %v4439_v57 = vsub.f32 %v4377_v62, %v3642_v15  ;;  %v2878_v0 = vpop.eup %2877  ;;  %v1255_v21 = vadd.f32 1.0, %v2874_v2  ;;  %v4441_v53 = vld [vmem:[#allocation7_spill] sm:$0xff] }
 0x17f   :  { %v4018_v33 = vmul.f32 %v3774_v60, %v4438_v22  ;;  %2897 = vrcp.f32 %v1251_v30  ;;  %v4440_v39 = vsub.f32 %v3602_v10, %v3642_v15  ;;  %v2880_v23 = vpop.eup %2879  ;;  %v1256_v17 = vadd.f32 1.0, %v2876_v38 }
 0x180   :  { %v4024_v3 = vmul.f32 %v3774_v60, %v4439_v57  ;;  %2899 = vrcp.f32 %v1252_v31  ;;  %v2882_v35 = vpop.eup %2881  ;;  %v1257_v28 = vadd.f32 1.0, %v2878_v0  ;;  %v1258_v62 = vadd.f32 1.0, %v2880_v23 }
 0x181   :  { %v4030_v4 = vmul.f32 %v3774_v60, %v4440_v39  ;;  %2901 = vrcp.f32 %v1253_v45  ;;  %v2884_v49 = vpop.eup %2883  ;;  %v1259_v29 = vadd.f32 1.0, %v2882_v35  ;;  %v2196_v30 = vmul.f32 -1.442695, %v3844_v55 }
 0x182   :  { %2903 = vrcp.f32 %v1254_v46  ;;  %v2886_v56 = vpop.eup %2885  ;;  %v2197_v61 = vmul.f32 -1.442695, %v3850_v54  ;;  %v1260_v20 = vadd.f32 1.0, %v2884_v49  ;;  %v2198_v52 = vmul.f32 -1.442695, %v3856_v11  ;;  %v4451_v49 = vld [vmem:[#allocation17_spill] sm:$0xff] }
 0x183   :  { %2905 = vrcp.f32 %v1255_v21  ;;  %v2888_v10 = vpop.eup %2887  ;;  %v2199_v31 = vmul.f32 -1.442695, %v3862_v47  ;;  %v2200_v2 = vmul.f32 -1.442695, %v3868_v19  ;;  %v2201_v45 = vmul.f32 -1.442695, %v3874_v1 }
 0x184   :  { %2907 = vrcp.f32 %v1256_v17  ;;  %v2890_v12 = vpop.eup %2889  ;;  %v2407_v9 = vpack.c.bf16 %v2888_v10, %v2886_v56  ;;  %v2202_v55 = vmul.f32 -1.442695, %v3880_v6  ;;  %v2203_v54 = vmul.f32 -1.442695, %v3886_v32  ;;  %v4443_v1 = vld [vmem:[#allocation11_spill] sm:$0xff]  ;;  %v4445_v32 = vld [vmem:[#allocation5_spill] sm:$0xff] }
 0x185   :  { %2909 = vrcp.f32 %v1257_v28  ;;  %v2892_v16 = vpop.eup %2891  ;;  %v4442_v38 = vsub.f32 %v4441_v53, %v3642_v15  ;;  %v4444_v46 = vsub.f32 %v4443_v1, %v3642_v15  ;;  %v4446_v22 = vsub.f32 %v4445_v32, %v3642_v15  ;;  %v4447_v21 = vld [vmem:[#allocation9_spill] sm:$0xff]  ;;  %v4449_v17 = vld [vmem:[#allocation14_spill] sm:$0xff] }
 0x186   :  { %2911 = vrcp.f32 %v1258_v62  ;;  %v2894_v47 = vpop.eup %2893  ;;  %2408 = vst [vmem:[%s4274_s2] sm:$0xff] %v2407_v9   ;;  %v2412_v19 = vpack.c.bf16 %v2892_v16, %v2890_v12  ;;  %v4448_v39 = vsub.f32 %v4447_v21, %v3642_v15  ;;  %v4450_v35 = vsub.f32 %v4449_v17, %v3642_v15  ;;  %v4455_v16 = vld [vmem:[#allocation16_spill] sm:$0xff] }
 0x187   :  { %v4044_v11 = vmul.f32 %v3774_v60, %v4442_v38  ;;  %2913 = vrcp.f32 %v1259_v29  ;;  %v4053_v6 = vmul.f32 %v3774_v60, %v4444_v46  ;;  %v4059_v57 = vmul.f32 %v3774_v60, %v4446_v22  ;;  %v2896_v0 = vpop.eup %2895  ;;  %v4457_v46 = vld [vmem:[#allocation21_spill] sm:$0xff]  ;;  %v4462_v17 = vld [vmem:[#allocation28_spill] sm:$0xff] }
 0x188   :  { %2915 = vrcp.f32 %v1260_v20  ;;  %v4065_v23 = vmul.f32 %v3774_v60, %v4448_v39  ;;  %v4071_v28 = vmul.f32 %v3774_v60, %v4450_v35  ;;  %v4452_v62 = vsub.f32 %v4451_v49, %v3642_v15  ;;  %2564 = vst [vmem:[%s4274_s2 + $0x8] sm:$0xff] %v2412_v19   ;;  %v4453_v20 = vld [vmem:[#allocation12_spill] sm:$0xff] }
 0x189   :  { %v2898_v29 = vpop.eup %2897  ;;  %v2417_v10 = vpack.c.bf16 %v2896_v0, %v2894_v47  ;;  %2917 = vpow2.f32 %v2196_v30  ;;  %v4454_v12 = vsub.f32 %v4453_v20, %v3642_v15  ;;  %v4456_v53 = vsub.f32 %v4455_v16, %v3642_v15 }
 0x18a   :  { %v4077_v56 = vmul.f32 %v3774_v60, %v4452_v62  ;;  %v2900_v1 = vpop.eup %2899  ;;  %2919 = vpow2.f32 %v2197_v61  ;;  %v4458_v32 = vsub.f32 %v4457_v46, %v3642_v15  ;;  %v4459_v30 = vsub.f32 %v4387_v40, %v3642_v15  ;;  %v4464_v62 = vld [vmem:[#allocation31_spill] sm:$0xff] }
 0x18b   :  { %v4086_v9 = vmul.f32 %v3774_v60, %v4454_v12  ;;  %v4092_v38 = vmul.f32 %v3774_v60, %v4456_v53  ;;  %v4460_v22 = vsub.f32 %v4388_v50, %v3642_v15  ;;  %v2902_v21 = vpop.eup %2901  ;;  %2565 = vst [vmem:[%s4274_s2 + $0x10] sm:$0xff] %v2417_v10   ;;  %v2422_v61 = vpack.c.bf16 %v2900_v1, %v2898_v29  ;;  %v4468_v12 = vld [vmem:[#allocation29_spill] sm:$0xff] }
 0x18c   :  { %v4098_v47 = vmul.f32 %v3774_v60, %v4458_v32  ;;  %v4104_v19 = vmul.f32 %v3774_v60, %v4459_v30  ;;  %2921 = vpow2.f32 %v2198_v52  ;;  %v4461_v39 = vsub.f32 %v4389_v24, %v3642_v15  ;;  %v2904_v49 = vpop.eup %2903  ;;  %v4466_v52 = vld [vmem:[#allocation27_spill] sm:$0xff] }
 0x18d   :  { %v4110_v0 = vmul.f32 %v3774_v60, %v4460_v22  ;;  %v4463_v35 = vsub.f32 %v4462_v17, %v3642_v15  ;;  %2923 = vpow2.f32 %v2199_v31  ;;  %v4465_v20 = vsub.f32 %v4464_v62, %v3642_v15  ;;  %v2906_v1 = vpop.eup %2905  ;;  %2566 = vst [vmem:[%s4274_s2 + $0x18] sm:$0xff] %v2422_v61  }
 0x18e   :  { %v4119_v40 = vmul.f32 %v3774_v60, %v4461_v39  ;;  %v4467_v24 = vsub.f32 %v4466_v52, %v3642_v15  ;;  %v4469_v16 = vsub.f32 %v4468_v12, %v3642_v15  ;;  %v2427_v31 = vpack.c.bf16 %v2904_v49, %v2902_v21  ;;  %v2908_v32 = vpop.eup %2907 }
 0x18f   :  { %v4125_v50 = vmul.f32 %v3774_v60, %v4463_v35  ;;  %v4131_v29 = vmul.f32 %v3774_v60, %v4465_v20  ;;  %2925 = vpow2.f32 %v2200_v2  ;;  %v2204_v46 = vmul.f32 -1.442695, %v3892_v42  ;;  %v2910_v22 = vpop.eup %2909 }
 0x190   :  { %v4137_v10 = vmul.f32 %v3774_v60, %v4467_v24  ;;  %v4143_v53 = vmul.f32 %v3774_v60, %v4469_v16  ;;  %2927 = vpow2.f32 %v2201_v45  ;;  %v2205_v30 = vmul.f32 -1.442695, %v3898_v26  ;;  %2567 = vst [vmem:[%s4274_s2 + $0x20] sm:$0xff] %v2427_v31   ;;  %v2912_v39 = vpop.eup %2911 }
 0x191   :  { %v2432_v15 = vpack.c.bf16 %v2908_v32, %v2906_v1  ;;  %2929 = vpow2.f32 %v2202_v55  ;;  %v2206_v60 = vmul.f32 -1.442695, %v3904_v37  ;;  %v2207_v21 = vmul.f32 -1.442695, %v3910_v5  ;;  %v2914_v2 = vpop.eup %2913 }
 0x192   :  { %2931 = vpow2.f32 %v2203_v54  ;;  %v2437_v42 = vpack.c.bf16 %v2912_v39, %v2910_v22  ;;  %v2208_v26 = vmul.f32 -1.442695, %v3916_v18  ;;  %v2916_v45 = vpop.eup %2915  ;;  %v2209_v61 = vmul.f32 -1.442695, %v3922_v58 }
 0x193   :  { %2568 = vst [vmem:[%s4274_s2 + $0x28] sm:$0xff] %v2432_v15   ;;  %2933 = vpow2.f32 %v2204_v46  ;;  %v2918_v55 = vpop.eup %2917  ;;  %v2442_v37 = vpack.c.bf16 %v2916_v45, %v2914_v2  ;;  %v2210_v5 = vmul.f32 -1.442695, %v3928_v13  ;;  %v2211_v17 = vmul.f32 -1.442695, %v3934_v48 }
 0x194   :  { %2935 = vpow2.f32 %v2205_v30  ;;  %2569 = vst [vmem:[%s4274_s2 + $0x30] sm:$0xff] %v2437_v42   ;;  %v2920_v54 = vpop.eup %2919  ;;  %v1453_v18 = vadd.f32 1.0, %v2918_v55 }
 0x195   :  { %2937 = vpow2.f32 %v2206_v60  ;;  %2570 = vst [vmem:[%s4274_s2 + $0x38] sm:$0xff] %v2442_v37   ;;  %v1454_v49 = vadd.f32 1.0, %v2920_v54 }
 0x196   :  { %2939 = vpow2.f32 %v2207_v21  ;;  %v2922_v35 = vpop.eup %2921 }
 0x197   :  { %2941 = vpow2.f32 %v2208_v26  ;;  %v2924_v58 = vpop.eup %2923  ;;  %v1455_v20 = vadd.f32 1.0, %v2922_v35 }
 0x198   :  { %2943 = vpow2.f32 %v2209_v61  ;;  %v1456_v13 = vadd.f32 1.0, %v2924_v58  ;;  %v2244_v58 = vmul.f32 -1.442695, %v3940_v63 }
 0x199   :  { %v2926_v62 = vpop.eup %2925  ;;  %2945 = vpow2.f32 %v2210_v5 }
 0x19a   :  { %v2928_v52 = vpop.eup %2927  ;;  %2947 = vpow2.f32 %v2211_v17  ;;  %v1457_v12 = vadd.f32 1.0, %v2926_v62  ;;  %v2245_v62 = vmul.f32 -1.442695, %v3946_v25  ;;  %v2248_v25 = vmul.f32 -1.442695, %v3964_v14 }
 0x19b   :  { %v2930_v24 = vpop.eup %2929  ;;  %2949 = vrcp.f32 %v1453_v18  ;;  %v1458_v16 = vadd.f32 1.0, %v2928_v52 }
 0x19c   :  { %v2932_v48 = vpop.eup %2931  ;;  %2951 = vrcp.f32 %v1454_v49  ;;  %v1459_v31 = vadd.f32 1.0, %v2930_v24 }
 0x19d   :  { %v2934_v1 = vpop.eup %2933  ;;  %2953 = vrcp.f32 %v1455_v20  ;;  %v1460_v32 = vadd.f32 1.0, %v2932_v48 }
 0x19e   :  { %v2936_v46 = vpop.eup %2935  ;;  %2955 = vrcp.f32 %v1456_v13  ;;  %v1461_v22 = vadd.f32 1.0, %v2934_v1  ;;  %v2246_v13 = vmul.f32 -1.442695, %v3952_v59  ;;  %v2249_v1 = vmul.f32 -1.442695, %v3970_v8 }
 0x19f   :  { %v2938_v30 = vpop.eup %2937  ;;  %2957 = vrcp.f32 %v1457_v12  ;;  %v1462_v60 = vadd.f32 1.0, %v2936_v46  ;;  %v2247_v12 = vmul.f32 -1.442695, %v3958_v43  ;;  %v2250_v43 = vmul.f32 -1.442695, %v3976_v34 }
 0x1a0   :  { %v2940_v15 = vpop.eup %2939  ;;  %2959 = vrcp.f32 %v1458_v16  ;;  %v1463_v21 = vadd.f32 1.0, %v2938_v30  ;;  %v2252_v8 = vmul.f32 -1.442695, %v3988_v41 }
 0x1a1   :  { %v2942_v39 = vpop.eup %2941  ;;  %2961 = vrcp.f32 %v1459_v31  ;;  %v1464_v42 = vadd.f32 1.0, %v2940_v15  ;;  %v2253_v15 = vmul.f32 -1.442695, %v3994_v51  ;;  %v2256_v51 = vmul.f32 -1.442695, %v4012_v27 }
 0x1a2   :  { %v2944_v2 = vpop.eup %2943  ;;  %2963 = vrcp.f32 %v1460_v32  ;;  %v1465_v45 = vadd.f32 1.0, %v2942_v39  ;;  %v2251_v32 = vmul.f32 -1.442695, %v3982_v36  ;;  %v2254_v36 = vmul.f32 -1.442695, %v4000_v44 }
 0x1a3   :  { %v2946_v26 = vpop.eup %2945  ;;  %2965 = vrcp.f32 %v1461_v22  ;;  %v1466_v55 = vadd.f32 1.0, %v2944_v2 }
 0x1a4   :  { %v2948_v61 = vpop.eup %2947  ;;  %2967 = vrcp.f32 %v1462_v60  ;;  %v1467_v5 = vadd.f32 1.0, %v2946_v26  ;;  %v2257_v26 = vmul.f32 -1.442695, %v4018_v33 }
 0x1a5   :  { %v2950_v37 = vpop.eup %2949  ;;  %2969 = vrcp.f32 %v1463_v21  ;;  %v1468_v17 = vadd.f32 1.0, %v2948_v61  ;;  %v2255_v21 = vmul.f32 -1.442695, %v4006_v7  ;;  %v2258_v7 = vmul.f32 -1.442695, %v4024_v3 }
 0x1a6   :  { %v2952_v54 = vpop.eup %2951  ;;  %2971 = vrcp.f32 %v1464_v42 }
 0x1a7   :  { %v2954_v35 = vpop.eup %2953  ;;  %2973 = vrcp.f32 %v1465_v45  ;;  %v2447_v18 = vpack.c.bf16 %v2952_v54, %v2950_v37 }
 0x1a8   :  { %v2956_v49 = vpop.eup %2955  ;;  %2975 = vrcp.f32 %v1466_v55  ;;  %v2259_v55 = vmul.f32 -1.442695, %v4030_v4 }
 0x1a9   :  { %v2958_v20 = vpop.eup %2957  ;;  %2977 = vrcp.f32 %v1467_v5  ;;  %2571 = vst [vmem:[%s4274_s2 + $0x40] sm:$0xff] %v2447_v18   ;;  %v2452_v52 = vpack.c.bf16 %v2956_v49, %v2954_v35 }
 0x1aa   :  { %v2960_v24 = vpop.eup %2959  ;;  %2979 = vrcp.f32 %v1468_v17 }
 0x1ab   :  { %v2962_v48 = vpop.eup %2961  ;;  %2572 = vst [vmem:[%s4274_s2 + $0x48] sm:$0xff] %v2452_v52   ;;  %v2457_v63 = vpack.c.bf16 %v2960_v24, %v2958_v20  ;;  %2981 = vpow2.f32 %v2244_v58 }
 0x1ac   :  { %v2964_v16 = vpop.eup %2963  ;;  %2983 = vpow2.f32 %v2245_v62 }
 0x1ad   :  { %v2966_v31 = vpop.eup %2965  ;;  %2573 = vst [vmem:[%s4274_s2 + $0x50] sm:$0xff] %v2457_v63   ;;  %v2462_v59 = vpack.c.bf16 %v2964_v16, %v2962_v48  ;;  %2985 = vpow2.f32 %v2246_v13 }
 0x1ae   :  { %v2968_v46 = vpop.eup %2967  ;;  %2987 = vpow2.f32 %v2247_v12 }
 0x1af   :  { %v2970_v30 = vpop.eup %2969  ;;  %2574 = vst [vmem:[%s4274_s2 + $0x58] sm:$0xff] %v2462_v59   ;;  %v2467_v14 = vpack.c.bf16 %v2968_v46, %v2966_v31  ;;  %2989 = vpow2.f32 %v2248_v25 }
 0x1b0   :  { %v2972_v22 = vpop.eup %2971  ;;  %2991 = vpow2.f32 %v2249_v1 }
 0x1b1   :  { %v2974_v60 = vpop.eup %2973  ;;  %2575 = vst [vmem:[%s4274_s2 + $0x60] sm:$0xff] %v2467_v14   ;;  %v2472_v34 = vpack.c.bf16 %v2972_v22, %v2970_v30  ;;  %2993 = vpow2.f32 %v2250_v43 }
 0x1b2   :  { %v2976_v39 = vpop.eup %2975  ;;  %2995 = vpow2.f32 %v2251_v32 }
 0x1b3   :  { %v2978_v2 = vpop.eup %2977  ;;  %2576 = vst [vmem:[%s4274_s2 + $0x68] sm:$0xff] %v2472_v34   ;;  %v2477_v41 = vpack.c.bf16 %v2976_v39, %v2974_v60  ;;  %2997 = vpow2.f32 %v2252_v8  ;;  %v2292_v34 = vmul.f32 -1.442695, %v4044_v11  ;;  %v2293_v39 = vmul.f32 -1.442695, %v4053_v6 }
 0x1b4   :  { %v2980_v42 = vpop.eup %2979  ;;  %2999 = vpow2.f32 %v2253_v15  ;;  %v2296_v6 = vmul.f32 -1.442695, %v4071_v28 }
 0x1b5   :  { %v2982_v45 = vpop.eup %2981  ;;  %2577 = vst [vmem:[%s4274_s2 + $0x70] sm:$0xff] %v2477_v41   ;;  %v2482_v44 = vpack.c.bf16 %v2980_v42, %v2978_v2  ;;  %3001 = vpow2.f32 %v2254_v36  ;;  %v2294_v41 = vmul.f32 -1.442695, %v4059_v57  ;;  %v2295_v42 = vmul.f32 -1.442695, %v4065_v23 }
 0x1b6   :  { %v2984_v61 = vpop.eup %2983  ;;  %3003 = vpow2.f32 %v2255_v21  ;;  %v1662_v27 = vadd.f32 1.0, %v2982_v45  ;;  %v2298_v23 = vmul.f32 -1.442695, %v4086_v9 }
 0x1b7   :  { %v2986_v37 = vpop.eup %2985  ;;  %2578 = vst [vmem:[%s4274_s2 + $0x78] sm:$0xff] %v2482_v44   ;;  %3005 = vpow2.f32 %v2256_v51  ;;  %v1663_v5 = vadd.f32 1.0, %v2984_v61  ;;  %v2297_v44 = vmul.f32 -1.442695, %v4077_v56  ;;  %v2300_v56 = vmul.f32 -1.442695, %v4098_v47 }
 0x1b8   :  { %v2988_v33 = vpop.eup %2987  ;;  %3007 = vpow2.f32 %v2257_v26  ;;  %v1664_v17 = vadd.f32 1.0, %v2986_v37 }
 0x1b9   :  { %v2990_v54 = vpop.eup %2989  ;;  %3009 = vpow2.f32 %v2258_v7  ;;  %v1665_v3 = vadd.f32 1.0, %v2988_v33  ;;  %v2301_v33 = vmul.f32 -1.442695, %v4104_v19  ;;  %v2304_v19 = vmul.f32 -1.442695, %v4125_v50 }
 0x1ba   :  { %v2992_v35 = vpop.eup %2991  ;;  %3011 = vpow2.f32 %v2259_v55  ;;  %v1666_v58 = vadd.f32 1.0, %v2990_v54  ;;  %v2299_v55 = vmul.f32 -1.442695, %v4092_v38  ;;  %v2302_v38 = vmul.f32 -1.442695, %v4110_v0 }
 0x1bb   :  { %v2994_v18 = vpop.eup %2993  ;;  %3013 = vrcp.f32 %v1662_v27  ;;  %v1667_v49 = vadd.f32 1.0, %v2992_v35 }
 0x1bc   :  { %v2996_v4 = vpop.eup %2995  ;;  %3015 = vrcp.f32 %v1663_v5  ;;  %v1668_v20 = vadd.f32 1.0, %v2994_v18  ;;  %v2305_v18 = vmul.f32 -1.442695, %v4131_v29 }
 0x1bd   :  { %v2998_v62 = vpop.eup %2997  ;;  %3017 = vrcp.f32 %v1664_v17  ;;  %v1669_v13 = vadd.f32 1.0, %v2996_v4  ;;  %v2303_v17 = vmul.f32 -1.442695, %v4119_v40  ;;  %v2306_v40 = vmul.f32 -1.442695, %v4137_v10 }
 0x1be   :  { %v3000_v52 = vpop.eup %2999  ;;  %3019 = vrcp.f32 %v1665_v3  ;;  %v1670_v12 = vadd.f32 1.0, %v2998_v62 }
 0x1bf   :  { %v3002_v24 = vpop.eup %3001  ;;  %3021 = vrcp.f32 %v1666_v58  ;;  %v1671_v63 = vadd.f32 1.0, %v3000_v52 }
 0x1c0   :  { %v3004_v48 = vpop.eup %3003  ;;  %3023 = vrcp.f32 %v1667_v49  ;;  %v1672_v16 = vadd.f32 1.0, %v3002_v24  ;;  %v2307_v49 = vmul.f32 -1.442695, %v4143_v53 }
 0x1c1   :  { %v3006_v25 = vpop.eup %3005  ;;  %3025 = vrcp.f32 %v1668_v20  ;;  %v1673_v31 = vadd.f32 1.0, %v3004_v48 }
 0x1c2   :  { %v3008_v1 = vpop.eup %3007  ;;  %3027 = vrcp.f32 %v1669_v13  ;;  %v1674_v43 = vadd.f32 1.0, %v3006_v25 }
 0x1c3   :  { %v3010_v59 = vpop.eup %3009  ;;  %3029 = vrcp.f32 %v1670_v12  ;;  %v1675_v32 = vadd.f32 1.0, %v3008_v1 }
 0x1c4   :  { %v3012_v46 = vpop.eup %3011  ;;  %3031 = vrcp.f32 %v1671_v63  ;;  %v1676_v14 = vadd.f32 1.0, %v3010_v59 }
 0x1c5   :  { %v3014_v30 = vpop.eup %3013  ;;  %3033 = vrcp.f32 %v1672_v16  ;;  %v1677_v22 = vadd.f32 1.0, %v3012_v46 }
 0x1c6   :  { %v3016_v8 = vpop.eup %3015  ;;  %3035 = vrcp.f32 %v1673_v31 }
 0x1c7   :  { %v3018_v15 = vpop.eup %3017  ;;  %3037 = vrcp.f32 %v1674_v43  ;;  %v2487_v60 = vpack.c.bf16 %v3016_v8, %v3014_v30 }
 0x1c8   :  { %v3020_v36 = vpop.eup %3019  ;;  %3039 = vrcp.f32 %v1675_v32 }
 0x1c9   :  { %v3022_v21 = vpop.eup %3021  ;;  %3041 = vrcp.f32 %v1676_v14  ;;  %2579 = vst [vmem:[%s4274_s2 + $0x80] sm:$0xff] %v2487_v60   ;;  %v2492_v2 = vpack.c.bf16 %v3020_v36, %v3018_v15 }
 0x1ca   :  { %v3024_v51 = vpop.eup %3023  ;;  %3043 = vrcp.f32 %v1677_v22 }
 0x1cb   :  { %v3026_v26 = vpop.eup %3025  ;;  %2580 = vst [vmem:[%s4274_s2 + $0x88] sm:$0xff] %v2492_v2   ;;  %v2497_v11 = vpack.c.bf16 %v3024_v51, %v3022_v21  ;;  %3045 = vpow2.f32 %v2292_v34 }
 0x1cc   :  { %v3028_v45 = vpop.eup %3027  ;;  %3047 = vpow2.f32 %v2293_v39 }
 0x1cd   :  { %v3030_v7 = vpop.eup %3029  ;;  %2581 = vst [vmem:[%s4274_s2 + $0x90] sm:$0xff] %v2497_v11   ;;  %v2502_v57 = vpack.c.bf16 %v3028_v45, %v3026_v26  ;;  %3049 = vpow2.f32 %v2294_v41 }
 0x1ce   :  { %v3032_v61 = vpop.eup %3031  ;;  %3051 = vpow2.f32 %v2295_v42 }
 0x1cf   :  { %v3034_v37 = vpop.eup %3033  ;;  %2582 = vst [vmem:[%s4274_s2 + $0x98] sm:$0xff] %v2502_v57   ;;  %v2507_v28 = vpack.c.bf16 %v3032_v61, %v3030_v7  ;;  %3053 = vpow2.f32 %v2296_v6 }
 0x1d0   :  { %v3036_v27 = vpop.eup %3035  ;;  %3055 = vpow2.f32 %v2297_v44 }
 0x1d1   :  { %v3038_v5 = vpop.eup %3037  ;;  %2583 = vst [vmem:[%s4274_s2 + $0xa0] sm:$0xff] %v2507_v28   ;;  %v2512_v9 = vpack.c.bf16 %v3036_v27, %v3034_v37  ;;  %3057 = vpow2.f32 %v2298_v23 }
 0x1d2   :  { %v3040_v54 = vpop.eup %3039  ;;  %3059 = vpow2.f32 %v2299_v55 }
 0x1d3   :  { %v3042_v35 = vpop.eup %3041  ;;  %2584 = vst [vmem:[%s4274_s2 + $0xa8] sm:$0xff] %v2512_v9   ;;  %v2517_v47 = vpack.c.bf16 %v3040_v54, %v3038_v5  ;;  %3061 = vpow2.f32 %v2300_v56 }
 0x1d4   :  { %v3044_v3 = vpop.eup %3043  ;;  %3063 = vpow2.f32 %v2301_v33 }
 0x1d5   :  { %v3046_v58 = vpop.eup %3045  ;;  %2585 = vst [vmem:[%s4274_s2 + $0xb0] sm:$0xff] %v2517_v47   ;;  %v2522_v0 = vpack.c.bf16 %v3044_v3, %v3042_v35  ;;  %3065 = vpow2.f32 %v2302_v38 }
 0x1d6   :  { %v3048_v4 = vpop.eup %3047  ;;  %3067 = vpow2.f32 %v2303_v17  ;;  %v1871_v50 = vadd.f32 1.0, %v3046_v58 }
 0x1d7   :  { %v3050_v62 = vpop.eup %3049  ;;  %2586 = vst [vmem:[%s4274_s2 + $0xb8] sm:$0xff] %v2522_v0   ;;  %3069 = vpow2.f32 %v2304_v19  ;;  %v1872_v20 = vadd.f32 1.0, %v3048_v4 }
 0x1d8   :  { %v3052_v29 = vpop.eup %3051  ;;  %3071 = vpow2.f32 %v2305_v18  ;;  %v1873_v13 = vadd.f32 1.0, %v3050_v62 }
 0x1d9   :  { %v3054_v52 = vpop.eup %3053  ;;  %3073 = vpow2.f32 %v2306_v40  ;;  %v1874_v10 = vadd.f32 1.0, %v3052_v29 }
 0x1da   :  { %v3056_v24 = vpop.eup %3055  ;;  %3075 = vpow2.f32 %v2307_v49  ;;  %v1875_v48 = vadd.f32 1.0, %v3054_v52 }
 0x1db   :  { %v3058_v12 = vpop.eup %3057  ;;  %3077 = vrcp.f32 %v1871_v50  ;;  %v1876_v63 = vadd.f32 1.0, %v3056_v24 }
 0x1dc   :  { %v3060_v53 = vpop.eup %3059  ;;  %3079 = vrcp.f32 %v1872_v20  ;;  %v1877_v16 = vadd.f32 1.0, %v3058_v12 }
 0x1dd   :  { %v3062_v25 = vpop.eup %3061  ;;  %3081 = vrcp.f32 %v1873_v13  ;;  %v1878_v31 = vadd.f32 1.0, %v3060_v53 }
 0x1de   :  { %v3064_v1 = vpop.eup %3063  ;;  %3083 = vrcp.f32 %v1874_v10  ;;  %v1879_v43 = vadd.f32 1.0, %v3062_v25 }
 0x1df   :  { %v3066_v59 = vpop.eup %3065  ;;  %3085 = vrcp.f32 %v1875_v48  ;;  %v1880_v32 = vadd.f32 1.0, %v3064_v1 }
 0x1e0   :  { %v3068_v46 = vpop.eup %3067  ;;  %3087 = vrcp.f32 %v1876_v63  ;;  %v1881_v14 = vadd.f32 1.0, %v3066_v59 }
 0x1e1   :  { %v3070_v30 = vpop.eup %3069  ;;  %3089 = vrcp.f32 %v1877_v16  ;;  %v1882_v22 = vadd.f32 1.0, %v3068_v46 }
 0x1e2   :  { %v3072_v8 = vpop.eup %3071  ;;  %3091 = vrcp.f32 %v1878_v31  ;;  %v1883_v60 = vadd.f32 1.0, %v3070_v30 }
 0x1e3   :  { %v3074_v15 = vpop.eup %3073  ;;  %3093 = vrcp.f32 %v1879_v43  ;;  %v1884_v36 = vadd.f32 1.0, %v3072_v8 }
 0x1e4   :  { %v3076_v34 = vpop.eup %3075  ;;  %3095 = vrcp.f32 %v1880_v32  ;;  %v1885_v21 = vadd.f32 1.0, %v3074_v15 }
 0x1e5   :  { %v3078_v39 = vpop.eup %3077  ;;  %3097 = vrcp.f32 %v1881_v14  ;;  %v1886_v41 = vadd.f32 1.0, %v3076_v34 }
 0x1e6   :  { %v3080_v2 = vpop.eup %3079  ;;  %3099 = vrcp.f32 %v1882_v22 }
 0x1e7   :  { %v3082_v51 = vpop.eup %3081  ;;  %3101 = vrcp.f32 %v1883_v60  ;;  %v2527_v42 = vpack.c.bf16 %v3080_v2, %v3078_v39 }
 0x1e8   :  { %v3084_v26 = vpop.eup %3083  ;;  %3103 = vrcp.f32 %v1884_v36 }
 0x1e9   :  { %v3086_v11 = vpop.eup %3085  ;;  %3105 = vrcp.f32 %v1885_v21  ;;  %2587 = vst [vmem:[%s4274_s2 + $0xc0] sm:$0xff] %v2527_v42   ;;  %v2532_v6 = vpack.c.bf16 %v3084_v26, %v3082_v51 }
 0x1ea   :  { %v3088_v45 = vpop.eup %3087  ;;  %3107 = vrcp.f32 %v1886_v41 }
 0x1eb   :  { %v3090_v44 = vpop.eup %3089  ;;  %2588 = vst [vmem:[%s4274_s2 + $0xc8] sm:$0xff] %v2532_v6   ;;  %v2537_v7 = vpack.c.bf16 %v3088_v45, %v3086_v11 }
 0x1ec   :  { %v3092_v57 = vpop.eup %3091 }
 0x1ed   :  { %v3094_v23 = vpop.eup %3093  ;;  %2589 = vst [vmem:[%s4274_s2 + $0xd0] sm:$0xff] %v2537_v7   ;;  %v2542_v61 = vpack.c.bf16 %v3092_v57, %v3090_v44 }
 0x1ee   :  { %v3096_v55 = vpop.eup %3095 }
 0x1ef   :  { %v3098_v37 = vpop.eup %3097  ;;  %2590 = vst [vmem:[%s4274_s2 + $0xd8] sm:$0xff] %v2542_v61   ;;  %v2547_v28 = vpack.c.bf16 %v3096_v55, %v3094_v23 }
 0x1f0   :  { %v3100_v56 = vpop.eup %3099 }
 0x1f1   :  { %v3102_v27 = vpop.eup %3101  ;;  %2591 = vst [vmem:[%s4274_s2 + $0xe0] sm:$0xff] %v2547_v28   ;;  %v2552_v33 = vpack.c.bf16 %v3100_v56, %v3098_v37 }
 0x1f2   :  { %v3104_v5 = vpop.eup %3103 }
 0x1f3   :  { %v3106_v9 = vpop.eup %3105  ;;  %2592 = vst [vmem:[%s4274_s2 + $0xe8] sm:$0xff] %v2552_v33   ;;  %v2557_v38 = vpack.c.bf16 %v3104_v5, %v3102_v27 }
 0x1f4   :  { %v3108_v54 = vpop.eup %3107 }
 0x1f5   :  { %2593 = vst [vmem:[%s4274_s2 + $0xf0] sm:$0xff] %v2557_v38   ;;  %v2562_v17 = vpack.c.bf16 %v3108_v54, %v3106_v9 }
 0x1f7   :  { %2594 = vst [vmem:[%s4274_s2 + $0xf8] sm:$0xff] %v2562_v17  }

</bundles_post_ra>
